<compile_context>
chip_gen: v7x
topology: tpu7x:2x2x1
jax: 0.10.0
libtpu: 0.0.40
codegen_flags: <defaults>
</compile_context>

<pallas_src>
import functools

import jax
import jax.numpy as jnp
import numpy as np
from jax import lax
from jax.experimental import pallas as pl
from jax.experimental.pallas import tpu as pltpu


# ----------------------------------------------------------------------------
# AOT probe: does this build accept pipeline_mode=pl.Buffered(1)?  Lower and
# compile a tiny dedicated kernel once (no execution) instead of compiling and
# running the real kernel and swallowing its errors.
# ----------------------------------------------------------------------------
@functools.lru_cache(maxsize=1)
def _buffered_one_supported():
    try:
        def k(x_ref, o_ref):
            o_ref[...] = x_ref[...] * 2.0

        f = pl.pallas_call(
            k,
            out_shape=jax.ShapeDtypeStruct((16, 128), jnp.float32),
            grid_spec=pltpu.PrefetchScalarGridSpec(
                num_scalar_prefetch=0,
                grid=(2,),
                in_specs=[pl.BlockSpec((8, 128), lambda i: (0, 0),
                                       pipeline_mode=pl.Buffered(1))],
                out_specs=pl.BlockSpec((8, 128), lambda i: (i, 0))))
        jax.jit(f).lower(jax.ShapeDtypeStruct((8, 128), jnp.float32)).compile()
        return True
    except Exception:   # probe only exercises the Buffered(1) feature
        return False


# ----------------------------------------------------------------------------
# Pallas kernel: one (direction, time-chunk) grid step of a fused
# bidirectional LSTM layer.  Direction is the outer "parallel" axis; the time
# chunk axis is "arbitrary" and carries the h/c state in VMEM scratch.
# ----------------------------------------------------------------------------
def _bilstm_layer_kernel(Tp, TC, lengths_ref, gx_ref, whh_ref, h0_ref, c0_ref,
                         y_ref, h_scr, c_scr):
    d = pl.program_id(0)                       # 0 = forward, 1 = reverse
    c = pl.program_id(1)                       # time-chunk index
    H = h_scr.shape[-1]

    @pl.when(c == 0)
    def _():
        h_scr[...] = h0_ref[...]
        c_scr[...] = c0_ref[...]

    whh = whh_ref[...]                         # (H, 4H) bf16, once per chunk
    lengths = lengths_ref[...]                 # (B, 1) i32, once per chunk
    base = c * TC

    # TODO(synk): use pltpu.matmul_push_rhs/acc_lhs/pop here to keep W_hh
    # resident in the MXU across the unrolled steps (removes the per-step
    # weight re-push, the dominant per-step MXU cost at small batch).
    def step(i, carry):
        h_prev, c_prev = carry
        s = base + i                           # processing-order step
        time = s + d * (Tp - 1 - 2 * s)        # absolute timestep (rev flips)
        gx = gx_ref[i].astype(jnp.float32)     # (B, 4H) precomputed x@W_ih+b
        gates = gx + jnp.dot(h_prev.astype(whh.dtype), whh,
                             preferred_element_type=jnp.float32)
        # f32 gate math (v5e has no bf16 VPU/EUP); on v6e/v7x the
        # sigmoid/tanh could run in bf16 for ~2x EUP throughput.
        i_g = jax.nn.sigmoid(gates[:, 0 * H:1 * H])
        f_g = jax.nn.sigmoid(gates[:, 1 * H:2 * H])
        g_g = jnp.tanh(gates[:, 2 * H:3 * H])
        o_g = jax.nn.sigmoid(gates[:, 3 * H:4 * H])
        c_new = f_g * c_prev + i_g * g_g
        h_new = o_g * jnp.tanh(c_new)
        mask = time < lengths                  # (B, 1), broadcasts over H
        row = i + d * (TC - 1 - 2 * i)         # reverse dir writes reversed
        y_ref[row] = jnp.where(mask, h_new, 0.0).astype(y_ref.dtype)
        return (jnp.where(mask, h_new, h_prev),
                jnp.where(mask, c_new, c_prev))

    h_fin, c_fin = lax.fori_loop(0, TC, step, (h_scr[...], c_scr[...]),
                                 unroll=True)
    h_scr[...] = h_fin
    c_scr[...] = c_fin


def _bilstm_layer(gx, whh, h0, c0, lengths2d, *, TC, out_dtype,
                  single_buffer=None):
    """One fused bidirectional LSTM layer.

    gx:        (2, Tp, B, 4H) bf16  precomputed x @ W_ih + b per direction
               (reverse direction pre-reversed + front-padded in time)
    whh:       (2, H, 4H)     bf16  recurrent weights
    h0 / c0:   (2, B, H)      f32   initial state (broadcast over batch)
    lengths2d: (B, 1)         i32
    returns    (Tp, B, 2H)    out_dtype  [forward | reverse] along last dim
    """
    _, Tp, B, G = gx.shape
    H = G // 4
    NT = Tp // TC
    assert NT * TC == Tp

    if single_buffer is None:
        single_buffer = _buffered_one_supported()
    # Single-buffer the time-invariant operands (pure VMEM saving; matters at
    # large H on v7x's 64 MiB VMEM).
    inv = dict(pipeline_mode=pl.Buffered(1)) if single_buffer else {}

    in_specs = [
        pl.BlockSpec((B, 1), lambda d, c: (0, 0), **inv),                  # lengths
        pl.BlockSpec((None, TC, B, 4 * H), lambda d, c: (d, c, 0, 0)),     # gx chunk
        pl.BlockSpec((None, H, 4 * H), lambda d, c: (d, 0, 0), **inv),     # W_hh
        pl.BlockSpec((None, B, H), lambda d, c: (d, 0, 0), **inv),         # h0
        pl.BlockSpec((None, B, H), lambda d, c: (d, 0, 0), **inv),         # c0
    ]

    # Fused (Tp, B, 2H) output needs a lane-aligned per-direction half.
    fused_out = (H % 128 == 0)
    if fused_out:
        out_shape = jax.ShapeDtypeStruct((Tp, B, 2 * H), out_dtype)
        out_spec = pl.BlockSpec(
            (TC, B, H), lambda d, c: (c + d * (NT - 1 - 2 * c), 0, d))
    else:
        # Fallback layout: stack directions along time; concat in the wrapper.
        out_shape = jax.ShapeDtypeStruct((2 * Tp, B, H), out_dtype)
        out_spec = pl.BlockSpec(
            (TC, B, H), lambda d, c: (d * NT + c + d * (NT - 1 - 2 * c), 0, 0))

    # VMEM budget: streamed chunks double-buffered, invariants single/double,
    # plus the h/c scratch.  2x headroom, capped at 48 MiB so the same tiling
    # leaves headroom on v7x (64 MiB physical VMEM).
    inv_bufs = 1 if single_buffer else 2
    out_itemsize = jnp.dtype(out_dtype).itemsize
    footprint = (
        2 * TC * B * 4 * H * gx.dtype.itemsize        # gx chunk (2 buffers)
        + 2 * TC * B * H * out_itemsize               # y chunk (2 buffers)
        + inv_bufs * H * 4 * H * whh.dtype.itemsize   # W_hh
        + inv_bufs * 2 * B * H * 4                    # h0 / c0
        + inv_bufs * B * 4                            # lengths
        + 2 * B * H * 4                               # h / c scratch
    )
    vmem_limit = int(min(48 * 1024 * 1024,
                         max(32 * 1024 * 1024, 2 * footprint)))

    out = pl.pallas_call(
        functools.partial(_bilstm_layer_kernel, Tp, TC),
        out_shape=out_shape,
        grid_spec=pltpu.PrefetchScalarGridSpec(
            num_scalar_prefetch=0,
            grid=(2, NT),                              # (direction, chunk)
            in_specs=in_specs,
            out_specs=out_spec,
            scratch_shapes=[pltpu.VMEM((B, H), jnp.float32),   # h carry
                            pltpu.VMEM((B, H), jnp.float32)],  # c carry
        ),
        compiler_params=pltpu.CompilerParams(
            dimension_semantics=("parallel", "arbitrary"),
            vmem_limit_bytes=vmem_limit),
    )(lengths2d, gx, whh, h0, c0)

    if fused_out:
        return out
    return jnp.concatenate([out[:Tp], out[Tp:]], axis=-1)


# ----------------------------------------------------------------------------
# Wrapper mirroring LSTMEncoder.forward
# ----------------------------------------------------------------------------
def lstm_encoder_forward(inputs, lengths, params, init_state, hidden_size,
                         layers_num, compute_dtype=jnp.bfloat16,
                         stream_dtype=jnp.bfloat16, time_chunk=16,
                         single_buffer=None):
    B, T, _ = inputs.shape
    H = hidden_size

    # init_state: (2*2*L, 1, H); module: cell = first half, hidden = second half
    half = init_state.shape[0] // 2
    cell_init = init_state[:half]      # (2L, 1, H)
    hidden_init = init_state[half:]    # (2L, 1, H)

    x = jnp.transpose(inputs, (1, 0, 2))                         # (T, B, D)
    lengths2d = lengths.astype(jnp.int32).reshape(B, 1)

    # Time chunk: bounded so the fully-unrolled in-kernel loop stays small;
    # time is padded up to a multiple of TC (padded steps are length-masked).
    TC = max(1, min(time_chunk, T))
    NT = -(-T // TC)
    Tp = NT * TC
    pad = Tp - T

    for layer in range(layers_num):
        last = layer == layers_num - 1
        D = x.shape[-1]
        x_c = x.reshape(T * B, D).astype(compute_dtype)

        # Hoisted input projection for BOTH directions as one MXU matmul
        # (T*B, D) x (D, 8H) with f32 accumulation, rounded to the bf16 HBM
        # stream (gx dominates HBM traffic).
        # TODO(synk): compute this per-chunk inside the kernel instead to
        # remove the gx HBM round trip entirely.
        w_cat = jnp.concatenate([params[layer][0][0], params[layer][1][0]],
                                axis=1).astype(compute_dtype)
        b_cat = jnp.concatenate([params[layer][0][2], params[layer][1][2]],
                                axis=1).astype(jnp.float32)
        g_all = (jnp.dot(x_c, w_cat, preferred_element_type=jnp.float32)
                 + b_cat).astype(stream_dtype).reshape(T, B, 8 * H)
        g_fwd, g_rev = g_all[:, :, :4 * H], g_all[:, :, 4 * H:]
        if pad:
            zpad = jnp.zeros((pad, B, 4 * H), stream_dtype)
            g_fwd = jnp.concatenate([g_fwd, zpad], axis=0)
            g_rev = jnp.concatenate([g_rev, zpad], axis=0)
        # Pre-reverse the reverse direction so both directions stream chunks
        # forward; padded (length-masked) steps land at the front of rev.
        gx = jnp.stack([g_fwd, g_rev[::-1]], axis=0)             # (2,Tp,B,4H)

        whh = jnp.stack([params[layer][0][1], params[layer][1][1]],
                        axis=0).astype(compute_dtype)
        h0 = jnp.stack(
            [jnp.broadcast_to(hidden_init[2 * layer + d, 0], (B, H))
             for d in (0, 1)], axis=0).astype(jnp.float32)
        c0 = jnp.stack(
            [jnp.broadcast_to(cell_init[2 * layer + d, 0], (B, H))
             for d in (0, 1)], axis=0).astype(jnp.float32)

        y = _bilstm_layer(gx, whh, h0, c0, lengths2d, TC=TC,
                          out_dtype=jnp.float32 if last else stream_dtype,
                          single_buffer=single_buffer)           # (Tp, B, 2H)
        x = y[:T]                                                # (T, B, 2H)

    out = jnp.transpose(x, (1, 0, 2))                            # (B, T, 2H)
    # self.dropout(outputs): identity in eval/inference mode (no RNG here).
    return out


# ----------------------------------------------------------------------------
# Pure-JAX reference (lax.scan) with the SAME precision policy as the kernel
# (bf16 matmul operands, bf16 gx / intermediate-layer stream, f32 gates and
# state) so the check isolates the recurrence / masking / direction logic.
# ----------------------------------------------------------------------------
def lstm_encoder_ref(inputs, lengths, params, init_state, hidden_size,
                     layers_num, compute_dtype=jnp.bfloat16,
                     stream_dtype=jnp.bfloat16):
    B, T, _ = inputs.shape
    H = hidden_size
    half = init_state.shape[0] // 2
    cell_init, hidden_init = init_state[:half], init_state[half:]
    x = inputs

    for layer in range(layers_num):
        last = layer == layers_num - 1
        outs = []
        for direction, reverse in ((0, False), (1, True)):
            w_ih, w_hh, b = params[layer][direction]
            w_hh_c = w_hh.astype(compute_dtype)
            gx = (jnp.einsum('btd,dg->btg', x.astype(compute_dtype),
                             w_ih.astype(compute_dtype),
                             preferred_element_type=jnp.float32)
                  + b).astype(stream_dtype).astype(jnp.float32)
            h0 = jnp.broadcast_to(hidden_init[2 * layer + direction, 0],
                                  (B, H)).astype(jnp.float32)
            c0 = jnp.broadcast_to(cell_init[2 * layer + direction, 0],
                                  (B, H)).astype(jnp.float32)

            def step(carry, inp, w_hh_c=w_hh_c):
                h, c = carry
                gx_t, t = inp
                gates = gx_t + jnp.dot(h.astype(compute_dtype), w_hh_c,
                                       preferred_element_type=jnp.float32)
                i = jax.nn.sigmoid(gates[:, :H])
                f = jax.nn.sigmoid(gates[:, H:2 * H])
                g = jnp.tanh(gates[:, 2 * H:3 * H])
                o = jax.nn.sigmoid(gates[:, 3 * H:])
                c_new = f * c + i * g
                h_new = o * jnp.tanh(c_new)
                mask = (t < lengths)[:, None]
                return ((jnp.where(mask, h_new, h),
                         jnp.where(mask, c_new, c)),
                        jnp.where(mask, h_new, 0.0))

            xs = jnp.transpose(gx, (1, 0, 2))      # (T, B, 4H)
            ts = jnp.arange(T)
            if reverse:
                xs, ts = xs[::-1], ts[::-1]
            _, ys = lax.scan(step, (h0, c0), (xs, ts))
            if reverse:
                ys = ys[::-1]
            outs.append(jnp.transpose(ys, (1, 0, 2)))
        out = jnp.concatenate(outs, axis=-1)       # (B, T, 2H) f32
        x = out if last else out.astype(stream_dtype)
    return out


# ----------------------------------------------------------------------------
def make_params(key, input_size, hidden_size, layers_num):
    """Deterministic LSTM weights, PyTorch shapes transposed to (D_in,4H)/(H,4H)."""
    params = []
    k = 1.0 / np.sqrt(hidden_size)
    for layer in range(layers_num):
        d_in = input_size if layer == 0 else 2 * hidden_size
        dirs = []
        for _ in range(2):
            key, k1, k2, k3, k4 = jax.random.split(key, 5)
            w_ih = jax.random.uniform(k1, (d_in, 4 * hidden_size), jnp.float32, -k, k)
            w_hh = jax.random.uniform(k2, (hidden_size, 4 * hidden_size), jnp.float32, -k, k)
            b_ih = jax.random.uniform(k3, (4 * hidden_size,), jnp.float32, -k, k)
            b_hh = jax.random.uniform(k4, (4 * hidden_size,), jnp.float32, -k, k)
            dirs.append((w_ih, w_hh, (b_ih + b_hh).reshape(1, 4 * hidden_size)))
        params.append(tuple(dirs))
    return params


if __name__ == "__main__":
    # TPU-friendly small shapes: B multiple of 8 (sublane-aligned), H multiple
    # of 128 (lane-dense fused per-direction output half), max(lengths) == T.
    B, T, input_size, hidden_size, layers_num = 8, 8, 16, 128, 2

    key = jax.random.PRNGKey(0)
    key, k_in = jax.random.split(key)
    inputs = jax.random.normal(k_in, (B, T, input_size), jnp.float32)
    lengths = jnp.array([8, 5, 3, 8, 6, 2, 7, 4], dtype=jnp.int32)  # max == T

    params = make_params(key, input_size, hidden_size, layers_num)
    # nn.Parameter(torch.zeros(2 * 2 * layers_num, 1, hidden_size))
    init_state = jnp.zeros((2 * 2 * layers_num, 1, hidden_size), jnp.float32)

    # Resolve the Buffered(1) capability with the AOT probe (outside jit).
    sb = _buffered_one_supported()

    fwd = jax.jit(functools.partial(lstm_encoder_forward,
                                    hidden_size=hidden_size,
                                    layers_num=layers_num,
                                    single_buffer=sb))
    out = jax.block_until_ready(fwd(inputs, lengths, params, init_state))

    ref = jax.block_until_ready(
        lstm_encoder_ref(inputs, lengths, params, init_state,
                         hidden_size, layers_num))

    np.testing.assert_allclose(np.asarray(out), np.asarray(ref),
                               rtol=2e-2, atol=1e-2)
    assert out.shape == (B, T, 2 * hidden_size)
    # Padded positions must be exactly zero (pad_packed_sequence semantics).
    out_np = np.asarray(out)
    for b in range(B):
        L = int(lengths[b])
        if L < T:
            assert float(np.abs(out_np[b, L:]).max()) == 0.0

    print("KERNEL_OK")
</pallas_src>

<mosaic_0001>
module attributes {stable_mosaic.version = 11 : i64} {
  func.func @_bilstm_layer_kernel(%arg0: i32, %arg1: i32, %arg2: memref<8x1xi32, #tpu.memory_space<vmem>>, %arg3: memref<1x8x8x512xbf16, #tpu.memory_space<vmem>>, %arg4: memref<1x128x512xbf16, #tpu.memory_space<vmem>>, %arg5: memref<1x8x128xf32, #tpu.memory_space<vmem>>, %arg6: memref<1x8x128xf32, #tpu.memory_space<vmem>>, %arg7: memref<8x8x128xbf16, #tpu.memory_space<vmem>>, %arg8: memref<8x128xf32, #tpu.memory_space<vmem>>, %arg9: memref<8x128xf32, #tpu.memory_space<vmem>>) attributes {dimension_semantics = [#tpu.dimension_semantics<parallel>, #tpu.dimension_semantics<arbitrary>], iteration_bounds = array<i64: 2, 1>, scalar_prefetch = 0 : i64, scratch_operands = 2 : i64, tpu.core_type = #tpu.core_type<tc>, window_params = [{pipeline_mode = #tpu.pipeline_mode<synchronous>, transform_indices = @transform_0, window_bounds = array<i64: 8, 1>}, {transform_indices = @transform_1, window_bounds = array<i64: 1, 8, 8, 512>}, {transform_indices = @transform_2, window_bounds = array<i64: 1, 128, 512>}, {transform_indices = @transform_3, window_bounds = array<i64: 1, 8, 128>}, {transform_indices = @transform_4, window_bounds = array<i64: 1, 8, 128>}, {transform_indices = @transform_5, window_bounds = array<i64: 8, 8, 128>}]} {
    %c0_i32 = arith.constant 0 : i32
    %0 = arith.cmpi eq, %arg1, %c0_i32 : i32
    %1 = arith.extui %0 : i1 to i32
    %c0_i32_0 = arith.constant 0 : i32
    %2 = arith.cmpi ne, %1, %c0_i32_0 : i32
    scf.if %2 {
      %c0_126 = arith.constant 0 : index
      %c0_127 = arith.constant 0 : index
      %c0_128 = arith.constant 0 : index
      %475 = vector.load %arg5[%c0_126, %c0_127, %c0_128] : memref<1x8x128xf32, #tpu.memory_space<vmem>>, vector<1x8x128xf32>
      %476 = vector.shape_cast %475 : vector<1x8x128xf32> to vector<8x128xf32>
      %c0_129 = arith.constant 0 : index
      %c0_130 = arith.constant 0 : index
      %477 = vector.load %arg8[%c0_129, %c0_130] : memref<8x128xf32, #tpu.memory_space<vmem>>, vector<8x128xf32>
      tpu.vector_store %arg8[%c0_129, %c0_130], %476 {strides = array<i32>} : memref<8x128xf32, #tpu.memory_space<vmem>>, vector<8x128xf32>,
      %c0_131 = arith.constant 0 : index
      %c0_132 = arith.constant 0 : index
      %c0_133 = arith.constant 0 : index
      %478 = vector.load %arg6[%c0_131, %c0_132, %c0_133] : memref<1x8x128xf32, #tpu.memory_space<vmem>>, vector<1x8x128xf32>
      %479 = vector.shape_cast %478 : vector<1x8x128xf32> to vector<8x128xf32>
      %c0_134 = arith.constant 0 : index
      %c0_135 = arith.constant 0 : index
      %480 = vector.load %arg9[%c0_134, %c0_135] : memref<8x128xf32, #tpu.memory_space<vmem>>, vector<8x128xf32>
      tpu.vector_store %arg9[%c0_134, %c0_135], %479 {strides = array<i32>} : memref<8x128xf32, #tpu.memory_space<vmem>>, vector<8x128xf32>,
    } else {
    }
    %c0 = arith.constant 0 : index
    %c0_1 = arith.constant 0 : index
    %c0_2 = arith.constant 0 : index
    %3 = vector.load %arg4[%c0, %c0_1, %c0_2] : memref<1x128x512xbf16, #tpu.memory_space<vmem>>, vector<1x128x512xbf16>
    %4 = vector.shape_cast %3 : vector<1x128x512xbf16> to vector<128x512xbf16>
    %c0_3 = arith.constant 0 : index
    %c0_4 = arith.constant 0 : index
    %5 = vector.load %arg2[%c0_3, %c0_4] : memref<8x1xi32, #tpu.memory_space<vmem>>, vector<8x1xi32>
    %c8_i32 = arith.constant 8 : i32
    %6 = arith.muli %arg1, %c8_i32 : i32
    %c0_5 = arith.constant 0 : index
    %c0_6 = arith.constant 0 : index
    %7 = vector.load %arg8[%c0_5, %c0_6] : memref<8x128xf32, #tpu.memory_space<vmem>>, vector<8x128xf32>
    %c0_7 = arith.constant 0 : index
    %c0_8 = arith.constant 0 : index
    %8 = vector.load %arg9[%c0_7, %c0_8] : memref<8x128xf32, #tpu.memory_space<vmem>>, vector<8x128xf32>
    %c0_i32_9 = arith.constant 0 : i32
    %9 = arith.addi %6, %c0_i32_9 : i32
    %c2_i32 = arith.constant 2 : i32
    %10 = arith.muli %c2_i32, %9 : i32
    %c7_i32 = arith.constant 7 : i32
    %11 = arith.subi %c7_i32, %10 : i32
    %12 = arith.muli %arg0, %11 : i32
    %13 = arith.addi %9, %12 : i32
    %c0_10 = arith.constant 0 : index
    %14 = arith.index_cast %c0_i32_9 : i32 to index
    %c0_11 = arith.constant 0 : index
    %c0_12 = arith.constant 0 : index
    %15 = vector.load %arg3[%c0_10, %14, %c0_11, %c0_12] : memref<1x8x8x512xbf16, #tpu.memory_space<vmem>>, vector<1x1x8x512xbf16>
    %16 = vector.shape_cast %15 : vector<1x1x8x512xbf16> to vector<8x512xbf16>
    %17 = arith.extf %16 : vector<8x512xbf16> to vector<8x512xf32>
    %18 = arith.truncf %7 : vector<8x128xf32> to vector<8x128xbf16>
    %cst = arith.constant dense<0.000000e+00> : vector<8x512xf32>
    %19 = tpu.matmul %18, %4, %cst {dimension_numbers = #tpu.dot_dimension_numbers<[1], [0], [0], [1], [0, 0, 1, 1], [], []>} : vector<8x128xbf16>, vector<128x512xbf16>, vector<8x512xf32> -> vector<8x512xf32>
    %20 = arith.addf %17, %19 : vector<8x512xf32>
    %21 = vector.extract_strided_slice %20 {offsets = [0, 0], sizes = [8, 128], strides = [1, 1]} : vector<8x512xf32> to vector<8x128xf32>
    %22 = arith.negf %21 : vector<8x128xf32>
    %23 = math.exp %22 : vector<8x128xf32>
    %cst_13 = arith.constant 1.000000e+00 : f32
    %24 = vector.broadcast %cst_13 : f32 to vector<8x128xf32>
    %25 = arith.addf %24, %23 : vector<8x128xf32>
    %26 = arith.divf %24, %25 : vector<8x128xf32>
    %27 = vector.extract_strided_slice %20 {offsets = [0, 128], sizes = [8, 128], strides = [1, 1]} : vector<8x512xf32> to vector<8x128xf32>
    %28 = arith.negf %27 : vector<8x128xf32>
    %29 = math.exp %28 : vector<8x128xf32>
    %cst_14 = arith.constant 1.000000e+00 : f32
    %30 = vector.broadcast %cst_14 : f32 to vector<8x128xf32>
    %31 = arith.addf %30, %29 : vector<8x128xf32>
    %32 = arith.divf %30, %31 : vector<8x128xf32>
    %33 = vector.extract_strided_slice %20 {offsets = [0, 256], sizes = [8, 128], strides = [1, 1]} : vector<8x512xf32> to vector<8x128xf32>
    %34 = math.tanh %33 : vector<8x128xf32>
    %35 = vector.extract_strided_slice %20 {offsets = [0, 384], sizes = [8, 128], strides = [1, 1]} : vector<8x512xf32> to vector<8x128xf32>
    %36 = arith.negf %35 : vector<8x128xf32>
    %37 = math.exp %36 : vector<8x128xf32>
    %cst_15 = arith.constant 1.000000e+00 : f32
    %38 = vector.broadcast %cst_15 : f32 to vector<8x128xf32>
    %39 = arith.addf %38, %37 : vector<8x128xf32>
    %40 = arith.divf %38, %39 : vector<8x128xf32>
    %41 = arith.mulf %32, %8 : vector<8x128xf32>
    %42 = arith.mulf %26, %34 : vector<8x128xf32>
    %43 = arith.addf %41, %42 : vector<8x128xf32>
    %44 = math.tanh %43 : vector<8x128xf32>
    %45 = arith.mulf %40, %44 : vector<8x128xf32>
    %46 = vector.broadcast %13 : i32 to vector<8x1xi32>
    %47 = arith.cmpi slt, %46, %5 : vector<8x1xi32>
    %c2_i32_16 = arith.constant 2 : i32
    %48 = arith.muli %c2_i32_16, %c0_i32_9 : i32
    %c7_i32_17 = arith.constant 7 : i32
    %49 = arith.subi %c7_i32_17, %48 : i32
    %50 = arith.muli %arg0, %49 : i32
    %51 = arith.addi %c0_i32_9, %50 : i32
    %cst_18 = arith.constant 0.000000e+00 : f32
    %52 = vector.shape_cast %47 : vector<8x1xi1> to vector<8x1xi1>
    %53 = vector.broadcast %52 : vector<8x1xi1> to vector<8x128xi1>
    %54 = vector.broadcast %cst_18 : f32 to vector<8x128xf32>
    %55 = arith.select %53, %45, %54 : vector<8x128xi1>, vector<8x128xf32>
    %56 = arith.truncf %55 : vector<8x128xf32> to vector<8x128xbf16>
    %57 = arith.index_cast %51 : i32 to index
    %c0_19 = arith.constant 0 : index
    %c0_20 = arith.constant 0 : index
    %58 = vector.load %arg7[%57, %c0_19, %c0_20] : memref<8x8x128xbf16, #tpu.memory_space<vmem>>, vector<1x8x128xbf16>
    %59 = vector.shape_cast %58 : vector<1x8x128xbf16> to vector<8x128xbf16>
    %60 = vector.shape_cast %56 : vector<8x128xbf16> to vector<1x8x128xbf16>
    tpu.vector_store %arg7[%57, %c0_19, %c0_20], %60 {strides = array<i32>} : memref<8x8x128xbf16, #tpu.memory_space<vmem>>, vector<1x8x128xbf16>,
    %61 = vector.shape_cast %47 : vector<8x1xi1> to vector<8x1xi1>
    %62 = vector.broadcast %61 : vector<8x1xi1> to vector<8x128xi1>
    %63 = arith.select %62, %45, %7 : vector<8x128xi1>, vector<8x128xf32>
    %64 = vector.shape_cast %47 : vector<8x1xi1> to vector<8x1xi1>
    %65 = vector.broadcast %64 : vector<8x1xi1> to vector<8x128xi1>
    %66 = arith.select %65, %43, %8 : vector<8x128xi1>, vector<8x128xf32>
    %c1_i32 = arith.constant 1 : i32
    %67 = arith.addi %6, %c1_i32 : i32
    %c2_i32_21 = arith.constant 2 : i32
    %68 = arith.muli %c2_i32_21, %67 : i32
    %c7_i32_22 = arith.constant 7 : i32
    %69 = arith.subi %c7_i32_22, %68 : i32
    %70 = arith.muli %arg0, %69 : i32
    %71 = arith.addi %67, %70 : i32
    %c0_23 = arith.constant 0 : index
    %72 = arith.index_cast %c1_i32 : i32 to index
    %c0_24 = arith.constant 0 : index
    %c0_25 = arith.constant 0 : index
    %73 = vector.load %arg3[%c0_23, %72, %c0_24, %c0_25] : memref<1x8x8x512xbf16, #tpu.memory_space<vmem>>, vector<1x1x8x512xbf16>
    %74 = vector.shape_cast %73 : vector<1x1x8x512xbf16> to vector<8x512xbf16>
    %75 = arith.extf %74 : vector<8x512xbf16> to vector<8x512xf32>
    %76 = arith.truncf %63 : vector<8x128xf32> to vector<8x128xbf16>
    %cst_26 = arith.constant dense<0.000000e+00> : vector<8x512xf32>
    %77 = tpu.matmul %76, %4, %cst_26 {dimension_numbers = #tpu.dot_dimension_numbers<[1], [0], [0], [1], [0, 0, 1, 1], [], []>} : vector<8x128xbf16>, vector<128x512xbf16>, vector<8x512xf32> -> vector<8x512xf32>
    %78 = arith.addf %75, %77 : vector<8x512xf32>
    %79 = vector.extract_strided_slice %78 {offsets = [0, 0], sizes = [8, 128], strides = [1, 1]} : vector<8x512xf32> to vector<8x128xf32>
    %80 = arith.negf %79 : vector<8x128xf32>
    %81 = math.exp %80 : vector<8x128xf32>
    %cst_27 = arith.constant 1.000000e+00 : f32
    %82 = vector.broadcast %cst_27 : f32 to vector<8x128xf32>
    %83 = arith.addf %82, %81 : vector<8x128xf32>
    %84 = arith.divf %82, %83 : vector<8x128xf32>
    %85 = vector.extract_strided_slice %78 {offsets = [0, 128], sizes = [8, 128], strides = [1, 1]} : vector<8x512xf32> to vector<8x128xf32>
    %86 = arith.negf %85 : vector<8x128xf32>
    %87 = math.exp %86 : vector<8x128xf32>
    %cst_28 = arith.constant 1.000000e+00 : f32
    %88 = vector.broadcast %cst_28 : f32 to vector<8x128xf32>
    %89 = arith.addf %88, %87 : vector<8x128xf32>
    %90 = arith.divf %88, %89 : vector<8x128xf32>
    %91 = vector.extract_strided_slice %78 {offsets = [0, 256], sizes = [8, 128], strides = [1, 1]} : vector<8x512xf32> to vector<8x128xf32>
    %92 = math.tanh %91 : vector<8x128xf32>
    %93 = vector.extract_strided_slice %78 {offsets = [0, 384], sizes = [8, 128], strides = [1, 1]} : vector<8x512xf32> to vector<8x128xf32>
    %94 = arith.negf %93 : vector<8x128xf32>
    %95 = math.exp %94 : vector<8x128xf32>
    %cst_29 = arith.constant 1.000000e+00 : f32
    %96 = vector.broadcast %cst_29 : f32 to vector<8x128xf32>
    %97 = arith.addf %96, %95 : vector<8x128xf32>
    %98 = arith.divf %96, %97 : vector<8x128xf32>
    %99 = arith.mulf %90, %66 : vector<8x128xf32>
    %100 = arith.mulf %84, %92 : vector<8x128xf32>
    %101 = arith.addf %99, %100 : vector<8x128xf32>
    %102 = math.tanh %101 : vector<8x128xf32>
    %103 = arith.mulf %98, %102 : vector<8x128xf32>
    %104 = vector.broadcast %71 : i32 to vector<8x1xi32>
    %105 = arith.cmpi slt, %104, %5 : vector<8x1xi32>
    %c2_i32_30 = arith.constant 2 : i32
    %106 = arith.muli %c2_i32_30, %c1_i32 : i32
    %c7_i32_31 = arith.constant 7 : i32
    %107 = arith.subi %c7_i32_31, %106 : i32
    %108 = arith.muli %arg0, %107 : i32
    %109 = arith.addi %c1_i32, %108 : i32
    %cst_32 = arith.constant 0.000000e+00 : f32
    %110 = vector.shape_cast %105 : vector<8x1xi1> to vector<8x1xi1>
    %111 = vector.broadcast %110 : vector<8x1xi1> to vector<8x128xi1>
    %112 = vector.broadcast %cst_32 : f32 to vector<8x128xf32>
    %113 = arith.select %111, %103, %112 : vector<8x128xi1>, vector<8x128xf32>
    %114 = arith.truncf %113 : vector<8x128xf32> to vector<8x128xbf16>
    %115 = arith.index_cast %109 : i32 to index
    %c0_33 = arith.constant 0 : index
    %c0_34 = arith.constant 0 : index
    %116 = vector.load %arg7[%115, %c0_33, %c0_34] : memref<8x8x128xbf16, #tpu.memory_space<vmem>>, vector<1x8x128xbf16>
    %117 = vector.shape_cast %116 : vector<1x8x128xbf16> to vector<8x128xbf16>
    %118 = vector.shape_cast %114 : vector<8x128xbf16> to vector<1x8x128xbf16>
    tpu.vector_store %arg7[%115, %c0_33, %c0_34], %118 {strides = array<i32>} : memref<8x8x128xbf16, #tpu.memory_space<vmem>>, vector<1x8x128xbf16>,
    %119 = vector.shape_cast %105 : vector<8x1xi1> to vector<8x1xi1>
    %120 = vector.broadcast %119 : vector<8x1xi1> to vector<8x128xi1>
    %121 = arith.select %120, %103, %63 : vector<8x128xi1>, vector<8x128xf32>
    %122 = vector.shape_cast %105 : vector<8x1xi1> to vector<8x1xi1>
    %123 = vector.broadcast %122 : vector<8x1xi1> to vector<8x128xi1>
    %124 = arith.select %123, %101, %66 : vector<8x128xi1>, vector<8x128xf32>
    %c2_i32_35 = arith.constant 2 : i32
    %125 = arith.addi %6, %c2_i32_35 : i32
    %c2_i32_36 = arith.constant 2 : i32
    %126 = arith.muli %c2_i32_36, %125 : i32
    %c7_i32_37 = arith.constant 7 : i32
    %127 = arith.subi %c7_i32_37, %126 : i32
    %128 = arith.muli %arg0, %127 : i32
    %129 = arith.addi %125, %128 : i32
    %c0_38 = arith.constant 0 : index
    %130 = arith.index_cast %c2_i32_35 : i32 to index
    %c0_39 = arith.constant 0 : index
    %c0_40 = arith.constant 0 : index
    %131 = vector.load %arg3[%c0_38, %130, %c0_39, %c0_40] : memref<1x8x8x512xbf16, #tpu.memory_space<vmem>>, vector<1x1x8x512xbf16>
    %132 = vector.shape_cast %131 : vector<1x1x8x512xbf16> to vector<8x512xbf16>
    %133 = arith.extf %132 : vector<8x512xbf16> to vector<8x512xf32>
    %134 = arith.truncf %121 : vector<8x128xf32> to vector<8x128xbf16>
    %cst_41 = arith.constant dense<0.000000e+00> : vector<8x512xf32>
    %135 = tpu.matmul %134, %4, %cst_41 {dimension_numbers = #tpu.dot_dimension_numbers<[1], [0], [0], [1], [0, 0, 1, 1], [], []>} : vector<8x128xbf16>, vector<128x512xbf16>, vector<8x512xf32> -> vector<8x512xf32>
    %136 = arith.addf %133, %135 : vector<8x512xf32>
    %137 = vector.extract_strided_slice %136 {offsets = [0, 0], sizes = [8, 128], strides = [1, 1]} : vector<8x512xf32> to vector<8x128xf32>
    %138 = arith.negf %137 : vector<8x128xf32>
    %139 = math.exp %138 : vector<8x128xf32>
    %cst_42 = arith.constant 1.000000e+00 : f32
    %140 = vector.broadcast %cst_42 : f32 to vector<8x128xf32>
    %141 = arith.addf %140, %139 : vector<8x128xf32>
    %142 = arith.divf %140, %141 : vector<8x128xf32>
    %143 = vector.extract_strided_slice %136 {offsets = [0, 128], sizes = [8, 128], strides = [1, 1]} : vector<8x512xf32> to vector<8x128xf32>
    %144 = arith.negf %143 : vector<8x128xf32>
    %145 = math.exp %144 : vector<8x128xf32>
    %cst_43 = arith.constant 1.000000e+00 : f32
    %146 = vector.broadcast %cst_43 : f32 to vector<8x128xf32>
    %147 = arith.addf %146, %145 : vector<8x128xf32>
    %148 = arith.divf %146, %147 : vector<8x128xf32>
    %149 = vector.extract_strided_slice %136 {offsets = [0, 256], sizes = [8, 128], strides = [1, 1]} : vector<8x512xf32> to vector<8x128xf32>
    %150 = math.tanh %149 : vector<8x128xf32>
    %151 = vector.extract_strided_slice %136 {offsets = [0, 384], sizes = [8, 128], strides = [1, 1]} : vector<8x512xf32> to vector<8x128xf32>
    %152 = arith.negf %151 : vector<8x128xf32>
    %153 = math.exp %152 : vector<8x128xf32>
    %cst_44 = arith.constant 1.000000e+00 : f32
    %154 = vector.broadcast %cst_44 : f32 to vector<8x128xf32>
    %155 = arith.addf %154, %153 : vector<8x128xf32>
    %156 = arith.divf %154, %155 : vector<8x128xf32>
    %157 = arith.mulf %148, %124 : vector<8x128xf32>
    %158 = arith.mulf %142, %150 : vector<8x128xf32>
    %159 = arith.addf %157, %158 : vector<8x128xf32>
    %160 = math.tanh %159 : vector<8x128xf32>
    %161 = arith.mulf %156, %160 : vector<8x128xf32>
    %162 = vector.broadcast %129 : i32 to vector<8x1xi32>
    %163 = arith.cmpi slt, %162, %5 : vector<8x1xi32>
    %c2_i32_45 = arith.constant 2 : i32
    %164 = arith.muli %c2_i32_45, %c2_i32_35 : i32
    %c7_i32_46 = arith.constant 7 : i32
    %165 = arith.subi %c7_i32_46, %164 : i32
    %166 = arith.muli %arg0, %165 : i32
    %167 = arith.addi %c2_i32_35, %166 : i32
    %cst_47 = arith.constant 0.000000e+00 : f32
    %168 = vector.shape_cast %163 : vector<8x1xi1> to vector<8x1xi1>
    %169 = vector.broadcast %168 : vector<8x1xi1> to vector<8x128xi1>
    %170 = vector.broadcast %cst_47 : f32 to vector<8x128xf32>
    %171 = arith.select %169, %161, %170 : vector<8x128xi1>, vector<8x128xf32>
    %172 = arith.truncf %171 : vector<8x128xf32> to vector<8x128xbf16>
    %173 = arith.index_cast %167 : i32 to index
    %c0_48 = arith.constant 0 : index
    %c0_49 = arith.constant 0 : index
    %174 = vector.load %arg7[%173, %c0_48, %c0_49] : memref<8x8x128xbf16, #tpu.memory_space<vmem>>, vector<1x8x128xbf16>
    %175 = vector.shape_cast %174 : vector<1x8x128xbf16> to vector<8x128xbf16>
    %176 = vector.shape_cast %172 : vector<8x128xbf16> to vector<1x8x128xbf16>
    tpu.vector_store %arg7[%173, %c0_48, %c0_49], %176 {strides = array<i32>} : memref<8x8x128xbf16, #tpu.memory_space<vmem>>, vector<1x8x128xbf16>,
    %177 = vector.shape_cast %163 : vector<8x1xi1> to vector<8x1xi1>
    %178 = vector.broadcast %177 : vector<8x1xi1> to vector<8x128xi1>
    %179 = arith.select %178, %161, %121 : vector<8x128xi1>, vector<8x128xf32>
    %180 = vector.shape_cast %163 : vector<8x1xi1> to vector<8x1xi1>
    %181 = vector.broadcast %180 : vector<8x1xi1> to vector<8x128xi1>
    %182 = arith.select %181, %159, %124 : vector<8x128xi1>, vector<8x128xf32>
    %c3_i32 = arith.constant 3 : i32
    %183 = arith.addi %6, %c3_i32 : i32
    %c2_i32_50 = arith.constant 2 : i32
    %184 = arith.muli %c2_i32_50, %183 : i32
    %c7_i32_51 = arith.constant 7 : i32
    %185 = arith.subi %c7_i32_51, %184 : i32
    %186 = arith.muli %arg0, %185 : i32
    %187 = arith.addi %183, %186 : i32
    %c0_52 = arith.constant 0 : index
    %188 = arith.index_cast %c3_i32 : i32 to index
    %c0_53 = arith.constant 0 : index
    %c0_54 = arith.constant 0 : index
    %189 = vector.load %arg3[%c0_52, %188, %c0_53, %c0_54] : memref<1x8x8x512xbf16, #tpu.memory_space<vmem>>, vector<1x1x8x512xbf16>
    %190 = vector.shape_cast %189 : vector<1x1x8x512xbf16> to vector<8x512xbf16>
    %191 = arith.extf %190 : vector<8x512xbf16> to vector<8x512xf32>
    %192 = arith.truncf %179 : vector<8x128xf32> to vector<8x128xbf16>
    %cst_55 = arith.constant dense<0.000000e+00> : vector<8x512xf32>
    %193 = tpu.matmul %192, %4, %cst_55 {dimension_numbers = #tpu.dot_dimension_numbers<[1], [0], [0], [1], [0, 0, 1, 1], [], []>} : vector<8x128xbf16>, vector<128x512xbf16>, vector<8x512xf32> -> vector<8x512xf32>
    %194 = arith.addf %191, %193 : vector<8x512xf32>
    %195 = vector.extract_strided_slice %194 {offsets = [0, 0], sizes = [8, 128], strides = [1, 1]} : vector<8x512xf32> to vector<8x128xf32>
    %196 = arith.negf %195 : vector<8x128xf32>
    %197 = math.exp %196 : vector<8x128xf32>
    %cst_56 = arith.constant 1.000000e+00 : f32
    %198 = vector.broadcast %cst_56 : f32 to vector<8x128xf32>
    %199 = arith.addf %198, %197 : vector<8x128xf32>
    %200 = arith.divf %198, %199 : vector<8x128xf32>
    %201 = vector.extract_strided_slice %194 {offsets = [0, 128], sizes = [8, 128], strides = [1, 1]} : vector<8x512xf32> to vector<8x128xf32>
    %202 = arith.negf %201 : vector<8x128xf32>
    %203 = math.exp %202 : vector<8x128xf32>
    %cst_57 = arith.constant 1.000000e+00 : f32
    %204 = vector.broadcast %cst_57 : f32 to vector<8x128xf32>
    %205 = arith.addf %204, %203 : vector<8x128xf32>
    %206 = arith.divf %204, %205 : vector<8x128xf32>
    %207 = vector.extract_strided_slice %194 {offsets = [0, 256], sizes = [8, 128], strides = [1, 1]} : vector<8x512xf32> to vector<8x128xf32>
    %208 = math.tanh %207 : vector<8x128xf32>
    %209 = vector.extract_strided_slice %194 {offsets = [0, 384], sizes = [8, 128], strides = [1, 1]} : vector<8x512xf32> to vector<8x128xf32>
    %210 = arith.negf %209 : vector<8x128xf32>
    %211 = math.exp %210 : vector<8x128xf32>
    %cst_58 = arith.constant 1.000000e+00 : f32
    %212 = vector.broadcast %cst_58 : f32 to vector<8x128xf32>
    %213 = arith.addf %212, %211 : vector<8x128xf32>
    %214 = arith.divf %212, %213 : vector<8x128xf32>
    %215 = arith.mulf %206, %182 : vector<8x128xf32>
    %216 = arith.mulf %200, %208 : vector<8x128xf32>
    %217 = arith.addf %215, %216 : vector<8x128xf32>
    %218 = math.tanh %217 : vector<8x128xf32>
    %219 = arith.mulf %214, %218 : vector<8x128xf32>
    %220 = vector.broadcast %187 : i32 to vector<8x1xi32>
    %221 = arith.cmpi slt, %220, %5 : vector<8x1xi32>
    %c2_i32_59 = arith.constant 2 : i32
    %222 = arith.muli %c2_i32_59, %c3_i32 : i32
    %c7_i32_60 = arith.constant 7 : i32
    %223 = arith.subi %c7_i32_60, %222 : i32
    %224 = arith.muli %arg0, %223 : i32
    %225 = arith.addi %c3_i32, %224 : i32
    %cst_61 = arith.constant 0.000000e+00 : f32
    %226 = vector.shape_cast %221 : vector<8x1xi1> to vector<8x1xi1>
    %227 = vector.broadcast %226 : vector<8x1xi1> to vector<8x128xi1>
    %228 = vector.broadcast %cst_61 : f32 to vector<8x128xf32>
    %229 = arith.select %227, %219, %228 : vector<8x128xi1>, vector<8x128xf32>
    %230 = arith.truncf %229 : vector<8x128xf32> to vector<8x128xbf16>
    %231 = arith.index_cast %225 : i32 to index
    %c0_62 = arith.constant 0 : index
    %c0_63 = arith.constant 0 : index
    %232 = vector.load %arg7[%231, %c0_62, %c0_63] : memref<8x8x128xbf16, #tpu.memory_space<vmem>>, vector<1x8x128xbf16>
    %233 = vector.shape_cast %232 : vector<1x8x128xbf16> to vector<8x128xbf16>
    %234 = vector.shape_cast %230 : vector<8x128xbf16> to vector<1x8x128xbf16>
    tpu.vector_store %arg7[%231, %c0_62, %c0_63], %234 {strides = array<i32>} : memref<8x8x128xbf16, #tpu.memory_space<vmem>>, vector<1x8x128xbf16>,
    %235 = vector.shape_cast %221 : vector<8x1xi1> to vector<8x1xi1>
    %236 = vector.broadcast %235 : vector<8x1xi1> to vector<8x128xi1>
    %237 = arith.select %236, %219, %179 : vector<8x128xi1>, vector<8x128xf32>
    %238 = vector.shape_cast %221 : vector<8x1xi1> to vector<8x1xi1>
    %239 = vector.broadcast %238 : vector<8x1xi1> to vector<8x128xi1>
    %240 = arith.select %239, %217, %182 : vector<8x128xi1>, vector<8x128xf32>
    %c4_i32 = arith.constant 4 : i32
    %241 = arith.addi %6, %c4_i32 : i32
    %c2_i32_64 = arith.constant 2 : i32
    %242 = arith.muli %c2_i32_64, %241 : i32
    %c7_i32_65 = arith.constant 7 : i32
    %243 = arith.subi %c7_i32_65, %242 : i32
    %244 = arith.muli %arg0, %243 : i32
    %245 = arith.addi %241, %244 : i32
    %c0_66 = arith.constant 0 : index
    %246 = arith.index_cast %c4_i32 : i32 to index
    %c0_67 = arith.constant 0 : index
    %c0_68 = arith.constant 0 : index
    %247 = vector.load %arg3[%c0_66, %246, %c0_67, %c0_68] : memref<1x8x8x512xbf16, #tpu.memory_space<vmem>>, vector<1x1x8x512xbf16>
    %248 = vector.shape_cast %247 : vector<1x1x8x512xbf16> to vector<8x512xbf16>
    %249 = arith.extf %248 : vector<8x512xbf16> to vector<8x512xf32>
    %250 = arith.truncf %237 : vector<8x128xf32> to vector<8x128xbf16>
    %cst_69 = arith.constant dense<0.000000e+00> : vector<8x512xf32>
    %251 = tpu.matmul %250, %4, %cst_69 {dimension_numbers = #tpu.dot_dimension_numbers<[1], [0], [0], [1], [0, 0, 1, 1], [], []>} : vector<8x128xbf16>, vector<128x512xbf16>, vector<8x512xf32> -> vector<8x512xf32>
    %252 = arith.addf %249, %251 : vector<8x512xf32>
    %253 = vector.extract_strided_slice %252 {offsets = [0, 0], sizes = [8, 128], strides = [1, 1]} : vector<8x512xf32> to vector<8x128xf32>
    %254 = arith.negf %253 : vector<8x128xf32>
    %255 = math.exp %254 : vector<8x128xf32>
    %cst_70 = arith.constant 1.000000e+00 : f32
    %256 = vector.broadcast %cst_70 : f32 to vector<8x128xf32>
    %257 = arith.addf %256, %255 : vector<8x128xf32>
    %258 = arith.divf %256, %257 : vector<8x128xf32>
    %259 = vector.extract_strided_slice %252 {offsets = [0, 128], sizes = [8, 128], strides = [1, 1]} : vector<8x512xf32> to vector<8x128xf32>
    %260 = arith.negf %259 : vector<8x128xf32>
    %261 = math.exp %260 : vector<8x128xf32>
    %cst_71 = arith.constant 1.000000e+00 : f32
    %262 = vector.broadcast %cst_71 : f32 to vector<8x128xf32>
    %263 = arith.addf %262, %261 : vector<8x128xf32>
    %264 = arith.divf %262, %263 : vector<8x128xf32>
    %265 = vector.extract_strided_slice %252 {offsets = [0, 256], sizes = [8, 128], strides = [1, 1]} : vector<8x512xf32> to vector<8x128xf32>
    %266 = math.tanh %265 : vector<8x128xf32>
    %267 = vector.extract_strided_slice %252 {offsets = [0, 384], sizes = [8, 128], strides = [1, 1]} : vector<8x512xf32> to vector<8x128xf32>
    %268 = arith.negf %267 : vector<8x128xf32>
    %269 = math.exp %268 : vector<8x128xf32>
    %cst_72 = arith.constant 1.000000e+00 : f32
    %270 = vector.broadcast %cst_72 : f32 to vector<8x128xf32>
    %271 = arith.addf %270, %269 : vector<8x128xf32>
    %272 = arith.divf %270, %271 : vector<8x128xf32>
    %273 = arith.mulf %264, %240 : vector<8x128xf32>
    %274 = arith.mulf %258, %266 : vector<8x128xf32>
    %275 = arith.addf %273, %274 : vector<8x128xf32>
    %276 = math.tanh %275 : vector<8x128xf32>
    %277 = arith.mulf %272, %276 : vector<8x128xf32>
    %278 = vector.broadcast %245 : i32 to vector<8x1xi32>
    %279 = arith.cmpi slt, %278, %5 : vector<8x1xi32>
    %c2_i32_73 = arith.constant 2 : i32
    %280 = arith.muli %c2_i32_73, %c4_i32 : i32
    %c7_i32_74 = arith.constant 7 : i32
    %281 = arith.subi %c7_i32_74, %280 : i32
    %282 = arith.muli %arg0, %281 : i32
    %283 = arith.addi %c4_i32, %282 : i32
    %cst_75 = arith.constant 0.000000e+00 : f32
    %284 = vector.shape_cast %279 : vector<8x1xi1> to vector<8x1xi1>
    %285 = vector.broadcast %284 : vector<8x1xi1> to vector<8x128xi1>
    %286 = vector.broadcast %cst_75 : f32 to vector<8x128xf32>
    %287 = arith.select %285, %277, %286 : vector<8x128xi1>, vector<8x128xf32>
    %288 = arith.truncf %287 : vector<8x128xf32> to vector<8x128xbf16>
    %289 = arith.index_cast %283 : i32 to index
    %c0_76 = arith.constant 0 : index
    %c0_77 = arith.constant 0 : index
    %290 = vector.load %arg7[%289, %c0_76, %c0_77] : memref<8x8x128xbf16, #tpu.memory_space<vmem>>, vector<1x8x128xbf16>
    %291 = vector.shape_cast %290 : vector<1x8x128xbf16> to vector<8x128xbf16>
    %292 = vector.shape_cast %288 : vector<8x128xbf16> to vector<1x8x128xbf16>
    tpu.vector_store %arg7[%289, %c0_76, %c0_77], %292 {strides = array<i32>} : memref<8x8x128xbf16, #tpu.memory_space<vmem>>, vector<1x8x128xbf16>,
    %293 = vector.shape_cast %279 : vector<8x1xi1> to vector<8x1xi1>
    %294 = vector.broadcast %293 : vector<8x1xi1> to vector<8x128xi1>
    %295 = arith.select %294, %277, %237 : vector<8x128xi1>, vector<8x128xf32>
    %296 = vector.shape_cast %279 : vector<8x1xi1> to vector<8x1xi1>
    %297 = vector.broadcast %296 : vector<8x1xi1> to vector<8x128xi1>
    %298 = arith.select %297, %275, %240 : vector<8x128xi1>, vector<8x128xf32>
    %c5_i32 = arith.constant 5 : i32
    %299 = arith.addi %6, %c5_i32 : i32
    %c2_i32_78 = arith.constant 2 : i32
    %300 = arith.muli %c2_i32_78, %299 : i32
    %c7_i32_79 = arith.constant 7 : i32
    %301 = arith.subi %c7_i32_79, %300 : i32
    %302 = arith.muli %arg0, %301 : i32
    %303 = arith.addi %299, %302 : i32
    %c0_80 = arith.constant 0 : index
    %304 = arith.index_cast %c5_i32 : i32 to index
    %c0_81 = arith.constant 0 : index
    %c0_82 = arith.constant 0 : index
    %305 = vector.load %arg3[%c0_80, %304, %c0_81, %c0_82] : memref<1x8x8x512xbf16, #tpu.memory_space<vmem>>, vector<1x1x8x512xbf16>
    %306 = vector.shape_cast %305 : vector<1x1x8x512xbf16> to vector<8x512xbf16>
    %307 = arith.extf %306 : vector<8x512xbf16> to vector<8x512xf32>
    %308 = arith.truncf %295 : vector<8x128xf32> to vector<8x128xbf16>
    %cst_83 = arith.constant dense<0.000000e+00> : vector<8x512xf32>
    %309 = tpu.matmul %308, %4, %cst_83 {dimension_numbers = #tpu.dot_dimension_numbers<[1], [0], [0], [1], [0, 0, 1, 1], [], []>} : vector<8x128xbf16>, vector<128x512xbf16>, vector<8x512xf32> -> vector<8x512xf32>
    %310 = arith.addf %307, %309 : vector<8x512xf32>
    %311 = vector.extract_strided_slice %310 {offsets = [0, 0], sizes = [8, 128], strides = [1, 1]} : vector<8x512xf32> to vector<8x128xf32>
    %312 = arith.negf %311 : vector<8x128xf32>
    %313 = math.exp %312 : vector<8x128xf32>
    %cst_84 = arith.constant 1.000000e+00 : f32
    %314 = vector.broadcast %cst_84 : f32 to vector<8x128xf32>
    %315 = arith.addf %314, %313 : vector<8x128xf32>
    %316 = arith.divf %314, %315 : vector<8x128xf32>
    %317 = vector.extract_strided_slice %310 {offsets = [0, 128], sizes = [8, 128], strides = [1, 1]} : vector<8x512xf32> to vector<8x128xf32>
    %318 = arith.negf %317 : vector<8x128xf32>
    %319 = math.exp %318 : vector<8x128xf32>
    %cst_85 = arith.constant 1.000000e+00 : f32
    %320 = vector.broadcast %cst_85 : f32 to vector<8x128xf32>
    %321 = arith.addf %320, %319 : vector<8x128xf32>
    %322 = arith.divf %320, %321 : vector<8x128xf32>
    %323 = vector.extract_strided_slice %310 {offsets = [0, 256], sizes = [8, 128], strides = [1, 1]} : vector<8x512xf32> to vector<8x128xf32>
    %324 = math.tanh %323 : vector<8x128xf32>
    %325 = vector.extract_strided_slice %310 {offsets = [0, 384], sizes = [8, 128], strides = [1, 1]} : vector<8x512xf32> to vector<8x128xf32>
    %326 = arith.negf %325 : vector<8x128xf32>
    %327 = math.exp %326 : vector<8x128xf32>
    %cst_86 = arith.constant 1.000000e+00 : f32
    %328 = vector.broadcast %cst_86 : f32 to vector<8x128xf32>
    %329 = arith.addf %328, %327 : vector<8x128xf32>
    %330 = arith.divf %328, %329 : vector<8x128xf32>
    %331 = arith.mulf %322, %298 : vector<8x128xf32>
    %332 = arith.mulf %316, %324 : vector<8x128xf32>
    %333 = arith.addf %331, %332 : vector<8x128xf32>
    %334 = math.tanh %333 : vector<8x128xf32>
    %335 = arith.mulf %330, %334 : vector<8x128xf32>
    %336 = vector.broadcast %303 : i32 to vector<8x1xi32>
    %337 = arith.cmpi slt, %336, %5 : vector<8x1xi32>
    %c2_i32_87 = arith.constant 2 : i32
    %338 = arith.muli %c2_i32_87, %c5_i32 : i32
    %c7_i32_88 = arith.constant 7 : i32
    %339 = arith.subi %c7_i32_88, %338 : i32
    %340 = arith.muli %arg0, %339 : i32
    %341 = arith.addi %c5_i32, %340 : i32
    %cst_89 = arith.constant 0.000000e+00 : f32
    %342 = vector.shape_cast %337 : vector<8x1xi1> to vector<8x1xi1>
    %343 = vector.broadcast %342 : vector<8x1xi1> to vector<8x128xi1>
    %344 = vector.broadcast %cst_89 : f32 to vector<8x128xf32>
    %345 = arith.select %343, %335, %344 : vector<8x128xi1>, vector<8x128xf32>
    %346 = arith.truncf %345 : vector<8x128xf32> to vector<8x128xbf16>
    %347 = arith.index_cast %341 : i32 to index
    %c0_90 = arith.constant 0 : index
    %c0_91 = arith.constant 0 : index
    %348 = vector.load %arg7[%347, %c0_90, %c0_91] : memref<8x8x128xbf16, #tpu.memory_space<vmem>>, vector<1x8x128xbf16>
    %349 = vector.shape_cast %348 : vector<1x8x128xbf16> to vector<8x128xbf16>
    %350 = vector.shape_cast %346 : vector<8x128xbf16> to vector<1x8x128xbf16>
    tpu.vector_store %arg7[%347, %c0_90, %c0_91], %350 {strides = array<i32>} : memref<8x8x128xbf16, #tpu.memory_space<vmem>>, vector<1x8x128xbf16>,
    %351 = vector.shape_cast %337 : vector<8x1xi1> to vector<8x1xi1>
    %352 = vector.broadcast %351 : vector<8x1xi1> to vector<8x128xi1>
    %353 = arith.select %352, %335, %295 : vector<8x128xi1>, vector<8x128xf32>
    %354 = vector.shape_cast %337 : vector<8x1xi1> to vector<8x1xi1>
    %355 = vector.broadcast %354 : vector<8x1xi1> to vector<8x128xi1>
    %356 = arith.select %355, %333, %298 : vector<8x128xi1>, vector<8x128xf32>
    %c6_i32 = arith.constant 6 : i32
    %357 = arith.addi %6, %c6_i32 : i32
    %c2_i32_92 = arith.constant 2 : i32
    %358 = arith.muli %c2_i32_92, %357 : i32
    %c7_i32_93 = arith.constant 7 : i32
    %359 = arith.subi %c7_i32_93, %358 : i32
    %360 = arith.muli %arg0, %359 : i32
    %361 = arith.addi %357, %360 : i32
    %c0_94 = arith.constant 0 : index
    %362 = arith.index_cast %c6_i32 : i32 to index
    %c0_95 = arith.constant 0 : index
    %c0_96 = arith.constant 0 : index
    %363 = vector.load %arg3[%c0_94, %362, %c0_95, %c0_96] : memref<1x8x8x512xbf16, #tpu.memory_space<vmem>>, vector<1x1x8x512xbf16>
    %364 = vector.shape_cast %363 : vector<1x1x8x512xbf16> to vector<8x512xbf16>
    %365 = arith.extf %364 : vector<8x512xbf16> to vector<8x512xf32>
    %366 = arith.truncf %353 : vector<8x128xf32> to vector<8x128xbf16>
    %cst_97 = arith.constant dense<0.000000e+00> : vector<8x512xf32>
    %367 = tpu.matmul %366, %4, %cst_97 {dimension_numbers = #tpu.dot_dimension_numbers<[1], [0], [0], [1], [0, 0, 1, 1], [], []>} : vector<8x128xbf16>, vector<128x512xbf16>, vector<8x512xf32> -> vector<8x512xf32>
    %368 = arith.addf %365, %367 : vector<8x512xf32>
    %369 = vector.extract_strided_slice %368 {offsets = [0, 0], sizes = [8, 128], strides = [1, 1]} : vector<8x512xf32> to vector<8x128xf32>
    %370 = arith.negf %369 : vector<8x128xf32>
    %371 = math.exp %370 : vector<8x128xf32>
    %cst_98 = arith.constant 1.000000e+00 : f32
    %372 = vector.broadcast %cst_98 : f32 to vector<8x128xf32>
    %373 = arith.addf %372, %371 : vector<8x128xf32>
    %374 = arith.divf %372, %373 : vector<8x128xf32>
    %375 = vector.extract_strided_slice %368 {offsets = [0, 128], sizes = [8, 128], strides = [1, 1]} : vector<8x512xf32> to vector<8x128xf32>
    %376 = arith.negf %375 : vector<8x128xf32>
    %377 = math.exp %376 : vector<8x128xf32>
    %cst_99 = arith.constant 1.000000e+00 : f32
    %378 = vector.broadcast %cst_99 : f32 to vector<8x128xf32>
    %379 = arith.addf %378, %377 : vector<8x128xf32>
    %380 = arith.divf %378, %379 : vector<8x128xf32>
    %381 = vector.extract_strided_slice %368 {offsets = [0, 256], sizes = [8, 128], strides = [1, 1]} : vector<8x512xf32> to vector<8x128xf32>
    %382 = math.tanh %381 : vector<8x128xf32>
    %383 = vector.extract_strided_slice %368 {offsets = [0, 384], sizes = [8, 128], strides = [1, 1]} : vector<8x512xf32> to vector<8x128xf32>
    %384 = arith.negf %383 : vector<8x128xf32>
    %385 = math.exp %384 : vector<8x128xf32>
    %cst_100 = arith.constant 1.000000e+00 : f32
    %386 = vector.broadcast %cst_100 : f32 to vector<8x128xf32>
    %387 = arith.addf %386, %385 : vector<8x128xf32>
    %388 = arith.divf %386, %387 : vector<8x128xf32>
    %389 = arith.mulf %380, %356 : vector<8x128xf32>
    %390 = arith.mulf %374, %382 : vector<8x128xf32>
    %391 = arith.addf %389, %390 : vector<8x128xf32>
    %392 = math.tanh %391 : vector<8x128xf32>
    %393 = arith.mulf %388, %392 : vector<8x128xf32>
    %394 = vector.broadcast %361 : i32 to vector<8x1xi32>
    %395 = arith.cmpi slt, %394, %5 : vector<8x1xi32>
    %c2_i32_101 = arith.constant 2 : i32
    %396 = arith.muli %c2_i32_101, %c6_i32 : i32
    %c7_i32_102 = arith.constant 7 : i32
    %397 = arith.subi %c7_i32_102, %396 : i32
    %398 = arith.muli %arg0, %397 : i32
    %399 = arith.addi %c6_i32, %398 : i32
    %cst_103 = arith.constant 0.000000e+00 : f32
    %400 = vector.shape_cast %395 : vector<8x1xi1> to vector<8x1xi1>
    %401 = vector.broadcast %400 : vector<8x1xi1> to vector<8x128xi1>
    %402 = vector.broadcast %cst_103 : f32 to vector<8x128xf32>
    %403 = arith.select %401, %393, %402 : vector<8x128xi1>, vector<8x128xf32>
    %404 = arith.truncf %403 : vector<8x128xf32> to vector<8x128xbf16>
    %405 = arith.index_cast %399 : i32 to index
    %c0_104 = arith.constant 0 : index
    %c0_105 = arith.constant 0 : index
    %406 = vector.load %arg7[%405, %c0_104, %c0_105] : memref<8x8x128xbf16, #tpu.memory_space<vmem>>, vector<1x8x128xbf16>
    %407 = vector.shape_cast %406 : vector<1x8x128xbf16> to vector<8x128xbf16>
    %408 = vector.shape_cast %404 : vector<8x128xbf16> to vector<1x8x128xbf16>
    tpu.vector_store %arg7[%405, %c0_104, %c0_105], %408 {strides = array<i32>} : memref<8x8x128xbf16, #tpu.memory_space<vmem>>, vector<1x8x128xbf16>,
    %409 = vector.shape_cast %395 : vector<8x1xi1> to vector<8x1xi1>
    %410 = vector.broadcast %409 : vector<8x1xi1> to vector<8x128xi1>
    %411 = arith.select %410, %393, %353 : vector<8x128xi1>, vector<8x128xf32>
    %412 = vector.shape_cast %395 : vector<8x1xi1> to vector<8x1xi1>
    %413 = vector.broadcast %412 : vector<8x1xi1> to vector<8x128xi1>
    %414 = arith.select %413, %391, %356 : vector<8x128xi1>, vector<8x128xf32>
    %c7_i32_106 = arith.constant 7 : i32
    %415 = arith.addi %6, %c7_i32_106 : i32
    %c2_i32_107 = arith.constant 2 : i32
    %416 = arith.muli %c2_i32_107, %415 : i32
    %c7_i32_108 = arith.constant 7 : i32
    %417 = arith.subi %c7_i32_108, %416 : i32
    %418 = arith.muli %arg0, %417 : i32
    %419 = arith.addi %415, %418 : i32
    %c0_109 = arith.constant 0 : index
    %420 = arith.index_cast %c7_i32_106 : i32 to index
    %c0_110 = arith.constant 0 : index
    %c0_111 = arith.constant 0 : index
    %421 = vector.load %arg3[%c0_109, %420, %c0_110, %c0_111] : memref<1x8x8x512xbf16, #tpu.memory_space<vmem>>, vector<1x1x8x512xbf16>
    %422 = vector.shape_cast %421 : vector<1x1x8x512xbf16> to vector<8x512xbf16>
    %423 = arith.extf %422 : vector<8x512xbf16> to vector<8x512xf32>
    %424 = arith.truncf %411 : vector<8x128xf32> to vector<8x128xbf16>
    %cst_112 = arith.constant dense<0.000000e+00> : vector<8x512xf32>
    %425 = tpu.matmul %424, %4, %cst_112 {dimension_numbers = #tpu.dot_dimension_numbers<[1], [0], [0], [1], [0, 0, 1, 1], [], []>} : vector<8x128xbf16>, vector<128x512xbf16>, vector<8x512xf32> -> vector<8x512xf32>
    %426 = arith.addf %423, %425 : vector<8x512xf32>
    %427 = vector.extract_strided_slice %426 {offsets = [0, 0], sizes = [8, 128], strides = [1, 1]} : vector<8x512xf32> to vector<8x128xf32>
    %428 = arith.negf %427 : vector<8x128xf32>
    %429 = math.exp %428 : vector<8x128xf32>
    %cst_113 = arith.constant 1.000000e+00 : f32
    %430 = vector.broadcast %cst_113 : f32 to vector<8x128xf32>
    %431 = arith.addf %430, %429 : vector<8x128xf32>
    %432 = arith.divf %430, %431 : vector<8x128xf32>
    %433 = vector.extract_strided_slice %426 {offsets = [0, 128], sizes = [8, 128], strides = [1, 1]} : vector<8x512xf32> to vector<8x128xf32>
    %434 = arith.negf %433 : vector<8x128xf32>
    %435 = math.exp %434 : vector<8x128xf32>
    %cst_114 = arith.constant 1.000000e+00 : f32
    %436 = vector.broadcast %cst_114 : f32 to vector<8x128xf32>
    %437 = arith.addf %436, %435 : vector<8x128xf32>
    %438 = arith.divf %436, %437 : vector<8x128xf32>
    %439 = vector.extract_strided_slice %426 {offsets = [0, 256], sizes = [8, 128], strides = [1, 1]} : vector<8x512xf32> to vector<8x128xf32>
    %440 = math.tanh %439 : vector<8x128xf32>
    %441 = vector.extract_strided_slice %426 {offsets = [0, 384], sizes = [8, 128], strides = [1, 1]} : vector<8x512xf32> to vector<8x128xf32>
    %442 = arith.negf %441 : vector<8x128xf32>
    %443 = math.exp %442 : vector<8x128xf32>
    %cst_115 = arith.constant 1.000000e+00 : f32
    %444 = vector.broadcast %cst_115 : f32 to vector<8x128xf32>
    %445 = arith.addf %444, %443 : vector<8x128xf32>
    %446 = arith.divf %444, %445 : vector<8x128xf32>
    %447 = arith.mulf %438, %414 : vector<8x128xf32>
    %448 = arith.mulf %432, %440 : vector<8x128xf32>
    %449 = arith.addf %447, %448 : vector<8x128xf32>
    %450 = math.tanh %449 : vector<8x128xf32>
    %451 = arith.mulf %446, %450 : vector<8x128xf32>
    %452 = vector.broadcast %419 : i32 to vector<8x1xi32>
    %453 = arith.cmpi slt, %452, %5 : vector<8x1xi32>
    %c2_i32_116 = arith.constant 2 : i32
    %454 = arith.muli %c2_i32_116, %c7_i32_106 : i32
    %c7_i32_117 = arith.constant 7 : i32
    %455 = arith.subi %c7_i32_117, %454 : i32
    %456 = arith.muli %arg0, %455 : i32
    %457 = arith.addi %c7_i32_106, %456 : i32
    %cst_118 = arith.constant 0.000000e+00 : f32
    %458 = vector.shape_cast %453 : vector<8x1xi1> to vector<8x1xi1>
    %459 = vector.broadcast %458 : vector<8x1xi1> to vector<8x128xi1>
    %460 = vector.broadcast %cst_118 : f32 to vector<8x128xf32>
    %461 = arith.select %459, %451, %460 : vector<8x128xi1>, vector<8x128xf32>
    %462 = arith.truncf %461 : vector<8x128xf32> to vector<8x128xbf16>
    %463 = arith.index_cast %457 : i32 to index
    %c0_119 = arith.constant 0 : index
    %c0_120 = arith.constant 0 : index
    %464 = vector.load %arg7[%463, %c0_119, %c0_120] : memref<8x8x128xbf16, #tpu.memory_space<vmem>>, vector<1x8x128xbf16>
    %465 = vector.shape_cast %464 : vector<1x8x128xbf16> to vector<8x128xbf16>
    %466 = vector.shape_cast %462 : vector<8x128xbf16> to vector<1x8x128xbf16>
    tpu.vector_store %arg7[%463, %c0_119, %c0_120], %466 {strides = array<i32>} : memref<8x8x128xbf16, #tpu.memory_space<vmem>>, vector<1x8x128xbf16>,
    %467 = vector.shape_cast %453 : vector<8x1xi1> to vector<8x1xi1>
    %468 = vector.broadcast %467 : vector<8x1xi1> to vector<8x128xi1>
    %469 = arith.select %468, %451, %411 : vector<8x128xi1>, vector<8x128xf32>
    %470 = vector.shape_cast %453 : vector<8x1xi1> to vector<8x1xi1>
    %471 = vector.broadcast %470 : vector<8x1xi1> to vector<8x128xi1>
    %472 = arith.select %471, %449, %414 : vector<8x128xi1>, vector<8x128xf32>
    %c8_i32_121 = arith.constant 8 : i32
    %c0_122 = arith.constant 0 : index
    %c0_123 = arith.constant 0 : index
    %473 = vector.load %arg8[%c0_122, %c0_123] : memref<8x128xf32, #tpu.memory_space<vmem>>, vector<8x128xf32>
    tpu.vector_store %arg8[%c0_122, %c0_123], %469 {strides = array<i32>} : memref<8x128xf32, #tpu.memory_space<vmem>>, vector<8x128xf32>,
    %c0_124 = arith.constant 0 : index
    %c0_125 = arith.constant 0 : index
    %474 = vector.load %arg9[%c0_124, %c0_125] : memref<8x128xf32, #tpu.memory_space<vmem>>, vector<8x128xf32>
    tpu.vector_store %arg9[%c0_124, %c0_125], %472 {strides = array<i32>} : memref<8x128xf32, #tpu.memory_space<vmem>>, vector<8x128xf32>,
    return
  }
  func.func @transform_0(%arg0: i32, %arg1: i32) -> (i32, i32) {
    %c0_i32 = arith.constant 0 : i32
    %c0_i32_0 = arith.constant 0 : i32
    %c0_i32_1 = arith.constant 0 : i32
    return %c0_i32, %c0_i32_0 : i32, i32
  }
  func.func @transform_1(%arg0: i32, %arg1: i32) -> (i32, i32, i32, i32) {
    %c0_i32 = arith.constant 0 : i32
    %c0_i32_0 = arith.constant 0 : i32
    %c0_i32_1 = arith.constant 0 : i32
    return %arg0, %arg1, %c0_i32, %c0_i32_0 : i32, i32, i32, i32
  }
  func.func @transform_2(%arg0: i32, %arg1: i32) -> (i32, i32, i32) {
    %c0_i32 = arith.constant 0 : i32
    %c0_i32_0 = arith.constant 0 : i32
    %c0_i32_1 = arith.constant 0 : i32
    return %arg0, %c0_i32, %c0_i32_0 : i32, i32, i32
  }
  func.func @transform_3(%arg0: i32, %arg1: i32) -> (i32, i32, i32) {
    %c0_i32 = arith.constant 0 : i32
    %c0_i32_0 = arith.constant 0 : i32
    %c0_i32_1 = arith.constant 0 : i32
    return %arg0, %c0_i32, %c0_i32_0 : i32, i32, i32
  }
  func.func @transform_4(%arg0: i32, %arg1: i32) -> (i32, i32, i32) {
    %c0_i32 = arith.constant 0 : i32
    %c0_i32_0 = arith.constant 0 : i32
    %c0_i32_1 = arith.constant 0 : i32
    return %arg0, %c0_i32, %c0_i32_0 : i32, i32, i32
  }
  func.func @transform_5(%arg0: i32, %arg1: i32) -> (i32, i32, i32) {
    %c2_i32 = arith.constant 2 : i32
    %0 = arith.muli %c2_i32, %arg1 : i32
    %c0_i32 = arith.constant 0 : i32
    %1 = arith.subi %c0_i32, %0 : i32
    %2 = arith.muli %arg0, %1 : i32
    %3 = arith.addi %arg1, %2 : i32
    %c0_i32_0 = arith.constant 0 : i32
    %c0_i32_1 = arith.constant 0 : i32
    return %3, %c0_i32_0, %arg0 : i32, i32, i32
  }
}

module attributes {stable_mosaic.version = 11 : i64} {
  func.func @_bilstm_layer_kernel(%arg0: i32, %arg1: i32, %arg2: memref<8x1xi32, #tpu.memory_space<vmem>>, %arg3: memref<1x8x8x512xbf16, #tpu.memory_space<vmem>>, %arg4: memref<1x128x512xbf16, #tpu.memory_space<vmem>>, %arg5: memref<1x8x128xf32, #tpu.memory_space<vmem>>, %arg6: memref<1x8x128xf32, #tpu.memory_space<vmem>>, %arg7: memref<8x8x128xf32, #tpu.memory_space<vmem>>, %arg8: memref<8x128xf32, #tpu.memory_space<vmem>>, %arg9: memref<8x128xf32, #tpu.memory_space<vmem>>) attributes {dimension_semantics = [#tpu.dimension_semantics<parallel>, #tpu.dimension_semantics<arbitrary>], iteration_bounds = array<i64: 2, 1>, scalar_prefetch = 0 : i64, scratch_operands = 2 : i64, tpu.core_type = #tpu.core_type<tc>, window_params = [{pipeline_mode = #tpu.pipeline_mode<synchronous>, transform_indices = @transform_0, window_bounds = array<i64: 8, 1>}, {transform_indices = @transform_1, window_bounds = array<i64: 1, 8, 8, 512>}, {transform_indices = @transform_2, window_bounds = array<i64: 1, 128, 512>}, {transform_indices = @transform_3, window_bounds = array<i64: 1, 8, 128>}, {transform_indices = @transform_4, window_bounds = array<i64: 1, 8, 128>}, {transform_indices = @transform_5, window_bounds = array<i64: 8, 8, 128>}]} {
    %c0_i32 = arith.constant 0 : i32
    %0 = arith.cmpi eq, %arg1, %c0_i32 : i32
    %1 = arith.extui %0 : i1 to i32
    %c0_i32_0 = arith.constant 0 : i32
    %2 = arith.cmpi ne, %1, %c0_i32_0 : i32
    scf.if %2 {
      %c0_126 = arith.constant 0 : index
      %c0_127 = arith.constant 0 : index
      %c0_128 = arith.constant 0 : index
      %467 = vector.load %arg5[%c0_126, %c0_127, %c0_128] : memref<1x8x128xf32, #tpu.memory_space<vmem>>, vector<1x8x128xf32>
      %468 = vector.shape_cast %467 : vector<1x8x128xf32> to vector<8x128xf32>
      %c0_129 = arith.constant 0 : index
      %c0_130 = arith.constant 0 : index
      %469 = vector.load %arg8[%c0_129, %c0_130] : memref<8x128xf32, #tpu.memory_space<vmem>>, vector<8x128xf32>
      tpu.vector_store %arg8[%c0_129, %c0_130], %468 {strides = array<i32>} : memref<8x128xf32, #tpu.memory_space<vmem>>, vector<8x128xf32>,
      %c0_131 = arith.constant 0 : index
      %c0_132 = arith.constant 0 : index
      %c0_133 = arith.constant 0 : index
      %470 = vector.load %arg6[%c0_131, %c0_132, %c0_133] : memref<1x8x128xf32, #tpu.memory_space<vmem>>, vector<1x8x128xf32>
      %471 = vector.shape_cast %470 : vector<1x8x128xf32> to vector<8x128xf32>
      %c0_134 = arith.constant 0 : index
      %c0_135 = arith.constant 0 : index
      %472 = vector.load %arg9[%c0_134, %c0_135] : memref<8x128xf32, #tpu.memory_space<vmem>>, vector<8x128xf32>
      tpu.vector_store %arg9[%c0_134, %c0_135], %471 {strides = array<i32>} : memref<8x128xf32, #tpu.memory_space<vmem>>, vector<8x128xf32>,
    } else {
    }
    %c0 = arith.constant 0 : index
    %c0_1 = arith.constant 0 : index
    %c0_2 = arith.constant 0 : index
    %3 = vector.load %arg4[%c0, %c0_1, %c0_2] : memref<1x128x512xbf16, #tpu.memory_space<vmem>>, vector<1x128x512xbf16>
    %4 = vector.shape_cast %3 : vector<1x128x512xbf16> to vector<128x512xbf16>
    %c0_3 = arith.constant 0 : index
    %c0_4 = arith.constant 0 : index
    %5 = vector.load %arg2[%c0_3, %c0_4] : memref<8x1xi32, #tpu.memory_space<vmem>>, vector<8x1xi32>
    %c8_i32 = arith.constant 8 : i32
    %6 = arith.muli %arg1, %c8_i32 : i32
    %c0_5 = arith.constant 0 : index
    %c0_6 = arith.constant 0 : index
    %7 = vector.load %arg8[%c0_5, %c0_6] : memref<8x128xf32, #tpu.memory_space<vmem>>, vector<8x128xf32>
    %c0_7 = arith.constant 0 : index
    %c0_8 = arith.constant 0 : index
    %8 = vector.load %arg9[%c0_7, %c0_8] : memref<8x128xf32, #tpu.memory_space<vmem>>, vector<8x128xf32>
    %c0_i32_9 = arith.constant 0 : i32
    %9 = arith.addi %6, %c0_i32_9 : i32
    %c2_i32 = arith.constant 2 : i32
    %10 = arith.muli %c2_i32, %9 : i32
    %c7_i32 = arith.constant 7 : i32
    %11 = arith.subi %c7_i32, %10 : i32
    %12 = arith.muli %arg0, %11 : i32
    %13 = arith.addi %9, %12 : i32
    %c0_10 = arith.constant 0 : index
    %14 = arith.index_cast %c0_i32_9 : i32 to index
    %c0_11 = arith.constant 0 : index
    %c0_12 = arith.constant 0 : index
    %15 = vector.load %arg3[%c0_10, %14, %c0_11, %c0_12] : memref<1x8x8x512xbf16, #tpu.memory_space<vmem>>, vector<1x1x8x512xbf16>
    %16 = vector.shape_cast %15 : vector<1x1x8x512xbf16> to vector<8x512xbf16>
    %17 = arith.extf %16 : vector<8x512xbf16> to vector<8x512xf32>
    %18 = arith.truncf %7 : vector<8x128xf32> to vector<8x128xbf16>
    %cst = arith.constant dense<0.000000e+00> : vector<8x512xf32>
    %19 = tpu.matmul %18, %4, %cst {dimension_numbers = #tpu.dot_dimension_numbers<[1], [0], [0], [1], [0, 0, 1, 1], [], []>} : vector<8x128xbf16>, vector<128x512xbf16>, vector<8x512xf32> -> vector<8x512xf32>
    %20 = arith.addf %17, %19 : vector<8x512xf32>
    %21 = vector.extract_strided_slice %20 {offsets = [0, 0], sizes = [8, 128], strides = [1, 1]} : vector<8x512xf32> to vector<8x128xf32>
    %22 = arith.negf %21 : vector<8x128xf32>
    %23 = math.exp %22 : vector<8x128xf32>
    %cst_13 = arith.constant 1.000000e+00 : f32
    %24 = vector.broadcast %cst_13 : f32 to vector<8x128xf32>
    %25 = arith.addf %24, %23 : vector<8x128xf32>
    %26 = arith.divf %24, %25 : vector<8x128xf32>
    %27 = vector.extract_strided_slice %20 {offsets = [0, 128], sizes = [8, 128], strides = [1, 1]} : vector<8x512xf32> to vector<8x128xf32>
    %28 = arith.negf %27 : vector<8x128xf32>
    %29 = math.exp %28 : vector<8x128xf32>
    %cst_14 = arith.constant 1.000000e+00 : f32
    %30 = vector.broadcast %cst_14 : f32 to vector<8x128xf32>
    %31 = arith.addf %30, %29 : vector<8x128xf32>
    %32 = arith.divf %30, %31 : vector<8x128xf32>
    %33 = vector.extract_strided_slice %20 {offsets = [0, 256], sizes = [8, 128], strides = [1, 1]} : vector<8x512xf32> to vector<8x128xf32>
    %34 = math.tanh %33 : vector<8x128xf32>
    %35 = vector.extract_strided_slice %20 {offsets = [0, 384], sizes = [8, 128], strides = [1, 1]} : vector<8x512xf32> to vector<8x128xf32>
    %36 = arith.negf %35 : vector<8x128xf32>
    %37 = math.exp %36 : vector<8x128xf32>
    %cst_15 = arith.constant 1.000000e+00 : f32
    %38 = vector.broadcast %cst_15 : f32 to vector<8x128xf32>
    %39 = arith.addf %38, %37 : vector<8x128xf32>
    %40 = arith.divf %38, %39 : vector<8x128xf32>
    %41 = arith.mulf %32, %8 : vector<8x128xf32>
    %42 = arith.mulf %26, %34 : vector<8x128xf32>
    %43 = arith.addf %41, %42 : vector<8x128xf32>
    %44 = math.tanh %43 : vector<8x128xf32>
    %45 = arith.mulf %40, %44 : vector<8x128xf32>
    %46 = vector.broadcast %13 : i32 to vector<8x1xi32>
    %47 = arith.cmpi slt, %46, %5 : vector<8x1xi32>
    %c2_i32_16 = arith.constant 2 : i32
    %48 = arith.muli %c2_i32_16, %c0_i32_9 : i32
    %c7_i32_17 = arith.constant 7 : i32
    %49 = arith.subi %c7_i32_17, %48 : i32
    %50 = arith.muli %arg0, %49 : i32
    %51 = arith.addi %c0_i32_9, %50 : i32
    %cst_18 = arith.constant 0.000000e+00 : f32
    %52 = vector.shape_cast %47 : vector<8x1xi1> to vector<8x1xi1>
    %53 = vector.broadcast %52 : vector<8x1xi1> to vector<8x128xi1>
    %54 = vector.broadcast %cst_18 : f32 to vector<8x128xf32>
    %55 = arith.select %53, %45, %54 : vector<8x128xi1>, vector<8x128xf32>
    %56 = arith.index_cast %51 : i32 to index
    %c0_19 = arith.constant 0 : index
    %c0_20 = arith.constant 0 : index
    %57 = vector.load %arg7[%56, %c0_19, %c0_20] : memref<8x8x128xf32, #tpu.memory_space<vmem>>, vector<1x8x128xf32>
    %58 = vector.shape_cast %57 : vector<1x8x128xf32> to vector<8x128xf32>
    %59 = vector.shape_cast %55 : vector<8x128xf32> to vector<1x8x128xf32>
    tpu.vector_store %arg7[%56, %c0_19, %c0_20], %59 {strides = array<i32>} : memref<8x8x128xf32, #tpu.memory_space<vmem>>, vector<1x8x128xf32>,
    %60 = vector.shape_cast %47 : vector<8x1xi1> to vector<8x1xi1>
    %61 = vector.broadcast %60 : vector<8x1xi1> to vector<8x128xi1>
    %62 = arith.select %61, %45, %7 : vector<8x128xi1>, vector<8x128xf32>
    %63 = vector.shape_cast %47 : vector<8x1xi1> to vector<8x1xi1>
    %64 = vector.broadcast %63 : vector<8x1xi1> to vector<8x128xi1>
    %65 = arith.select %64, %43, %8 : vector<8x128xi1>, vector<8x128xf32>
    %c1_i32 = arith.constant 1 : i32
    %66 = arith.addi %6, %c1_i32 : i32
    %c2_i32_21 = arith.constant 2 : i32
    %67 = arith.muli %c2_i32_21, %66 : i32
    %c7_i32_22 = arith.constant 7 : i32
    %68 = arith.subi %c7_i32_22, %67 : i32
    %69 = arith.muli %arg0, %68 : i32
    %70 = arith.addi %66, %69 : i32
    %c0_23 = arith.constant 0 : index
    %71 = arith.index_cast %c1_i32 : i32 to index
    %c0_24 = arith.constant 0 : index
    %c0_25 = arith.constant 0 : index
    %72 = vector.load %arg3[%c0_23, %71, %c0_24, %c0_25] : memref<1x8x8x512xbf16, #tpu.memory_space<vmem>>, vector<1x1x8x512xbf16>
    %73 = vector.shape_cast %72 : vector<1x1x8x512xbf16> to vector<8x512xbf16>
    %74 = arith.extf %73 : vector<8x512xbf16> to vector<8x512xf32>
    %75 = arith.truncf %62 : vector<8x128xf32> to vector<8x128xbf16>
    %cst_26 = arith.constant dense<0.000000e+00> : vector<8x512xf32>
    %76 = tpu.matmul %75, %4, %cst_26 {dimension_numbers = #tpu.dot_dimension_numbers<[1], [0], [0], [1], [0, 0, 1, 1], [], []>} : vector<8x128xbf16>, vector<128x512xbf16>, vector<8x512xf32> -> vector<8x512xf32>
    %77 = arith.addf %74, %76 : vector<8x512xf32>
    %78 = vector.extract_strided_slice %77 {offsets = [0, 0], sizes = [8, 128], strides = [1, 1]} : vector<8x512xf32> to vector<8x128xf32>
    %79 = arith.negf %78 : vector<8x128xf32>
    %80 = math.exp %79 : vector<8x128xf32>
    %cst_27 = arith.constant 1.000000e+00 : f32
    %81 = vector.broadcast %cst_27 : f32 to vector<8x128xf32>
    %82 = arith.addf %81, %80 : vector<8x128xf32>
    %83 = arith.divf %81, %82 : vector<8x128xf32>
    %84 = vector.extract_strided_slice %77 {offsets = [0, 128], sizes = [8, 128], strides = [1, 1]} : vector<8x512xf32> to vector<8x128xf32>
    %85 = arith.negf %84 : vector<8x128xf32>
    %86 = math.exp %85 : vector<8x128xf32>
    %cst_28 = arith.constant 1.000000e+00 : f32
    %87 = vector.broadcast %cst_28 : f32 to vector<8x128xf32>
    %88 = arith.addf %87, %86 : vector<8x128xf32>
    %89 = arith.divf %87, %88 : vector<8x128xf32>
    %90 = vector.extract_strided_slice %77 {offsets = [0, 256], sizes = [8, 128], strides = [1, 1]} : vector<8x512xf32> to vector<8x128xf32>
    %91 = math.tanh %90 : vector<8x128xf32>
    %92 = vector.extract_strided_slice %77 {offsets = [0, 384], sizes = [8, 128], strides = [1, 1]} : vector<8x512xf32> to vector<8x128xf32>
    %93 = arith.negf %92 : vector<8x128xf32>
    %94 = math.exp %93 : vector<8x128xf32>
    %cst_29 = arith.constant 1.000000e+00 : f32
    %95 = vector.broadcast %cst_29 : f32 to vector<8x128xf32>
    %96 = arith.addf %95, %94 : vector<8x128xf32>
    %97 = arith.divf %95, %96 : vector<8x128xf32>
    %98 = arith.mulf %89, %65 : vector<8x128xf32>
    %99 = arith.mulf %83, %91 : vector<8x128xf32>
    %100 = arith.addf %98, %99 : vector<8x128xf32>
    %101 = math.tanh %100 : vector<8x128xf32>
    %102 = arith.mulf %97, %101 : vector<8x128xf32>
    %103 = vector.broadcast %70 : i32 to vector<8x1xi32>
    %104 = arith.cmpi slt, %103, %5 : vector<8x1xi32>
    %c2_i32_30 = arith.constant 2 : i32
    %105 = arith.muli %c2_i32_30, %c1_i32 : i32
    %c7_i32_31 = arith.constant 7 : i32
    %106 = arith.subi %c7_i32_31, %105 : i32
    %107 = arith.muli %arg0, %106 : i32
    %108 = arith.addi %c1_i32, %107 : i32
    %cst_32 = arith.constant 0.000000e+00 : f32
    %109 = vector.shape_cast %104 : vector<8x1xi1> to vector<8x1xi1>
    %110 = vector.broadcast %109 : vector<8x1xi1> to vector<8x128xi1>
    %111 = vector.broadcast %cst_32 : f32 to vector<8x128xf32>
    %112 = arith.select %110, %102, %111 : vector<8x128xi1>, vector<8x128xf32>
    %113 = arith.index_cast %108 : i32 to index
    %c0_33 = arith.constant 0 : index
    %c0_34 = arith.constant 0 : index
    %114 = vector.load %arg7[%113, %c0_33, %c0_34] : memref<8x8x128xf32, #tpu.memory_space<vmem>>, vector<1x8x128xf32>
    %115 = vector.shape_cast %114 : vector<1x8x128xf32> to vector<8x128xf32>
    %116 = vector.shape_cast %112 : vector<8x128xf32> to vector<1x8x128xf32>
    tpu.vector_store %arg7[%113, %c0_33, %c0_34], %116 {strides = array<i32>} : memref<8x8x128xf32, #tpu.memory_space<vmem>>, vector<1x8x128xf32>,
    %117 = vector.shape_cast %104 : vector<8x1xi1> to vector<8x1xi1>
    %118 = vector.broadcast %117 : vector<8x1xi1> to vector<8x128xi1>
    %119 = arith.select %118, %102, %62 : vector<8x128xi1>, vector<8x128xf32>
    %120 = vector.shape_cast %104 : vector<8x1xi1> to vector<8x1xi1>
    %121 = vector.broadcast %120 : vector<8x1xi1> to vector<8x128xi1>
    %122 = arith.select %121, %100, %65 : vector<8x128xi1>, vector<8x128xf32>
    %c2_i32_35 = arith.constant 2 : i32
    %123 = arith.addi %6, %c2_i32_35 : i32
    %c2_i32_36 = arith.constant 2 : i32
    %124 = arith.muli %c2_i32_36, %123 : i32
    %c7_i32_37 = arith.constant 7 : i32
    %125 = arith.subi %c7_i32_37, %124 : i32
    %126 = arith.muli %arg0, %125 : i32
    %127 = arith.addi %123, %126 : i32
    %c0_38 = arith.constant 0 : index
    %128 = arith.index_cast %c2_i32_35 : i32 to index
    %c0_39 = arith.constant 0 : index
    %c0_40 = arith.constant 0 : index
    %129 = vector.load %arg3[%c0_38, %128, %c0_39, %c0_40] : memref<1x8x8x512xbf16, #tpu.memory_space<vmem>>, vector<1x1x8x512xbf16>
    %130 = vector.shape_cast %129 : vector<1x1x8x512xbf16> to vector<8x512xbf16>
    %131 = arith.extf %130 : vector<8x512xbf16> to vector<8x512xf32>
    %132 = arith.truncf %119 : vector<8x128xf32> to vector<8x128xbf16>
    %cst_41 = arith.constant dense<0.000000e+00> : vector<8x512xf32>
    %133 = tpu.matmul %132, %4, %cst_41 {dimension_numbers = #tpu.dot_dimension_numbers<[1], [0], [0], [1], [0, 0, 1, 1], [], []>} : vector<8x128xbf16>, vector<128x512xbf16>, vector<8x512xf32> -> vector<8x512xf32>
    %134 = arith.addf %131, %133 : vector<8x512xf32>
    %135 = vector.extract_strided_slice %134 {offsets = [0, 0], sizes = [8, 128], strides = [1, 1]} : vector<8x512xf32> to vector<8x128xf32>
    %136 = arith.negf %135 : vector<8x128xf32>
    %137 = math.exp %136 : vector<8x128xf32>
    %cst_42 = arith.constant 1.000000e+00 : f32
    %138 = vector.broadcast %cst_42 : f32 to vector<8x128xf32>
    %139 = arith.addf %138, %137 : vector<8x128xf32>
    %140 = arith.divf %138, %139 : vector<8x128xf32>
    %141 = vector.extract_strided_slice %134 {offsets = [0, 128], sizes = [8, 128], strides = [1, 1]} : vector<8x512xf32> to vector<8x128xf32>
    %142 = arith.negf %141 : vector<8x128xf32>
    %143 = math.exp %142 : vector<8x128xf32>
    %cst_43 = arith.constant 1.000000e+00 : f32
    %144 = vector.broadcast %cst_43 : f32 to vector<8x128xf32>
    %145 = arith.addf %144, %143 : vector<8x128xf32>
    %146 = arith.divf %144, %145 : vector<8x128xf32>
    %147 = vector.extract_strided_slice %134 {offsets = [0, 256], sizes = [8, 128], strides = [1, 1]} : vector<8x512xf32> to vector<8x128xf32>
    %148 = math.tanh %147 : vector<8x128xf32>
    %149 = vector.extract_strided_slice %134 {offsets = [0, 384], sizes = [8, 128], strides = [1, 1]} : vector<8x512xf32> to vector<8x128xf32>
    %150 = arith.negf %149 : vector<8x128xf32>
    %151 = math.exp %150 : vector<8x128xf32>
    %cst_44 = arith.constant 1.000000e+00 : f32
    %152 = vector.broadcast %cst_44 : f32 to vector<8x128xf32>
    %153 = arith.addf %152, %151 : vector<8x128xf32>
    %154 = arith.divf %152, %153 : vector<8x128xf32>
    %155 = arith.mulf %146, %122 : vector<8x128xf32>
    %156 = arith.mulf %140, %148 : vector<8x128xf32>
    %157 = arith.addf %155, %156 : vector<8x128xf32>
    %158 = math.tanh %157 : vector<8x128xf32>
    %159 = arith.mulf %154, %158 : vector<8x128xf32>
    %160 = vector.broadcast %127 : i32 to vector<8x1xi32>
    %161 = arith.cmpi slt, %160, %5 : vector<8x1xi32>
    %c2_i32_45 = arith.constant 2 : i32
    %162 = arith.muli %c2_i32_45, %c2_i32_35 : i32
    %c7_i32_46 = arith.constant 7 : i32
    %163 = arith.subi %c7_i32_46, %162 : i32
    %164 = arith.muli %arg0, %163 : i32
    %165 = arith.addi %c2_i32_35, %164 : i32
    %cst_47 = arith.constant 0.000000e+00 : f32
    %166 = vector.shape_cast %161 : vector<8x1xi1> to vector<8x1xi1>
    %167 = vector.broadcast %166 : vector<8x1xi1> to vector<8x128xi1>
    %168 = vector.broadcast %cst_47 : f32 to vector<8x128xf32>
    %169 = arith.select %167, %159, %168 : vector<8x128xi1>, vector<8x128xf32>
    %170 = arith.index_cast %165 : i32 to index
    %c0_48 = arith.constant 0 : index
    %c0_49 = arith.constant 0 : index
    %171 = vector.load %arg7[%170, %c0_48, %c0_49] : memref<8x8x128xf32, #tpu.memory_space<vmem>>, vector<1x8x128xf32>
    %172 = vector.shape_cast %171 : vector<1x8x128xf32> to vector<8x128xf32>
    %173 = vector.shape_cast %169 : vector<8x128xf32> to vector<1x8x128xf32>
    tpu.vector_store %arg7[%170, %c0_48, %c0_49], %173 {strides = array<i32>} : memref<8x8x128xf32, #tpu.memory_space<vmem>>, vector<1x8x128xf32>,
    %174 = vector.shape_cast %161 : vector<8x1xi1> to vector<8x1xi1>
    %175 = vector.broadcast %174 : vector<8x1xi1> to vector<8x128xi1>
    %176 = arith.select %175, %159, %119 : vector<8x128xi1>, vector<8x128xf32>
    %177 = vector.shape_cast %161 : vector<8x1xi1> to vector<8x1xi1>
    %178 = vector.broadcast %177 : vector<8x1xi1> to vector<8x128xi1>
    %179 = arith.select %178, %157, %122 : vector<8x128xi1>, vector<8x128xf32>
    %c3_i32 = arith.constant 3 : i32
    %180 = arith.addi %6, %c3_i32 : i32
    %c2_i32_50 = arith.constant 2 : i32
    %181 = arith.muli %c2_i32_50, %180 : i32
    %c7_i32_51 = arith.constant 7 : i32
    %182 = arith.subi %c7_i32_51, %181 : i32
    %183 = arith.muli %arg0, %182 : i32
    %184 = arith.addi %180, %183 : i32
    %c0_52 = arith.constant 0 : index
    %185 = arith.index_cast %c3_i32 : i32 to index
    %c0_53 = arith.constant 0 : index
    %c0_54 = arith.constant 0 : index
    %186 = vector.load %arg3[%c0_52, %185, %c0_53, %c0_54] : memref<1x8x8x512xbf16, #tpu.memory_space<vmem>>, vector<1x1x8x512xbf16>
    %187 = vector.shape_cast %186 : vector<1x1x8x512xbf16> to vector<8x512xbf16>
    %188 = arith.extf %187 : vector<8x512xbf16> to vector<8x512xf32>
    %189 = arith.truncf %176 : vector<8x128xf32> to vector<8x128xbf16>
    %cst_55 = arith.constant dense<0.000000e+00> : vector<8x512xf32>
    %190 = tpu.matmul %189, %4, %cst_55 {dimension_numbers = #tpu.dot_dimension_numbers<[1], [0], [0], [1], [0, 0, 1, 1], [], []>} : vector<8x128xbf16>, vector<128x512xbf16>, vector<8x512xf32> -> vector<8x512xf32>
    %191 = arith.addf %188, %190 : vector<8x512xf32>
    %192 = vector.extract_strided_slice %191 {offsets = [0, 0], sizes = [8, 128], strides = [1, 1]} : vector<8x512xf32> to vector<8x128xf32>
    %193 = arith.negf %192 : vector<8x128xf32>
    %194 = math.exp %193 : vector<8x128xf32>
    %cst_56 = arith.constant 1.000000e+00 : f32
    %195 = vector.broadcast %cst_56 : f32 to vector<8x128xf32>
    %196 = arith.addf %195, %194 : vector<8x128xf32>
    %197 = arith.divf %195, %196 : vector<8x128xf32>
    %198 = vector.extract_strided_slice %191 {offsets = [0, 128], sizes = [8, 128], strides = [1, 1]} : vector<8x512xf32> to vector<8x128xf32>
    %199 = arith.negf %198 : vector<8x128xf32>
    %200 = math.exp %199 : vector<8x128xf32>
    %cst_57 = arith.constant 1.000000e+00 : f32
    %201 = vector.broadcast %cst_57 : f32 to vector<8x128xf32>
    %202 = arith.addf %201, %200 : vector<8x128xf32>
    %203 = arith.divf %201, %202 : vector<8x128xf32>
    %204 = vector.extract_strided_slice %191 {offsets = [0, 256], sizes = [8, 128], strides = [1, 1]} : vector<8x512xf32> to vector<8x128xf32>
    %205 = math.tanh %204 : vector<8x128xf32>
    %206 = vector.extract_strided_slice %191 {offsets = [0, 384], sizes = [8, 128], strides = [1, 1]} : vector<8x512xf32> to vector<8x128xf32>
    %207 = arith.negf %206 : vector<8x128xf32>
    %208 = math.exp %207 : vector<8x128xf32>
    %cst_58 = arith.constant 1.000000e+00 : f32
    %209 = vector.broadcast %cst_58 : f32 to vector<8x128xf32>
    %210 = arith.addf %209, %208 : vector<8x128xf32>
    %211 = arith.divf %209, %210 : vector<8x128xf32>
    %212 = arith.mulf %203, %179 : vector<8x128xf32>
    %213 = arith.mulf %197, %205 : vector<8x128xf32>
    %214 = arith.addf %212, %213 : vector<8x128xf32>
    %215 = math.tanh %214 : vector<8x128xf32>
    %216 = arith.mulf %211, %215 : vector<8x128xf32>
    %217 = vector.broadcast %184 : i32 to vector<8x1xi32>
    %218 = arith.cmpi slt, %217, %5 : vector<8x1xi32>
    %c2_i32_59 = arith.constant 2 : i32
    %219 = arith.muli %c2_i32_59, %c3_i32 : i32
    %c7_i32_60 = arith.constant 7 : i32
    %220 = arith.subi %c7_i32_60, %219 : i32
    %221 = arith.muli %arg0, %220 : i32
    %222 = arith.addi %c3_i32, %221 : i32
    %cst_61 = arith.constant 0.000000e+00 : f32
    %223 = vector.shape_cast %218 : vector<8x1xi1> to vector<8x1xi1>
    %224 = vector.broadcast %223 : vector<8x1xi1> to vector<8x128xi1>
    %225 = vector.broadcast %cst_61 : f32 to vector<8x128xf32>
    %226 = arith.select %224, %216, %225 : vector<8x128xi1>, vector<8x128xf32>
    %227 = arith.index_cast %222 : i32 to index
    %c0_62 = arith.constant 0 : index
    %c0_63 = arith.constant 0 : index
    %228 = vector.load %arg7[%227, %c0_62, %c0_63] : memref<8x8x128xf32, #tpu.memory_space<vmem>>, vector<1x8x128xf32>
    %229 = vector.shape_cast %228 : vector<1x8x128xf32> to vector<8x128xf32>
    %230 = vector.shape_cast %226 : vector<8x128xf32> to vector<1x8x128xf32>
    tpu.vector_store %arg7[%227, %c0_62, %c0_63], %230 {strides = array<i32>} : memref<8x8x128xf32, #tpu.memory_space<vmem>>, vector<1x8x128xf32>,
    %231 = vector.shape_cast %218 : vector<8x1xi1> to vector<8x1xi1>
    %232 = vector.broadcast %231 : vector<8x1xi1> to vector<8x128xi1>
    %233 = arith.select %232, %216, %176 : vector<8x128xi1>, vector<8x128xf32>
    %234 = vector.shape_cast %218 : vector<8x1xi1> to vector<8x1xi1>
    %235 = vector.broadcast %234 : vector<8x1xi1> to vector<8x128xi1>
    %236 = arith.select %235, %214, %179 : vector<8x128xi1>, vector<8x128xf32>
    %c4_i32 = arith.constant 4 : i32
    %237 = arith.addi %6, %c4_i32 : i32
    %c2_i32_64 = arith.constant 2 : i32
    %238 = arith.muli %c2_i32_64, %237 : i32
    %c7_i32_65 = arith.constant 7 : i32
    %239 = arith.subi %c7_i32_65, %238 : i32
    %240 = arith.muli %arg0, %239 : i32
    %241 = arith.addi %237, %240 : i32
    %c0_66 = arith.constant 0 : index
    %242 = arith.index_cast %c4_i32 : i32 to index
    %c0_67 = arith.constant 0 : index
    %c0_68 = arith.constant 0 : index
    %243 = vector.load %arg3[%c0_66, %242, %c0_67, %c0_68] : memref<1x8x8x512xbf16, #tpu.memory_space<vmem>>, vector<1x1x8x512xbf16>
    %244 = vector.shape_cast %243 : vector<1x1x8x512xbf16> to vector<8x512xbf16>
    %245 = arith.extf %244 : vector<8x512xbf16> to vector<8x512xf32>
    %246 = arith.truncf %233 : vector<8x128xf32> to vector<8x128xbf16>
    %cst_69 = arith.constant dense<0.000000e+00> : vector<8x512xf32>
    %247 = tpu.matmul %246, %4, %cst_69 {dimension_numbers = #tpu.dot_dimension_numbers<[1], [0], [0], [1], [0, 0, 1, 1], [], []>} : vector<8x128xbf16>, vector<128x512xbf16>, vector<8x512xf32> -> vector<8x512xf32>
    %248 = arith.addf %245, %247 : vector<8x512xf32>
    %249 = vector.extract_strided_slice %248 {offsets = [0, 0], sizes = [8, 128], strides = [1, 1]} : vector<8x512xf32> to vector<8x128xf32>
    %250 = arith.negf %249 : vector<8x128xf32>
    %251 = math.exp %250 : vector<8x128xf32>
    %cst_70 = arith.constant 1.000000e+00 : f32
    %252 = vector.broadcast %cst_70 : f32 to vector<8x128xf32>
    %253 = arith.addf %252, %251 : vector<8x128xf32>
    %254 = arith.divf %252, %253 : vector<8x128xf32>
    %255 = vector.extract_strided_slice %248 {offsets = [0, 128], sizes = [8, 128], strides = [1, 1]} : vector<8x512xf32> to vector<8x128xf32>
    %256 = arith.negf %255 : vector<8x128xf32>
    %257 = math.exp %256 : vector<8x128xf32>
    %cst_71 = arith.constant 1.000000e+00 : f32
    %258 = vector.broadcast %cst_71 : f32 to vector<8x128xf32>
    %259 = arith.addf %258, %257 : vector<8x128xf32>
    %260 = arith.divf %258, %259 : vector<8x128xf32>
    %261 = vector.extract_strided_slice %248 {offsets = [0, 256], sizes = [8, 128], strides = [1, 1]} : vector<8x512xf32> to vector<8x128xf32>
    %262 = math.tanh %261 : vector<8x128xf32>
    %263 = vector.extract_strided_slice %248 {offsets = [0, 384], sizes = [8, 128], strides = [1, 1]} : vector<8x512xf32> to vector<8x128xf32>
    %264 = arith.negf %263 : vector<8x128xf32>
    %265 = math.exp %264 : vector<8x128xf32>
    %cst_72 = arith.constant 1.000000e+00 : f32
    %266 = vector.broadcast %cst_72 : f32 to vector<8x128xf32>
    %267 = arith.addf %266, %265 : vector<8x128xf32>
    %268 = arith.divf %266, %267 : vector<8x128xf32>
    %269 = arith.mulf %260, %236 : vector<8x128xf32>
    %270 = arith.mulf %254, %262 : vector<8x128xf32>
    %271 = arith.addf %269, %270 : vector<8x128xf32>
    %272 = math.tanh %271 : vector<8x128xf32>
    %273 = arith.mulf %268, %272 : vector<8x128xf32>
    %274 = vector.broadcast %241 : i32 to vector<8x1xi32>
    %275 = arith.cmpi slt, %274, %5 : vector<8x1xi32>
    %c2_i32_73 = arith.constant 2 : i32
    %276 = arith.muli %c2_i32_73, %c4_i32 : i32
    %c7_i32_74 = arith.constant 7 : i32
    %277 = arith.subi %c7_i32_74, %276 : i32
    %278 = arith.muli %arg0, %277 : i32
    %279 = arith.addi %c4_i32, %278 : i32
    %cst_75 = arith.constant 0.000000e+00 : f32
    %280 = vector.shape_cast %275 : vector<8x1xi1> to vector<8x1xi1>
    %281 = vector.broadcast %280 : vector<8x1xi1> to vector<8x128xi1>
    %282 = vector.broadcast %cst_75 : f32 to vector<8x128xf32>
    %283 = arith.select %281, %273, %282 : vector<8x128xi1>, vector<8x128xf32>
    %284 = arith.index_cast %279 : i32 to index
    %c0_76 = arith.constant 0 : index
    %c0_77 = arith.constant 0 : index
    %285 = vector.load %arg7[%284, %c0_76, %c0_77] : memref<8x8x128xf32, #tpu.memory_space<vmem>>, vector<1x8x128xf32>
    %286 = vector.shape_cast %285 : vector<1x8x128xf32> to vector<8x128xf32>
    %287 = vector.shape_cast %283 : vector<8x128xf32> to vector<1x8x128xf32>
    tpu.vector_store %arg7[%284, %c0_76, %c0_77], %287 {strides = array<i32>} : memref<8x8x128xf32, #tpu.memory_space<vmem>>, vector<1x8x128xf32>,
    %288 = vector.shape_cast %275 : vector<8x1xi1> to vector<8x1xi1>
    %289 = vector.broadcast %288 : vector<8x1xi1> to vector<8x128xi1>
    %290 = arith.select %289, %273, %233 : vector<8x128xi1>, vector<8x128xf32>
    %291 = vector.shape_cast %275 : vector<8x1xi1> to vector<8x1xi1>
    %292 = vector.broadcast %291 : vector<8x1xi1> to vector<8x128xi1>
    %293 = arith.select %292, %271, %236 : vector<8x128xi1>, vector<8x128xf32>
    %c5_i32 = arith.constant 5 : i32
    %294 = arith.addi %6, %c5_i32 : i32
    %c2_i32_78 = arith.constant 2 : i32
    %295 = arith.muli %c2_i32_78, %294 : i32
    %c7_i32_79 = arith.constant 7 : i32
    %296 = arith.subi %c7_i32_79, %295 : i32
    %297 = arith.muli %arg0, %296 : i32
    %298 = arith.addi %294, %297 : i32
    %c0_80 = arith.constant 0 : index
    %299 = arith.index_cast %c5_i32 : i32 to index
    %c0_81 = arith.constant 0 : index
    %c0_82 = arith.constant 0 : index
    %300 = vector.load %arg3[%c0_80, %299, %c0_81, %c0_82] : memref<1x8x8x512xbf16, #tpu.memory_space<vmem>>, vector<1x1x8x512xbf16>
    %301 = vector.shape_cast %300 : vector<1x1x8x512xbf16> to vector<8x512xbf16>
    %302 = arith.extf %301 : vector<8x512xbf16> to vector<8x512xf32>
    %303 = arith.truncf %290 : vector<8x128xf32> to vector<8x128xbf16>
    %cst_83 = arith.constant dense<0.000000e+00> : vector<8x512xf32>
    %304 = tpu.matmul %303, %4, %cst_83 {dimension_numbers = #tpu.dot_dimension_numbers<[1], [0], [0], [1], [0, 0, 1, 1], [], []>} : vector<8x128xbf16>, vector<128x512xbf16>, vector<8x512xf32> -> vector<8x512xf32>
    %305 = arith.addf %302, %304 : vector<8x512xf32>
    %306 = vector.extract_strided_slice %305 {offsets = [0, 0], sizes = [8, 128], strides = [1, 1]} : vector<8x512xf32> to vector<8x128xf32>
    %307 = arith.negf %306 : vector<8x128xf32>
    %308 = math.exp %307 : vector<8x128xf32>
    %cst_84 = arith.constant 1.000000e+00 : f32
    %309 = vector.broadcast %cst_84 : f32 to vector<8x128xf32>
    %310 = arith.addf %309, %308 : vector<8x128xf32>
    %311 = arith.divf %309, %310 : vector<8x128xf32>
    %312 = vector.extract_strided_slice %305 {offsets = [0, 128], sizes = [8, 128], strides = [1, 1]} : vector<8x512xf32> to vector<8x128xf32>
    %313 = arith.negf %312 : vector<8x128xf32>
    %314 = math.exp %313 : vector<8x128xf32>
    %cst_85 = arith.constant 1.000000e+00 : f32
    %315 = vector.broadcast %cst_85 : f32 to vector<8x128xf32>
    %316 = arith.addf %315, %314 : vector<8x128xf32>
    %317 = arith.divf %315, %316 : vector<8x128xf32>
    %318 = vector.extract_strided_slice %305 {offsets = [0, 256], sizes = [8, 128], strides = [1, 1]} : vector<8x512xf32> to vector<8x128xf32>
    %319 = math.tanh %318 : vector<8x128xf32>
    %320 = vector.extract_strided_slice %305 {offsets = [0, 384], sizes = [8, 128], strides = [1, 1]} : vector<8x512xf32> to vector<8x128xf32>
    %321 = arith.negf %320 : vector<8x128xf32>
    %322 = math.exp %321 : vector<8x128xf32>
    %cst_86 = arith.constant 1.000000e+00 : f32
    %323 = vector.broadcast %cst_86 : f32 to vector<8x128xf32>
    %324 = arith.addf %323, %322 : vector<8x128xf32>
    %325 = arith.divf %323, %324 : vector<8x128xf32>
    %326 = arith.mulf %317, %293 : vector<8x128xf32>
    %327 = arith.mulf %311, %319 : vector<8x128xf32>
    %328 = arith.addf %326, %327 : vector<8x128xf32>
    %329 = math.tanh %328 : vector<8x128xf32>
    %330 = arith.mulf %325, %329 : vector<8x128xf32>
    %331 = vector.broadcast %298 : i32 to vector<8x1xi32>
    %332 = arith.cmpi slt, %331, %5 : vector<8x1xi32>
    %c2_i32_87 = arith.constant 2 : i32
    %333 = arith.muli %c2_i32_87, %c5_i32 : i32
    %c7_i32_88 = arith.constant 7 : i32
    %334 = arith.subi %c7_i32_88, %333 : i32
    %335 = arith.muli %arg0, %334 : i32
    %336 = arith.addi %c5_i32, %335 : i32
    %cst_89 = arith.constant 0.000000e+00 : f32
    %337 = vector.shape_cast %332 : vector<8x1xi1> to vector<8x1xi1>
    %338 = vector.broadcast %337 : vector<8x1xi1> to vector<8x128xi1>
    %339 = vector.broadcast %cst_89 : f32 to vector<8x128xf32>
    %340 = arith.select %338, %330, %339 : vector<8x128xi1>, vector<8x128xf32>
    %341 = arith.index_cast %336 : i32 to index
    %c0_90 = arith.constant 0 : index
    %c0_91 = arith.constant 0 : index
    %342 = vector.load %arg7[%341, %c0_90, %c0_91] : memref<8x8x128xf32, #tpu.memory_space<vmem>>, vector<1x8x128xf32>
    %343 = vector.shape_cast %342 : vector<1x8x128xf32> to vector<8x128xf32>
    %344 = vector.shape_cast %340 : vector<8x128xf32> to vector<1x8x128xf32>
    tpu.vector_store %arg7[%341, %c0_90, %c0_91], %344 {strides = array<i32>} : memref<8x8x128xf32, #tpu.memory_space<vmem>>, vector<1x8x128xf32>,
    %345 = vector.shape_cast %332 : vector<8x1xi1> to vector<8x1xi1>
    %346 = vector.broadcast %345 : vector<8x1xi1> to vector<8x128xi1>
    %347 = arith.select %346, %330, %290 : vector<8x128xi1>, vector<8x128xf32>
    %348 = vector.shape_cast %332 : vector<8x1xi1> to vector<8x1xi1>
    %349 = vector.broadcast %348 : vector<8x1xi1> to vector<8x128xi1>
    %350 = arith.select %349, %328, %293 : vector<8x128xi1>, vector<8x128xf32>
    %c6_i32 = arith.constant 6 : i32
    %351 = arith.addi %6, %c6_i32 : i32
    %c2_i32_92 = arith.constant 2 : i32
    %352 = arith.muli %c2_i32_92, %351 : i32
    %c7_i32_93 = arith.constant 7 : i32
    %353 = arith.subi %c7_i32_93, %352 : i32
    %354 = arith.muli %arg0, %353 : i32
    %355 = arith.addi %351, %354 : i32
    %c0_94 = arith.constant 0 : index
    %356 = arith.index_cast %c6_i32 : i32 to index
    %c0_95 = arith.constant 0 : index
    %c0_96 = arith.constant 0 : index
    %357 = vector.load %arg3[%c0_94, %356, %c0_95, %c0_96] : memref<1x8x8x512xbf16, #tpu.memory_space<vmem>>, vector<1x1x8x512xbf16>
    %358 = vector.shape_cast %357 : vector<1x1x8x512xbf16> to vector<8x512xbf16>
    %359 = arith.extf %358 : vector<8x512xbf16> to vector<8x512xf32>
    %360 = arith.truncf %347 : vector<8x128xf32> to vector<8x128xbf16>
    %cst_97 = arith.constant dense<0.000000e+00> : vector<8x512xf32>
    %361 = tpu.matmul %360, %4, %cst_97 {dimension_numbers = #tpu.dot_dimension_numbers<[1], [0], [0], [1], [0, 0, 1, 1], [], []>} : vector<8x128xbf16>, vector<128x512xbf16>, vector<8x512xf32> -> vector<8x512xf32>
    %362 = arith.addf %359, %361 : vector<8x512xf32>
    %363 = vector.extract_strided_slice %362 {offsets = [0, 0], sizes = [8, 128], strides = [1, 1]} : vector<8x512xf32> to vector<8x128xf32>
    %364 = arith.negf %363 : vector<8x128xf32>
    %365 = math.exp %364 : vector<8x128xf32>
    %cst_98 = arith.constant 1.000000e+00 : f32
    %366 = vector.broadcast %cst_98 : f32 to vector<8x128xf32>
    %367 = arith.addf %366, %365 : vector<8x128xf32>
    %368 = arith.divf %366, %367 : vector<8x128xf32>
    %369 = vector.extract_strided_slice %362 {offsets = [0, 128], sizes = [8, 128], strides = [1, 1]} : vector<8x512xf32> to vector<8x128xf32>
    %370 = arith.negf %369 : vector<8x128xf32>
    %371 = math.exp %370 : vector<8x128xf32>
    %cst_99 = arith.constant 1.000000e+00 : f32
    %372 = vector.broadcast %cst_99 : f32 to vector<8x128xf32>
    %373 = arith.addf %372, %371 : vector<8x128xf32>
    %374 = arith.divf %372, %373 : vector<8x128xf32>
    %375 = vector.extract_strided_slice %362 {offsets = [0, 256], sizes = [8, 128], strides = [1, 1]} : vector<8x512xf32> to vector<8x128xf32>
    %376 = math.tanh %375 : vector<8x128xf32>
    %377 = vector.extract_strided_slice %362 {offsets = [0, 384], sizes = [8, 128], strides = [1, 1]} : vector<8x512xf32> to vector<8x128xf32>
    %378 = arith.negf %377 : vector<8x128xf32>
    %379 = math.exp %378 : vector<8x128xf32>
    %cst_100 = arith.constant 1.000000e+00 : f32
    %380 = vector.broadcast %cst_100 : f32 to vector<8x128xf32>
    %381 = arith.addf %380, %379 : vector<8x128xf32>
    %382 = arith.divf %380, %381 : vector<8x128xf32>
    %383 = arith.mulf %374, %350 : vector<8x128xf32>
    %384 = arith.mulf %368, %376 : vector<8x128xf32>
    %385 = arith.addf %383, %384 : vector<8x128xf32>
    %386 = math.tanh %385 : vector<8x128xf32>
    %387 = arith.mulf %382, %386 : vector<8x128xf32>
    %388 = vector.broadcast %355 : i32 to vector<8x1xi32>
    %389 = arith.cmpi slt, %388, %5 : vector<8x1xi32>
    %c2_i32_101 = arith.constant 2 : i32
    %390 = arith.muli %c2_i32_101, %c6_i32 : i32
    %c7_i32_102 = arith.constant 7 : i32
    %391 = arith.subi %c7_i32_102, %390 : i32
    %392 = arith.muli %arg0, %391 : i32
    %393 = arith.addi %c6_i32, %392 : i32
    %cst_103 = arith.constant 0.000000e+00 : f32
    %394 = vector.shape_cast %389 : vector<8x1xi1> to vector<8x1xi1>
    %395 = vector.broadcast %394 : vector<8x1xi1> to vector<8x128xi1>
    %396 = vector.broadcast %cst_103 : f32 to vector<8x128xf32>
    %397 = arith.select %395, %387, %396 : vector<8x128xi1>, vector<8x128xf32>
    %398 = arith.index_cast %393 : i32 to index
    %c0_104 = arith.constant 0 : index
    %c0_105 = arith.constant 0 : index
    %399 = vector.load %arg7[%398, %c0_104, %c0_105] : memref<8x8x128xf32, #tpu.memory_space<vmem>>, vector<1x8x128xf32>
    %400 = vector.shape_cast %399 : vector<1x8x128xf32> to vector<8x128xf32>
    %401 = vector.shape_cast %397 : vector<8x128xf32> to vector<1x8x128xf32>
    tpu.vector_store %arg7[%398, %c0_104, %c0_105], %401 {strides = array<i32>} : memref<8x8x128xf32, #tpu.memory_space<vmem>>, vector<1x8x128xf32>,
    %402 = vector.shape_cast %389 : vector<8x1xi1> to vector<8x1xi1>
    %403 = vector.broadcast %402 : vector<8x1xi1> to vector<8x128xi1>
    %404 = arith.select %403, %387, %347 : vector<8x128xi1>, vector<8x128xf32>
    %405 = vector.shape_cast %389 : vector<8x1xi1> to vector<8x1xi1>
    %406 = vector.broadcast %405 : vector<8x1xi1> to vector<8x128xi1>
    %407 = arith.select %406, %385, %350 : vector<8x128xi1>, vector<8x128xf32>
    %c7_i32_106 = arith.constant 7 : i32
    %408 = arith.addi %6, %c7_i32_106 : i32
    %c2_i32_107 = arith.constant 2 : i32
    %409 = arith.muli %c2_i32_107, %408 : i32
    %c7_i32_108 = arith.constant 7 : i32
    %410 = arith.subi %c7_i32_108, %409 : i32
    %411 = arith.muli %arg0, %410 : i32
    %412 = arith.addi %408, %411 : i32
    %c0_109 = arith.constant 0 : index
    %413 = arith.index_cast %c7_i32_106 : i32 to index
    %c0_110 = arith.constant 0 : index
    %c0_111 = arith.constant 0 : index
    %414 = vector.load %arg3[%c0_109, %413, %c0_110, %c0_111] : memref<1x8x8x512xbf16, #tpu.memory_space<vmem>>, vector<1x1x8x512xbf16>
    %415 = vector.shape_cast %414 : vector<1x1x8x512xbf16> to vector<8x512xbf16>
    %416 = arith.extf %415 : vector<8x512xbf16> to vector<8x512xf32>
    %417 = arith.truncf %404 : vector<8x128xf32> to vector<8x128xbf16>
    %cst_112 = arith.constant dense<0.000000e+00> : vector<8x512xf32>
    %418 = tpu.matmul %417, %4, %cst_112 {dimension_numbers = #tpu.dot_dimension_numbers<[1], [0], [0], [1], [0, 0, 1, 1], [], []>} : vector<8x128xbf16>, vector<128x512xbf16>, vector<8x512xf32> -> vector<8x512xf32>
    %419 = arith.addf %416, %418 : vector<8x512xf32>
    %420 = vector.extract_strided_slice %419 {offsets = [0, 0], sizes = [8, 128], strides = [1, 1]} : vector<8x512xf32> to vector<8x128xf32>
    %421 = arith.negf %420 : vector<8x128xf32>
    %422 = math.exp %421 : vector<8x128xf32>
    %cst_113 = arith.constant 1.000000e+00 : f32
    %423 = vector.broadcast %cst_113 : f32 to vector<8x128xf32>
    %424 = arith.addf %423, %422 : vector<8x128xf32>
    %425 = arith.divf %423, %424 : vector<8x128xf32>
    %426 = vector.extract_strided_slice %419 {offsets = [0, 128], sizes = [8, 128], strides = [1, 1]} : vector<8x512xf32> to vector<8x128xf32>
    %427 = arith.negf %426 : vector<8x128xf32>
    %428 = math.exp %427 : vector<8x128xf32>
    %cst_114 = arith.constant 1.000000e+00 : f32
    %429 = vector.broadcast %cst_114 : f32 to vector<8x128xf32>
    %430 = arith.addf %429, %428 : vector<8x128xf32>
    %431 = arith.divf %429, %430 : vector<8x128xf32>
    %432 = vector.extract_strided_slice %419 {offsets = [0, 256], sizes = [8, 128], strides = [1, 1]} : vector<8x512xf32> to vector<8x128xf32>
    %433 = math.tanh %432 : vector<8x128xf32>
    %434 = vector.extract_strided_slice %419 {offsets = [0, 384], sizes = [8, 128], strides = [1, 1]} : vector<8x512xf32> to vector<8x128xf32>
    %435 = arith.negf %434 : vector<8x128xf32>
    %436 = math.exp %435 : vector<8x128xf32>
    %cst_115 = arith.constant 1.000000e+00 : f32
    %437 = vector.broadcast %cst_115 : f32 to vector<8x128xf32>
    %438 = arith.addf %437, %436 : vector<8x128xf32>
    %439 = arith.divf %437, %438 : vector<8x128xf32>
    %440 = arith.mulf %431, %407 : vector<8x128xf32>
    %441 = arith.mulf %425, %433 : vector<8x128xf32>
    %442 = arith.addf %440, %441 : vector<8x128xf32>
    %443 = math.tanh %442 : vector<8x128xf32>
    %444 = arith.mulf %439, %443 : vector<8x128xf32>
    %445 = vector.broadcast %412 : i32 to vector<8x1xi32>
    %446 = arith.cmpi slt, %445, %5 : vector<8x1xi32>
    %c2_i32_116 = arith.constant 2 : i32
    %447 = arith.muli %c2_i32_116, %c7_i32_106 : i32
    %c7_i32_117 = arith.constant 7 : i32
    %448 = arith.subi %c7_i32_117, %447 : i32
    %449 = arith.muli %arg0, %448 : i32
    %450 = arith.addi %c7_i32_106, %449 : i32
    %cst_118 = arith.constant 0.000000e+00 : f32
    %451 = vector.shape_cast %446 : vector<8x1xi1> to vector<8x1xi1>
    %452 = vector.broadcast %451 : vector<8x1xi1> to vector<8x128xi1>
    %453 = vector.broadcast %cst_118 : f32 to vector<8x128xf32>
    %454 = arith.select %452, %444, %453 : vector<8x128xi1>, vector<8x128xf32>
    %455 = arith.index_cast %450 : i32 to index
    %c0_119 = arith.constant 0 : index
    %c0_120 = arith.constant 0 : index
    %456 = vector.load %arg7[%455, %c0_119, %c0_120] : memref<8x8x128xf32, #tpu.memory_space<vmem>>, vector<1x8x128xf32>
    %457 = vector.shape_cast %456 : vector<1x8x128xf32> to vector<8x128xf32>
    %458 = vector.shape_cast %454 : vector<8x128xf32> to vector<1x8x128xf32>
    tpu.vector_store %arg7[%455, %c0_119, %c0_120], %458 {strides = array<i32>} : memref<8x8x128xf32, #tpu.memory_space<vmem>>, vector<1x8x128xf32>,
    %459 = vector.shape_cast %446 : vector<8x1xi1> to vector<8x1xi1>
    %460 = vector.broadcast %459 : vector<8x1xi1> to vector<8x128xi1>
    %461 = arith.select %460, %444, %404 : vector<8x128xi1>, vector<8x128xf32>
    %462 = vector.shape_cast %446 : vector<8x1xi1> to vector<8x1xi1>
    %463 = vector.broadcast %462 : vector<8x1xi1> to vector<8x128xi1>
    %464 = arith.select %463, %442, %407 : vector<8x128xi1>, vector<8x128xf32>
    %c8_i32_121 = arith.constant 8 : i32
    %c0_122 = arith.constant 0 : index
    %c0_123 = arith.constant 0 : index
    %465 = vector.load %arg8[%c0_122, %c0_123] : memref<8x128xf32, #tpu.memory_space<vmem>>, vector<8x128xf32>
    tpu.vector_store %arg8[%c0_122, %c0_123], %461 {strides = array<i32>} : memref<8x128xf32, #tpu.memory_space<vmem>>, vector<8x128xf32>,
    %c0_124 = arith.constant 0 : index
    %c0_125 = arith.constant 0 : index
    %466 = vector.load %arg9[%c0_124, %c0_125] : memref<8x128xf32, #tpu.memory_space<vmem>>, vector<8x128xf32>
    tpu.vector_store %arg9[%c0_124, %c0_125], %464 {strides = array<i32>} : memref<8x128xf32, #tpu.memory_space<vmem>>, vector<8x128xf32>,
    return
  }
  func.func @transform_0(%arg0: i32, %arg1: i32) -> (i32, i32) {
    %c0_i32 = arith.constant 0 : i32
    %c0_i32_0 = arith.constant 0 : i32
    %c0_i32_1 = arith.constant 0 : i32
    return %c0_i32, %c0_i32_0 : i32, i32
  }
  func.func @transform_1(%arg0: i32, %arg1: i32) -> (i32, i32, i32, i32) {
    %c0_i32 = arith.constant 0 : i32
    %c0_i32_0 = arith.constant 0 : i32
    %c0_i32_1 = arith.constant 0 : i32
    return %arg0, %arg1, %c0_i32, %c0_i32_0 : i32, i32, i32, i32
  }
  func.func @transform_2(%arg0: i32, %arg1: i32) -> (i32, i32, i32) {
    %c0_i32 = arith.constant 0 : i32
    %c0_i32_0 = arith.constant 0 : i32
    %c0_i32_1 = arith.constant 0 : i32
    return %arg0, %c0_i32, %c0_i32_0 : i32, i32, i32
  }
  func.func @transform_3(%arg0: i32, %arg1: i32) -> (i32, i32, i32) {
    %c0_i32 = arith.constant 0 : i32
    %c0_i32_0 = arith.constant 0 : i32
    %c0_i32_1 = arith.constant 0 : i32
    return %arg0, %c0_i32, %c0_i32_0 : i32, i32, i32
  }
  func.func @transform_4(%arg0: i32, %arg1: i32) -> (i32, i32, i32) {
    %c0_i32 = arith.constant 0 : i32
    %c0_i32_0 = arith.constant 0 : i32
    %c0_i32_1 = arith.constant 0 : i32
    return %arg0, %c0_i32, %c0_i32_0 : i32, i32, i32
  }
  func.func @transform_5(%arg0: i32, %arg1: i32) -> (i32, i32, i32) {
    %c2_i32 = arith.constant 2 : i32
    %0 = arith.muli %c2_i32, %arg1 : i32
    %c0_i32 = arith.constant 0 : i32
    %1 = arith.subi %c0_i32, %0 : i32
    %2 = arith.muli %arg0, %1 : i32
    %3 = arith.addi %arg1, %2 : i32
    %c0_i32_0 = arith.constant 0 : i32
    %c0_i32_1 = arith.constant 0 : i32
    return %3, %c0_i32_0, %arg0 : i32, i32, i32
  }
}

</mosaic_0001>

<bundles_post_ra>
// kernel: lstm_encoder_forward.3
= control target key start
LH: loop header
LB: loop body
LE: loop exit
PB: predicated region body
PF: predicated region fallthrough
CT: control target
= control target key end

     0   :  { %s2259_s18 = smov 0   ;;  %s2261_s19 = smov 0   ;;  %s2947_s0 = inlined_call_operand.vmem [shape: s32[8,1], index: 0, kind: input, shape index: {}]   ;;  %s2948_s1 = inlined_call_operand.vmem [shape: bf16[2,8,8,512], index: 1, kind: input, shape index: {}]   ;;  %s2949_s2 = inlined_call_operand.vmem [shape: bf16[2,128,512], index: 2, kind: input, shape index: {}]   ;;  %s2950_s3 = inlined_call_operand.vmem [shape: f32[2,8,128], index: 3, kind: input, shape index: {}]   ;;  %s2951_s4 = inlined_call_operand.vmem [shape: f32[2,8,128], index: 4, kind: input, shape index: {}]   ;;  %s2952_s5 = inlined_call_operand.vmem [shape: f32[8,8,256], index: 5, kind: output, shape index: {}]  }
   0x1   :  { %s2263_s20 = smov 0   ;;  %s2265_s21 = smov 0  }
   0x2   :  { %s2267_s22 = smov 0  }
   0x3 LB: > { %s1835_s23 = sadd.s32 4294967295, %s2226_s22   ;;  %s27_s24 = sadd.s32 1, %s2222_s21  ;;  %s2226_s22 = sphi %s2267_s22, %s15_s22   ;;  %s2222_s21 = sphi %s2265_s21, %s2957_s21   ;;  %s2218_s20 = sphi %s2263_s20, %s2956_s20   ;;  %s2214_s19 = sphi %s2261_s19, %s2955_s19   ;;  %s2210_s18 = sphi %s2259_s18, %s2954_s18  }
   0x4   : > { %p29_p0 = scmp.ge.s32.totalorder %s27_s24, 2  ;;  %s171_s25 = sadd.s32 1, %s2214_s19 }
   0x5   : > { %p181_p1 = scmp.ne.s32.totalorder %s2214_s19, %s2210_s18  ;;  %p182_p2 = scmp.eq.s32.totalorder %s1835_s23, 1 }
   0x6   : > { %s2959_s24 = smov (%p29_p0, %s27_s24), 0  ;;  %p1839_p4 = scmp.ge.s32.totalorder %s2226_s22, 1 }
   0x7   : > { %p2291_p3 = por %p182_p2, %p181_p1  ;;  %s167_s27 = ssub.s32 %s2222_s21, %s2959_s24 }
   0x8   : > { %p245_p5 = scmp.lt.s32.totalorder %s2226_s22, 3  ;;  %p169_p6 = scmp.eq.s32.totalorder %s167_s27, 0 }
   0xa   : > { %p246_p7 = pnand %p1839_p4, %p245_p5 }
   0xb   : > { %s2300_s28 = scalar_select %p169_p6, %s2214_s19, %s171_s25  }
   0xc   : > { %249 = sbr.rel (%p246_p7) target bundleno = 2154 (0x86a), region = 40  ;;  %p291_p8 = scmp.lt.s32.totalorder (!%p246_p7), %s2218_s20, 1  ;;  %v2306_v0 = vld [vmem:[%s2947_s0] sm:$0xff] (!%p246_p7)  ;;  %v2228_v1 = vmov (!%p246_p7), 0  }
   0xd   : > { %s366_s6 = smul.u32 (!%p246_p7), 7, %s2218_s20  ;;  %567 = vmatprep.mubr.bf16.mxu0 (!%p246_p7), %v2228_v1  ;;  %608 = vmatprep.mubr.bf16.mxu1 (!%p246_p7), %v2228_v1 }
   0xe   : > { %s662_s7 = smul.u32 (!%p246_p7), 5, %s2218_s20  ;;  %1978 = vset.pattern.permute.xlu0 (!%p246_p7), %v2228_v1  ;;  %1979 = vset.pattern.permute.xlu1 (!%p246_p7), %v2228_v1 }
   0xf   : > { %v645_v2 = vstv (!%p246_p7), %s366_s6  ;;  %s1075_s10 = smul.u32 (!%p246_p7), 4294967295, %s2218_s20 }
  0x10   : > { %vm646_vm0 = vcmp.lt.s32.totalorder (!%p246_p7), %v645_v2, %v2306_v0  ;;  %s663_s9 = sadd.s32 (!%p246_p7), 1, %s662_s7  ;;  %s1350_s16 = smul.u32 (!%p246_p7), 4294967291, %s2218_s20 }
  0x11   : > { %v648_v3 = vsel (!%p246_p7), %vm646_vm0, 1, %v2228_v1  ;;  %v782_v4 = vstv (!%p246_p7), %s663_s9  ;;  %s1076_s15 = sadd.s32 (!%p246_p7), 4, %s1075_s10  ;;  %s1212_s25 = smul.u32 (!%p246_p7), 4294967293, %s2218_s20 }
  0x12   : > { %650 = vperm.xlu0 (!%p246_p7), %1978, %v648_v3   ;;  %vm783_vm1 = vcmp.lt.s32.totalorder (!%p246_p7), %v782_v4, %v2306_v0  ;;  %v1195_v8 = vstv (!%p246_p7), %s1076_s15  ;;  %s1351_s17 = sadd.s32 (!%p246_p7), 6, %s1350_s16  ;;  %s1882_s15 = smul.u32 (!%p246_p7), 56, %s2218_s20 }
  0x13   : > { %s2313_s8 = scalar_select %p291_p8, %s2218_s20, 1  ;;  %v786_v6 = vsel %vm783_vm1, 1, %v2228_v1  ;;  %vm1196_vm2 = vcmp.lt.s32.totalorder %v1195_v8, %v2306_v0  ;;  %v1470_v13 = vstv %s1351_s17 }
  0x14   : > { %v1198_v15 = vsel %vm1196_vm2, 1, %v2228_v1  ;;  %vm1471_vm3 = vcmp.lt.s32.totalorder %v1470_v13, %v2306_v0  ;;  %s1888_s7 = smul.u32 40, %s2218_s20 }
  0x15   : > { %s1936_s11 = sshll.u32 %s2313_s8, 8  ;;  %v1474_v20 = vsel %vm1471_vm3, 1, %v2228_v1  ;;  %s1845_s23 = sshll.u32 %s2313_s8, 3 }
  0x16   : > { %s2324_s14 = scalar_lea.vmem %s2949_s2, %s1936_s11  ;;  %788 = vperm.xlu0 %1978, %v786_v6   ;;  %s309_s29 = scalar_lea.vmem %s2950_s3, %s1845_s23 }
  0x17   : > { %v2328_v5 = vld [vmem:[%s2324_s14 + $0x4] ss:$16 sps:$4 sm:$0xff]   ;;  %v2332_v7 = vld [vmem:[%s2324_s14] ss:$16 sps:$4 sm:$0xff]   ;;  %v2349_v12 = vld [vmem:[%s2324_s14 + $0xc] ss:$16 sps:$4 sm:$0xff]   ;;  %s313_s12 = scalar_lea.vmem %s2951_s4, %s1845_s23 }
  0x18   : > { %535 = vmatprep.subr.bf16.mxu0 %v2328_v5  ;;  %v2337_v9 = vld [vmem:[%s2324_s14 + $0x24] ss:$16 sps:$4 sm:$0xff]   ;;  %v2341_v10 = vld [vmem:[%s2324_s14 + $0x20] ss:$16 sps:$4 sm:$0xff]   ;;  %v2352_v14 = vld [vmem:[%s2324_s14 + $0x8] ss:$16 sps:$4 sm:$0xff]   ;;  %576 = vmatprep.subr.bf16.mxu1 %v2349_v12 }
  0x19   : > { %536 = vmatpush1.bf16.msra.mxu0 %v2332_v7  ;;  %v2346_v11 = vld [vmem:[%s2324_s14 + $0x44] ss:$16 sps:$4 sm:$0xff]   ;;  %v2357_v16 = vld [vmem:[%s2324_s14 + $0x40] ss:$16 sps:$4 sm:$0xff]   ;;  %577 = vmatpush1.bf16.msra.mxu1 %v2352_v14  ;;  %v2367_v18 = vld [vmem:[%s2324_s14 + $0x2c] ss:$16 sps:$4 sm:$0xff]  }
  0x1a   : > { %537 = vmatprep.subr.bf16.mxu0 %v2337_v9  ;;  %v2363_v17 = vld [vmem:[%s2324_s14 + $0x64] ss:$16 sps:$4 sm:$0xff]   ;;  %v2370_v19 = vld [vmem:[%s2324_s14 + $0x28] ss:$16 sps:$4 sm:$0xff]   ;;  %1200 = vperm.xlu0 %1978, %v1198_v15   ;;  %v2376_v21 = vld [vmem:[%s2324_s14 + $0x60] ss:$16 sps:$4 sm:$0xff]  }
  0x1b   : > { %578 = vmatprep.subr.bf16.mxu1 %v2367_v18  ;;  %v2379_v22 = vld [vmem:[%s2324_s14 + $0x84] ss:$16 sps:$4 sm:$0xff]   ;;  %v2382_v23 = vld [vmem:[%s2324_s14 + $0x4c] ss:$16 sps:$4 sm:$0xff]   ;;  %v2387_v24 = vld [vmem:[%s2324_s14 + $0x48] ss:$16 sps:$4 sm:$0xff]  }
  0x1c   : > { %v2391_v25 = vld [vmem:[%s2324_s14 + $0x6c] ss:$16 sps:$4 sm:$0xff]   ;;  %v2395_v26 = vld [vmem:[%s2324_s14 + $0x80] ss:$16 sps:$4 sm:$0xff]   ;;  %v2399_v27 = vld [vmem:[%s2324_s14 + $0xa4] ss:$16 sps:$4 sm:$0xff]  }
  0x1d   : > { %538 = vmatpush1.bf16.msra.mxu0 %v2341_v10  ;;  %579 = vmatpush1.bf16.msra.mxu1 %v2370_v19  ;;  %v2403_v28 = vld [vmem:[%s2324_s14 + $0x68] ss:$16 sps:$4 sm:$0xff]   ;;  %v2407_v29 = vld [vmem:[%s2324_s14 + $0x8c] ss:$16 sps:$4 sm:$0xff]   ;;  %v2410_v30 = vld [vmem:[%s2324_s14 + $0xa0] ss:$16 sps:$4 sm:$0xff]  }
  0x1e   : > { %539 = vmatprep.subr.bf16.mxu0 %v2346_v11  ;;  %580 = vmatprep.subr.bf16.mxu1 %v2382_v23  ;;  %v2414_v31 = vld [vmem:[%s2324_s14 + $0xc4] ss:$16 sps:$4 sm:$0xff]   ;;  %v2419_v32 = vld [vmem:[%s2324_s14 + $0x88] ss:$16 sps:$4 sm:$0xff]   ;;  %v2424_v33 = vld [vmem:[%s2324_s14 + $0xac] ss:$16 sps:$4 sm:$0xff]  }
  0x1f   : > { %1476 = vperm.xlu0 %1978, %v1474_v20   ;;  %v2428_v34 = vld [vmem:[%s2324_s14 + $0xc0] ss:$16 sps:$4 sm:$0xff]   ;;  %v2432_v35 = vld [vmem:[%s2324_s14 + $0xe4] ss:$16 sps:$4 sm:$0xff]   ;;  %v2441_v36 = vld [vmem:[%s2324_s14 + $0xa8] ss:$16 sps:$4 sm:$0xff]  }
  0x20   : > { %v2445_v37 = vld [vmem:[%s2324_s14 + $0xcc] ss:$16 sps:$4 sm:$0xff]   ;;  %v2449_v38 = vld [vmem:[%s2324_s14 + $0xe0] ss:$16 sps:$4 sm:$0xff]   ;;  %v2456_v40 = vld [vmem:[%s2324_s14 + $0xc8] ss:$16 sps:$4 sm:$0xff]  }
  0x21   : > { %540 = vmatpush1.bf16.msra.mxu0 %v2357_v16  ;;  %581 = vmatpush1.bf16.msra.mxu1 %v2387_v24  ;;  %v2451_v39 = vld [vmem:[%s309_s29] sm:$0xff]  ;;  %v2460_v41 = vld [vmem:[%s2324_s14 + $0xec] ss:$16 sps:$4 sm:$0xff]   ;;  %v2467_v43 = vld [vmem:[%s2324_s14 + $0xe8] ss:$16 sps:$4 sm:$0xff]   ;;  %s1935_s30 = sshll.u32 %s2313_s8, 7 }
  0x22   : > { %541 = vmatprep.subr.bf16.mxu0 %v2363_v17  ;;  %582 = vmatprep.subr.bf16.mxu1 %v2391_v25  ;;  %v374_v42 = vpack.c.bf16 %v2451_v39, %v2451_v39  ;;  %s2511_s9 = scalar_lea.vmem %s2948_s1, %s1935_s30  ;;  %v326_v20 = vld [vmem:[%s313_s12] sm:$0xff]  ;;  %s287_s8 = sand.u32 1, %s2210_s18  }
  0x23   : > { %v368_v44 = vld [vmem:[%s2511_s9] sm:$0xff]  ;;  %v369_v48 = vld [vmem:[%s2511_s9 + $0x8] sm:$0xff]  ;;  %s1840_s13 = sshll.u32 %s287_s8, 6  ;;  %s800_s18 = smul.u32 3, %s2218_s20 }
  0x24   : > { %v370_v45 = vunpack.c.l.bf16 %v368_v44  ;;  %v371_v46 = vunpack.c.h.bf16 %v368_v44  ;;  %v373_v55 = vunpack.c.h.bf16 %v369_v48  ;;  %v372_v61 = vunpack.c.l.bf16 %v369_v48  ;;  %s2524_s16 = scalar_lea.vmem [#allocation4], %s1840_s13  ;;  %s939_s23 = sadd.s32 3, %s2218_s20 }
  0x25   : > { %542 = vmatpush1.bf16.msra.mxu0 %v2376_v21  ;;  %583 = vmatpush1.bf16.msra.mxu1 %v2403_v28  ;;  %s655_s17 = scalar_lea.vmem %s2524_s16, %s1882_s15 [#allocation4]  ;;  %s801_s27 = sadd.s32 2, %s800_s18 }
  0x26   : > { %543 = vmatprep.subr.bf16.mxu0 %v2379_v22  ;;  %584 = vmatprep.subr.bf16.mxu1 %v2407_v29  ;;  %s1488_s29 = smul.u32 4294967289, %s2218_s20  ;;  %s1213_s30 = sadd.s32 5, %s1212_s25 }
  0x27   : > { %s1752_s10 = scalar_lea.vmem %s2524_s16, %s1888_s7 [#allocation4]  ;;  %s1895_s11 = smul.u32 24, %s2218_s20 }
  0x28   : > { %s1489_s6 = sadd.s32 7, %s1488_s29  ;;  %s1902_s8 = sshll.u32 %s2218_s20, 3 }
  0x29   : > { %544 = vmatpush1.bf16.msra.mxu0 %v2395_v26  ;;  %585 = vmatpush1.bf16.msra.mxu1 %v2419_v32  ;;  %s1756_s12 = scalar_lea.vmem %s2524_s16, %s1895_s11 [#allocation4]  ;;  %s1759_s13 = scalar_lea.vmem %s2524_s16, %s1902_s8 [#allocation4] }
  0x2a   : > { %545 = vmatprep.subr.bf16.mxu0 %v2399_v27  ;;  %586 = vmatprep.subr.bf16.mxu1 %v2424_v33  ;;  %s1197_s15 = ssub.s32 4, %s2218_s20  ;;  %s1922_s25 = smul.u32 4294967256, %s2218_s20 }
  0x2b   : > { %s1640_s7 = scalar_lea.vmem (%p2291_p3), %s2952_s5, %s1902_s8 }
  0x2d   : > { %546 = vmatpush1.bf16.msra.mxu0 %v2410_v30  ;;  %587 = vmatpush1.bf16.msra.mxu1 %v2441_v36 }
  0x2e   : > { %547 = vmatprep.subr.bf16.mxu0 %v2414_v31  ;;  %588 = vmatprep.subr.bf16.mxu1 %v2445_v37 }
  0x31   : > { %548 = vmatpush1.bf16.msra.mxu0 %v2428_v34  ;;  %589 = vmatpush1.bf16.msra.mxu1 %v2456_v40 }
  0x32   : > { %549 = vmatprep.subr.bf16.mxu0 %v2432_v35  ;;  %590 = vmatprep.subr.bf16.mxu1 %v2460_v41 }
  0x35   : > { %550 = vmatpush1.bf16.msra.mxu0 %v2449_v38  ;;  %591 = vmatpush1.bf16.msra.mxu1 %v2467_v43 }
  0x36   : > { %672 = vmatprep.subr.bf16.mxu0 %v2328_v5  ;;  %713 = vmatprep.subr.bf16.mxu1 %v2349_v12 }
  0x38   : > { %568 = vmatmul.mubr.bf16.vlgmr.msra.gmra.mrb[0].mxu0 %v374_v42  ;;  %609 = vmatmul.mubr.bf16.vlgmr.msra.gmra.mrb[0].mxu1 %v374_v42 }
  0x39   : > { %673 = vmatpush1.bf16.msra.mxu0 %v2332_v7  ;;  %704 = vmatprep.mubr.bf16.mxu0 %v2228_v1 }
  0x3a   : > { %674 = vmatprep.subr.bf16.mxu0 %v2337_v9  ;;  %714 = vmatpush1.bf16.msra.mxu1 %v2352_v14 }
  0x3b   : > { %715 = vmatprep.subr.bf16.mxu1 %v2367_v18  ;;  %745 = vmatprep.mubr.bf16.mxu1 %v2228_v1 }
  0x3d   : > { %675 = vmatpush1.bf16.msra.mxu0 %v2341_v10 }
  0x3e   : > { %676 = vmatprep.subr.bf16.mxu0 %v2346_v11  ;;  %716 = vmatpush1.bf16.msra.mxu1 %v2370_v19 }
  0x3f   : > { %717 = vmatprep.subr.bf16.mxu1 %v2382_v23 }
  0x41   : > { %677 = vmatpush1.bf16.msra.mxu0 %v2357_v16 }
  0x42   : > { %678 = vmatprep.subr.bf16.mxu0 %v2363_v17  ;;  %718 = vmatpush1.bf16.msra.mxu1 %v2387_v24 }
  0x43   : > { %719 = vmatprep.subr.bf16.mxu1 %v2391_v25 }
  0x45   : > { %679 = vmatpush1.bf16.msra.mxu0 %v2376_v21 }
  0x46   : > { %680 = vmatprep.subr.bf16.mxu0 %v2379_v22  ;;  %720 = vmatpush1.bf16.msra.mxu1 %v2403_v28 }
  0x47   : > { %721 = vmatprep.subr.bf16.mxu1 %v2407_v29 }
  0x49   : > { %681 = vmatpush1.bf16.msra.mxu0 %v2395_v26 }
  0x4a   : > { %682 = vmatprep.subr.bf16.mxu0 %v2399_v27  ;;  %722 = vmatpush1.bf16.msra.mxu1 %v2419_v32 }
  0x4b   : > { %723 = vmatprep.subr.bf16.mxu1 %v2424_v33 }
  0x4d   : > { %683 = vmatpush1.bf16.msra.mxu0 %v2410_v30 }
  0x4e   : > { %684 = vmatprep.subr.bf16.mxu0 %v2414_v31  ;;  %724 = vmatpush1.bf16.msra.mxu1 %v2441_v36 }
  0x4f   : > { %725 = vmatprep.subr.bf16.mxu1 %v2445_v37 }
  0x51   : > { %685 = vmatpush1.bf16.msra.mxu0 %v2428_v34 }
  0x52   : > { %686 = vmatprep.subr.bf16.mxu0 %v2432_v35  ;;  %726 = vmatpush1.bf16.msra.mxu1 %v2456_v40 }
  0x53   : > { %727 = vmatprep.subr.bf16.mxu1 %v2460_v41 }
  0x55   : > { %687 = vmatpush1.bf16.msra.mxu0 %v2449_v38 }
  0x56   : > { %810 = vmatprep.subr.bf16.mxu0 %v2328_v5  ;;  %728 = vmatpush1.bf16.msra.mxu1 %v2467_v43 }
  0x57   : > { %851 = vmatprep.subr.bf16.mxu1 %v2349_v12 }
 0x10b   : > { %v569_v47 = vpop.f32.mrb[0].mxu0  ;;  %v610_v57 = vpop.f32.mrb[0].mxu1 }
 0x10c   : > { %v617_v49 = vadd.f32 %v569_v47, %v370_v45  ;;  %v571_v50 = vpop.f32.mrb[1].mxu0  ;;  %v612_v58 = vpop.f32.mrb[1].mxu1  ;;  %v619_v2 = vadd.f32 %v610_v57, %v372_v61  ;;  %v920_v57 = vstv %s801_s27  ;;  %v1608_v61 = vstv %s1489_s6  ;;  %s1769_s27 = scalar_lea.vmem %s2524_s16, %s1922_s25 [#allocation4] }
 0x10d   : > { %v618_v51 = vadd.f32 %v571_v50, %v371_v46  ;;  %v573_v52 = vpop.f32.mrb[2].mxu0  ;;  %v620_v59 = vadd.f32 %v612_v58, %v373_v55  ;;  %v614_v60 = vpop.f32.mrb[2].mxu1  ;;  %vm921_vm5 = vcmp.lt.s32.totalorder %v920_v57, %v2306_v0  ;;  %vm1609_vm8 = vcmp.lt.s32.totalorder %v1608_v61, %v2306_v0 }
 0x10e   : > { %v1879_v53 = vmul.f32 -1.442695, %v617_v49  ;;  %v574_v54 = vpop.f32.mrb[3].mxu0  ;;  %v615_v62 = vpop.f32.mrb[3].mxu1  ;;  %v924_v58 = vsel %vm921_vm5, 1, %v2228_v1 }
 0x10f   : > { %v1880_v56 = vmul.f32 -1.442695, %v618_v51  ;;  %v1881_v63 = vmul.f32 -1.442695, %v620_v59  ;;  %v651_v45 = vpop.permute.xlu0 %650  ;;  %v1332_v59 = vstv %s1213_s30  ;;  %926 = vperm.xlu1 %1979, %v924_v58  }
 0x110   : > { %2028 = vpow2.f32 %v1879_v53  ;;  %vm652_vm4 = vcmp.eq.s32.totalorder %v651_v45, 1  ;;  %vm1333_vm7 = vcmp.lt.s32.totalorder %v1332_v59, %v2306_v0 }
 0x111   : > { %2030 = vpow2.f32 %v1880_v56  ;;  %v1336_v62 = vsel %vm1333_vm7, 1, %v2228_v1 }
 0x112   : > { %2032 = vpow2.f32 %v1881_v63  ;;  %v1612_v63 = vsel %vm1609_vm8, 1, %v2228_v1 }
 0x113   : > { %2034 = vtanh.f32 %v619_v2  ;;  %v1883_v2 = vld [vmem:[%s2511_s9 + $0x10] sm:$0xff] }
 0x11a   : > { %v2029_v3 = vpop.eup %2028 }
 0x11b   : > { %v2031_v4 = vpop.eup %2030  ;;  %v624_v6 = vadd.f32 1.0, %v2029_v3  ;;  %v667_v3 = vunpack.c.l.bf16 %v1883_v2 }
 0x11c   : > { %v630_v8 = vadd.f32 1.0, %v2031_v4  ;;  %v2033_v13 = vpop.eup %2032  ;;  %v668_v4 = vunpack.c.h.bf16 %v1883_v2 }
 0x11d   : > { %2036 = vrcp.f32 %v624_v6  ;;  %v2035_v15 = vpop.eup %2034  ;;  %v637_v44 = vadd.f32 1.0, %v2033_v13 }
 0x11e   : > { %2038 = vrcp.f32 %v630_v8 }
 0x11f   : > { %2040 = vrcp.f32 %v637_v44 }
 0x127   : > { %v2037_v42 = vpop.eup %2036 }
 0x128   : > { %v2039_v46 = vpop.eup %2038  ;;  %v641_v47 = vmul.f32 %v2037_v42, %v2035_v15  ;;  %v1884_v15 = vld [vmem:[%s2511_s9 + $0x18] sm:$0xff] }
 0x129   : > { %v640_v48 = vmul.f32 %v2039_v46, %v326_v20  ;;  %v2041_v51 = vpop.eup %2040 }
 0x12b   : > { %v642_v49 = vadd.f32 %v641_v47, %v640_v48 }
 0x12d   : > { %2042 = vtanh.f32 %v642_v49  ;;  %v2520_v50 = vsel %vm652_vm4, %v642_v49, %v326_v20 }
 0x137   : > { %v2043_v52 = vpop.eup %2042 }
 0x138   : > { %v644_v53 = vmul.f32 %v2043_v52, %v2041_v51  ;;  %v670_v51 = vunpack.c.h.bf16 %v1884_v15 }
 0x13a   : > { %v653_v54 = vsel %vm652_vm4, %v644_v53, 0.0  ;;  %v2528_v55 = vsel %vm652_vm4, %v644_v53, %v2451_v39  ;;  %v1058_v39 = vstv %s939_s23  ;;  %v669_v53 = vunpack.c.l.bf16 %v1884_v15 }
 0x13b   : > { %656 = vst [vmem:[%s655_s17] sm:$0xff] %v653_v54  ;;  %v671_v56 = vpack.c.bf16 %v2528_v55, %v2528_v55  ;;  %vm1059_vm6 = vcmp.lt.s32.totalorder %v1058_v39, %v2306_v0  ;;  %s1909_s17 = sshll.u32 %s1197_s15, 3 }
 0x13c   : > { %v1061_v60 = vsel %vm1059_vm6, 1, %v2228_v1  ;;  %s1205_s18 = scalar_lea.vmem %s2524_s16, %s1909_s17 [#allocation4] }
 0x13d   : > { %705 = vmatmul.mubr.bf16.vlgmr.msra.gmra.mrb[4].mxu0 %v671_v56  ;;  %746 = vmatmul.mubr.bf16.vlgmr.msra.gmra.mrb[4].mxu1 %v671_v56 }
 0x13e   : > { %811 = vmatpush1.bf16.msra.mxu0 %v2332_v7  ;;  %852 = vmatpush1.bf16.msra.mxu1 %v2352_v14 }
 0x13f   : > { %812 = vmatprep.subr.bf16.mxu0 %v2337_v9  ;;  %853 = vmatprep.subr.bf16.mxu1 %v2367_v18 }
 0x140   : > { %842 = vmatprep.mubr.bf16.mxu0 %v2228_v1  ;;  %883 = vmatprep.mubr.bf16.mxu1 %v2228_v1 }
 0x141   : > { %1063 = vperm.xlu1 %1979, %v1061_v60  }
 0x142   : > { %813 = vmatpush1.bf16.msra.mxu0 %v2341_v10  ;;  %854 = vmatpush1.bf16.msra.mxu1 %v2370_v19 }
 0x143   : > { %814 = vmatprep.subr.bf16.mxu0 %v2346_v11  ;;  %855 = vmatprep.subr.bf16.mxu1 %v2382_v23 }
 0x145   : > { %1338 = vperm.xlu1 %1979, %v1336_v62  }
 0x146   : > { %815 = vmatpush1.bf16.msra.mxu0 %v2357_v16  ;;  %856 = vmatpush1.bf16.msra.mxu1 %v2387_v24 }
 0x147   : > { %816 = vmatprep.subr.bf16.mxu0 %v2363_v17  ;;  %857 = vmatprep.subr.bf16.mxu1 %v2391_v25 }
 0x149   : > { %1614 = vperm.xlu1 %1979, %v1612_v63  }
 0x14a   : > { %817 = vmatpush1.bf16.msra.mxu0 %v2376_v21  ;;  %858 = vmatpush1.bf16.msra.mxu1 %v2403_v28 }
 0x14b   : > { %818 = vmatprep.subr.bf16.mxu0 %v2379_v22  ;;  %859 = vmatprep.subr.bf16.mxu1 %v2407_v29 }
 0x14e   : > { %819 = vmatpush1.bf16.msra.mxu0 %v2395_v26  ;;  %860 = vmatpush1.bf16.msra.mxu1 %v2419_v32 }
 0x14f   : > { %820 = vmatprep.subr.bf16.mxu0 %v2399_v27  ;;  %861 = vmatprep.subr.bf16.mxu1 %v2424_v33 }
 0x152   : > { %821 = vmatpush1.bf16.msra.mxu0 %v2410_v30  ;;  %862 = vmatpush1.bf16.msra.mxu1 %v2441_v36 }
 0x153   : > { %822 = vmatprep.subr.bf16.mxu0 %v2414_v31  ;;  %863 = vmatprep.subr.bf16.mxu1 %v2445_v37 }
 0x156   : > { %823 = vmatpush1.bf16.msra.mxu0 %v2428_v34  ;;  %864 = vmatpush1.bf16.msra.mxu1 %v2456_v40 }
 0x157   : > { %824 = vmatprep.subr.bf16.mxu0 %v2432_v35  ;;  %865 = vmatprep.subr.bf16.mxu1 %v2460_v41 }
 0x15a   : > { %825 = vmatpush1.bf16.msra.mxu0 %v2449_v38  ;;  %866 = vmatpush1.bf16.msra.mxu1 %v2467_v43 }
 0x15b   : > { %948 = vmatprep.subr.bf16.mxu0 %v2328_v5  ;;  %989 = vmatprep.subr.bf16.mxu1 %v2349_v12 }
 0x210   : > { %v706_v6 = vpop.f32.mrb[4].mxu0  ;;  %v747_v8 = vpop.f32.mrb[4].mxu1 }
 0x211   : > { %v754_v13 = vadd.f32 %v706_v6, %v667_v3  ;;  %v708_v20 = vpop.f32.mrb[5].mxu0  ;;  %v749_v42 = vpop.f32.mrb[5].mxu1  ;;  %v756_v56 = vadd.f32 %v747_v8, %v669_v53 }
 0x212   : > { %v755_v44 = vadd.f32 %v708_v20, %v668_v4  ;;  %v710_v45 = vpop.f32.mrb[6].mxu0  ;;  %v751_v46 = vpop.f32.mrb[6].mxu1  ;;  %v757_v52 = vadd.f32 %v749_v42, %v670_v51  ;;  %v1891_v51 = vld [vmem:[%s2511_s9 + $0x28] sm:$0xff] }
 0x213   : > { %v1885_v47 = vmul.f32 -1.442695, %v754_v13  ;;  %v711_v48 = vpop.f32.mrb[7].mxu0  ;;  %v752_v49 = vpop.f32.mrb[7].mxu1 }
 0x214   : > { %v1886_v0 = vmul.f32 -1.442695, %v755_v44  ;;  %v1887_v54 = vmul.f32 -1.442695, %v757_v52  ;;  %v789_v6 = vpop.permute.xlu0 %788 }
 0x215   : > { %2044 = vpow2.f32 %v1885_v47  ;;  %vm790_vm9 = vcmp.eq.s32.totalorder %v789_v6, 1 }
 0x216   : > { %2046 = vpow2.f32 %v1886_v0 }
 0x217   : > { %2048 = vpow2.f32 %v1887_v54 }
 0x218   : > { %2050 = vtanh.f32 %v756_v56 }
 0x21f   : > { %v2045_v39 = vpop.eup %2044 }
 0x220   : > { %v2047_v57 = vpop.eup %2046  ;;  %v761_v58 = vadd.f32 1.0, %v2045_v39 }
 0x221   : > { %v767_v59 = vadd.f32 1.0, %v2047_v57  ;;  %v2049_v60 = vpop.eup %2048 }
 0x222   : > { %2052 = vrcp.f32 %v761_v58  ;;  %v2051_v61 = vpop.eup %2050  ;;  %v774_v3 = vadd.f32 1.0, %v2049_v60 }
 0x223   : > { %2054 = vrcp.f32 %v767_v59 }
 0x224   : > { %2056 = vrcp.f32 %v774_v3 }
 0x22c   : > { %v2053_v62 = vpop.eup %2052 }
 0x22d   : > { %v2055_v63 = vpop.eup %2054  ;;  %v778_v2 = vmul.f32 %v2053_v62, %v2051_v61  ;;  %v808_v61 = vunpack.c.h.bf16 %v1891_v51 }
 0x22e   : > { %v777_v4 = vmul.f32 %v2055_v63, %v2520_v50  ;;  %v2057_v15 = vpop.eup %2056  ;;  %v807_v63 = vunpack.c.l.bf16 %v1891_v51 }
 0x230   : > { %v779_v8 = vadd.f32 %v778_v2, %v777_v4 }
 0x232   : > { %2058 = vtanh.f32 %v779_v8  ;;  %v2582_v13 = vsel %vm790_vm9, %v779_v8, %v2520_v50  ;;  %v1890_v50 = vld [vmem:[%s2511_s9 + $0x20] sm:$0xff] }
 0x233   : > { %v806_v47 = vunpack.c.h.bf16 %v1890_v50 }
 0x23c   : > { %v2059_v20 = vpop.eup %2058 }
 0x23d   : > { %v781_v42 = vmul.f32 %v2059_v20, %v2057_v15 }
 0x23f   : > { %v791_v44 = vsel %vm790_vm9, %v781_v42, 0.0  ;;  %v2587_v45 = vsel %vm790_vm9, %v781_v42, %v2528_v55  ;;  %v805_v55 = vunpack.c.l.bf16 %v1890_v50 }
 0x240   : > { %v809_v46 = vpack.c.bf16 %v2587_v45, %v2587_v45  ;;  %1889 = vst [vmem:[%s1752_s10 + $0x8] sm:$0xff] %v791_v44 }
 0x242   : > { %843 = vmatmul.mubr.bf16.vlgmr.msra.gmra.mrb[8].mxu0 %v809_v46  ;;  %884 = vmatmul.mubr.bf16.vlgmr.msra.gmra.mrb[8].mxu1 %v809_v46  ;;  %v927_v46 = vpop.permute.xlu1 %926 }
 0x243   : > { %949 = vmatpush1.bf16.msra.mxu0 %v2332_v7  ;;  %990 = vmatpush1.bf16.msra.mxu1 %v2352_v14  ;;  %vm928_vm10 = vcmp.eq.s32.totalorder %v927_v46, 1 }
 0x244   : > { %950 = vmatprep.subr.bf16.mxu0 %v2337_v9  ;;  %991 = vmatprep.subr.bf16.mxu1 %v2367_v18 }
 0x245   : > { %980 = vmatprep.mubr.bf16.mxu0 %v2228_v1  ;;  %1021 = vmatprep.mubr.bf16.mxu1 %v2228_v1 }
 0x247   : > { %951 = vmatpush1.bf16.msra.mxu0 %v2341_v10  ;;  %992 = vmatpush1.bf16.msra.mxu1 %v2370_v19 }
 0x248   : > { %952 = vmatprep.subr.bf16.mxu0 %v2346_v11  ;;  %993 = vmatprep.subr.bf16.mxu1 %v2382_v23 }
 0x24b   : > { %953 = vmatpush1.bf16.msra.mxu0 %v2357_v16  ;;  %994 = vmatpush1.bf16.msra.mxu1 %v2387_v24 }
 0x24c   : > { %954 = vmatprep.subr.bf16.mxu0 %v2363_v17  ;;  %995 = vmatprep.subr.bf16.mxu1 %v2391_v25 }
 0x24f   : > { %955 = vmatpush1.bf16.msra.mxu0 %v2376_v21  ;;  %996 = vmatpush1.bf16.msra.mxu1 %v2403_v28 }
 0x250   : > { %956 = vmatprep.subr.bf16.mxu0 %v2379_v22  ;;  %997 = vmatprep.subr.bf16.mxu1 %v2407_v29 }
 0x253   : > { %957 = vmatpush1.bf16.msra.mxu0 %v2395_v26  ;;  %998 = vmatpush1.bf16.msra.mxu1 %v2419_v32 }
 0x254   : > { %958 = vmatprep.subr.bf16.mxu0 %v2399_v27  ;;  %999 = vmatprep.subr.bf16.mxu1 %v2424_v33 }
 0x257   : > { %959 = vmatpush1.bf16.msra.mxu0 %v2410_v30  ;;  %1000 = vmatpush1.bf16.msra.mxu1 %v2441_v36 }
 0x258   : > { %960 = vmatprep.subr.bf16.mxu0 %v2414_v31  ;;  %1001 = vmatprep.subr.bf16.mxu1 %v2445_v37 }
 0x25b   : > { %961 = vmatpush1.bf16.msra.mxu0 %v2428_v34  ;;  %1002 = vmatpush1.bf16.msra.mxu1 %v2456_v40 }
 0x25c   : > { %962 = vmatprep.subr.bf16.mxu0 %v2432_v35  ;;  %1003 = vmatprep.subr.bf16.mxu1 %v2460_v41 }
 0x25f   : > { %963 = vmatpush1.bf16.msra.mxu0 %v2449_v38  ;;  %1004 = vmatpush1.bf16.msra.mxu1 %v2467_v43 }
 0x260   : > { %1085 = vmatprep.subr.bf16.mxu0 %v2328_v5  ;;  %1126 = vmatprep.subr.bf16.mxu1 %v2349_v12 }
 0x315   : > { %v844_v48 = vpop.f32.mrb[8].mxu0  ;;  %v885_v49 = vpop.f32.mrb[8].mxu1 }
 0x316   : > { %v892_v0 = vadd.f32 %v844_v48, %v805_v55  ;;  %v846_v52 = vpop.f32.mrb[9].mxu0  ;;  %v887_v53 = vpop.f32.mrb[9].mxu1  ;;  %v894_v3 = vadd.f32 %v885_v49, %v807_v63 }
 0x317   : > { %v893_v54 = vadd.f32 %v846_v52, %v806_v47  ;;  %v848_v56 = vpop.f32.mrb[10].mxu0  ;;  %v889_v39 = vpop.f32.mrb[10].mxu1  ;;  %v895_v62 = vadd.f32 %v887_v53, %v808_v61  ;;  %v1898_v61 = vld [vmem:[%s2511_s9 + $0x38] sm:$0xff] }
 0x318   : > { %v1892_v57 = vmul.f32 -1.442695, %v892_v0  ;;  %v849_v58 = vpop.f32.mrb[11].mxu0  ;;  %v890_v59 = vpop.f32.mrb[11].mxu1 }
 0x319   : > { %v1893_v60 = vmul.f32 -1.442695, %v893_v54  ;;  %v1894_v2 = vmul.f32 -1.442695, %v895_v62 }
 0x31a   : > { %2060 = vpow2.f32 %v1892_v57 }
 0x31b   : > { %2062 = vpow2.f32 %v1893_v60 }
 0x31c   : > { %2064 = vpow2.f32 %v1894_v2 }
 0x31d   : > { %2066 = vtanh.f32 %v894_v3 }
 0x324   : > { %v2061_v4 = vpop.eup %2060 }
 0x325   : > { %v2063_v6 = vpop.eup %2062  ;;  %v899_v8 = vadd.f32 1.0, %v2061_v4 }
 0x326   : > { %v905_v15 = vadd.f32 1.0, %v2063_v6  ;;  %v2065_v20 = vpop.eup %2064 }
 0x327   : > { %2068 = vrcp.f32 %v899_v8  ;;  %v2067_v42 = vpop.eup %2066  ;;  %v912_v55 = vadd.f32 1.0, %v2065_v20 }
 0x328   : > { %2070 = vrcp.f32 %v905_v15 }
 0x329   : > { %2072 = vrcp.f32 %v912_v55 }
 0x331   : > { %v2069_v44 = vpop.eup %2068 }
 0x332   : > { %v2071_v50 = vpop.eup %2070  ;;  %v916_v47 = vmul.f32 %v2069_v44, %v2067_v42  ;;  %v946_v42 = vunpack.c.h.bf16 %v1898_v61  ;;  %v945_v44 = vunpack.c.l.bf16 %v1898_v61 }
 0x333   : > { %v915_v48 = vmul.f32 %v2071_v50, %v2582_v13  ;;  %v2073_v51 = vpop.eup %2072 }
 0x335   : > { %v917_v49 = vadd.f32 %v916_v47, %v915_v48 }
 0x337   : > { %2074 = vtanh.f32 %v917_v49  ;;  %v2629_v0 = vsel %vm928_vm10, %v917_v49, %v2582_v13  ;;  %v1897_v13 = vld [vmem:[%s2511_s9 + $0x30] sm:$0xff] }
 0x338   : > { %v944_v57 = vunpack.c.h.bf16 %v1897_v13 }
 0x341   : > { %v2075_v52 = vpop.eup %2074 }
 0x342   : > { %v919_v53 = vmul.f32 %v2075_v52, %v2073_v51 }
 0x344   : > { %v929_v54 = vsel %vm928_vm10, %v919_v53, 0.0  ;;  %v2634_v56 = vsel %vm928_vm10, %v919_v53, %v2587_v45  ;;  %v943_v45 = vunpack.c.l.bf16 %v1897_v13 }
 0x345   : > { %1896 = vst [vmem:[%s1756_s12 + $0x10] sm:$0xff] %v929_v54  ;;  %v947_v39 = vpack.c.bf16 %v2634_v56, %v2634_v56 }
 0x347   : > { %981 = vmatmul.mubr.bf16.vlgmr.msra.gmra.mrb[12].mxu0 %v947_v39  ;;  %1022 = vmatmul.mubr.bf16.vlgmr.msra.gmra.mrb[12].mxu1 %v947_v39 }
 0x348   : > { %1086 = vmatpush1.bf16.msra.mxu0 %v2332_v7  ;;  %1127 = vmatpush1.bf16.msra.mxu1 %v2352_v14 }
 0x349   : > { %1087 = vmatprep.subr.bf16.mxu0 %v2337_v9  ;;  %1128 = vmatprep.subr.bf16.mxu1 %v2367_v18 }
 0x34a   : > { %1117 = vmatprep.mubr.bf16.mxu0 %v2228_v1  ;;  %1158 = vmatprep.mubr.bf16.mxu1 %v2228_v1 }
 0x34c   : > { %1088 = vmatpush1.bf16.msra.mxu0 %v2341_v10  ;;  %1129 = vmatpush1.bf16.msra.mxu1 %v2370_v19 }
 0x34d   : > { %1089 = vmatprep.subr.bf16.mxu0 %v2346_v11  ;;  %1130 = vmatprep.subr.bf16.mxu1 %v2382_v23 }
 0x350   : > { %1090 = vmatpush1.bf16.msra.mxu0 %v2357_v16  ;;  %1131 = vmatpush1.bf16.msra.mxu1 %v2387_v24 }
 0x351   : > { %1091 = vmatprep.subr.bf16.mxu0 %v2363_v17  ;;  %1132 = vmatprep.subr.bf16.mxu1 %v2391_v25 }
 0x354   : > { %1092 = vmatpush1.bf16.msra.mxu0 %v2376_v21  ;;  %1133 = vmatpush1.bf16.msra.mxu1 %v2403_v28 }
 0x355   : > { %1093 = vmatprep.subr.bf16.mxu0 %v2379_v22  ;;  %1134 = vmatprep.subr.bf16.mxu1 %v2407_v29 }
 0x358   : > { %1094 = vmatpush1.bf16.msra.mxu0 %v2395_v26  ;;  %1135 = vmatpush1.bf16.msra.mxu1 %v2419_v32 }
 0x359   : > { %1095 = vmatprep.subr.bf16.mxu0 %v2399_v27  ;;  %1136 = vmatprep.subr.bf16.mxu1 %v2424_v33 }
 0x35c   : > { %1096 = vmatpush1.bf16.msra.mxu0 %v2410_v30  ;;  %1137 = vmatpush1.bf16.msra.mxu1 %v2441_v36 }
 0x35d   : > { %1097 = vmatprep.subr.bf16.mxu0 %v2414_v31  ;;  %1138 = vmatprep.subr.bf16.mxu1 %v2445_v37 }
 0x360   : > { %1098 = vmatpush1.bf16.msra.mxu0 %v2428_v34  ;;  %1139 = vmatpush1.bf16.msra.mxu1 %v2456_v40 }
 0x361   : > { %1099 = vmatprep.subr.bf16.mxu0 %v2432_v35  ;;  %1140 = vmatprep.subr.bf16.mxu1 %v2460_v41 }
 0x364   : > { %1100 = vmatpush1.bf16.msra.mxu0 %v2449_v38  ;;  %1141 = vmatpush1.bf16.msra.mxu1 %v2467_v43 }
 0x365   : > { %1222 = vmatprep.subr.bf16.mxu0 %v2328_v5  ;;  %1263 = vmatprep.subr.bf16.mxu1 %v2349_v12 }
 0x41a   : > { %v982_v58 = vpop.f32.mrb[12].mxu0  ;;  %v1023_v59 = vpop.f32.mrb[12].mxu1 }
 0x41b   : > { %v1030_v60 = vadd.f32 %v982_v58, %v943_v45  ;;  %v984_v62 = vpop.f32.mrb[13].mxu0  ;;  %v1025_v63 = vpop.f32.mrb[13].mxu1  ;;  %v1032_v50 = vadd.f32 %v1023_v59, %v945_v44 }
 0x41c   : > { %v1031_v2 = vadd.f32 %v984_v62, %v944_v57  ;;  %v986_v3 = vpop.f32.mrb[14].mxu0  ;;  %v1027_v4 = vpop.f32.mrb[14].mxu1  ;;  %v1033_v5 = vadd.f32 %v1025_v63, %v946_v42 }
 0x41d   : > { %v1899_v6 = vmul.f32 -1.442695, %v1030_v60  ;;  %v987_v8 = vpop.f32.mrb[15].mxu0  ;;  %v1028_v15 = vpop.f32.mrb[15].mxu1 }
 0x41e   : > { %v1900_v20 = vmul.f32 -1.442695, %v1031_v2  ;;  %v1901_v46 = vmul.f32 -1.442695, %v1033_v5  ;;  %v1064_v57 = vpop.permute.xlu1 %1063  ;;  %v1201_v4 = vpop.permute.xlu0 %1200 }
 0x41f   : > { %2076 = vpow2.f32 %v1899_v6  ;;  %vm1065_vm11 = vcmp.eq.s32.totalorder %v1064_v57, 1  ;;  %vm1202_vm12 = vcmp.eq.s32.totalorder %v1201_v4, 1  ;;  %v2788_v57 = vld [vmem:[%s2324_s14 + $0x60] ss:$16 sps:$4 sm:$0xff]  }
 0x420   : > { %2078 = vpow2.f32 %v1900_v20 }
 0x421   : > { %2080 = vpow2.f32 %v1901_v46 }
 0x422   : > { %2082 = vtanh.f32 %v1032_v50  ;;  %v2738_v50 = vld [vmem:[%s2324_s14] ss:$16 sps:$4 sm:$0xff]  }
 0x429   : > { %v2077_v55 = vpop.eup %2076 }
 0x42a   : > { %v2079_v47 = vpop.eup %2078  ;;  %v1037_v48 = vadd.f32 1.0, %v2077_v55  ;;  %v2742_v55 = vld [vmem:[%s2324_s14 + $0x8] ss:$16 sps:$4 sm:$0xff]  }
 0x42b   : > { %v1043_v49 = vadd.f32 1.0, %v2079_v47  ;;  %v2081_v51 = vpop.eup %2080  ;;  %v2746_v47 = vld [vmem:[%s2324_s14 + $0x24] ss:$16 sps:$4 sm:$0xff]  }
 0x42c   : > { %2084 = vrcp.f32 %v1037_v48  ;;  %v2083_v52 = vpop.eup %2082  ;;  %v1050_v13 = vadd.f32 1.0, %v2081_v51  ;;  %v2750_v48 = vld [vmem:[%s2324_s14 + $0x2c] ss:$16 sps:$4 sm:$0xff]   ;;  %v2760_v51 = vld [vmem:[%s2324_s14 + $0x28] ss:$16 sps:$4 sm:$0xff]  }
 0x42d   : > { %2086 = vrcp.f32 %v1043_v49  ;;  %v2756_v49 = vld [vmem:[%s2324_s14 + $0x20] ss:$16 sps:$4 sm:$0xff]  }
 0x42e   : > { %2088 = vrcp.f32 %v1050_v13  ;;  %v2780_v13 = vld [vmem:[%s2324_s14 + $0x64] ss:$16 sps:$4 sm:$0xff]  }
 0x436   : > { %v2085_v53 = vpop.eup %2084 }
 0x437   : > { %v2087_v54 = vpop.eup %2086  ;;  %v1054_v39 = vmul.f32 %v2085_v53, %v2083_v52  ;;  %v2764_v52 = vld [vmem:[%s2324_s14 + $0x44] ss:$16 sps:$4 sm:$0xff]   ;;  %v2768_v53 = vld [vmem:[%s2324_s14 + $0x4c] ss:$16 sps:$4 sm:$0xff]  }
 0x438   : > { %v1053_v45 = vmul.f32 %v2087_v54, %v2629_v0  ;;  %v2089_v60 = vpop.eup %2088  ;;  %v2772_v54 = vld [vmem:[%s2324_s14 + $0x40] ss:$16 sps:$4 sm:$0xff]  }
 0x43a   : > { %v1055_v58 = vadd.f32 %v1054_v39, %v1053_v45  ;;  %v2776_v39 = vld [vmem:[%s2324_s14 + $0x48] ss:$16 sps:$4 sm:$0xff]   ;;  %v2784_v45 = vld [vmem:[%s2324_s14 + $0x6c] ss:$16 sps:$4 sm:$0xff]  }
 0x43c   : > { %2090 = vtanh.f32 %v1055_v58  ;;  %v2676_v59 = vsel %vm1065_vm11, %v1055_v58, %v2629_v0  ;;  %v2792_v58 = vld [vmem:[%s2324_s14 + $0x68] ss:$16 sps:$4 sm:$0xff]  }
 0x446   : > { %v2091_v61 = vpop.eup %2090 }
 0x447   : > { %v1057_v62 = vmul.f32 %v2091_v61, %v2089_v60  ;;  %v2800_v60 = vld [vmem:[%s2324_s14 + $0x8c] ss:$16 sps:$4 sm:$0xff]   ;;  %v2804_v61 = vld [vmem:[%s2324_s14 + $0x80] ss:$16 sps:$4 sm:$0xff]  }
 0x449   : > { %v1066_v63 = vsel %vm1065_vm11, %v1057_v62, 0.0  ;;  %v2683_v2 = vsel %vm1065_vm11, %v1057_v62, %v2634_v56  ;;  %v2808_v62 = vld [vmem:[%s2324_s14 + $0x88] ss:$16 sps:$4 sm:$0xff]  }
 0x44a   : > { %1903 = vst [vmem:[%s1759_s13 + $0x18] sm:$0xff] %v1066_v63  ;;  %v1084_v3 = vpack.c.bf16 %v2683_v2, %v2683_v2  ;;  %v2812_v63 = vld [vmem:[%s2324_s14 + $0xa4] ss:$16 sps:$4 sm:$0xff]  }
 0x44c   : > { %1118 = vmatmul.mubr.bf16.vlgmr.msra.gmra.mrb[16].mxu0 %v1084_v3  ;;  %1159 = vmatmul.mubr.bf16.vlgmr.msra.gmra.mrb[16].mxu1 %v1084_v3  ;;  %v2820_v3 = vld [vmem:[%s2324_s14 + $0xa0] ss:$16 sps:$4 sm:$0xff]  }
 0x44d   : > { %1223 = vmatpush1.bf16.msra.mxu0 %v2332_v7  ;;  %1264 = vmatpush1.bf16.msra.mxu1 %v2352_v14  ;;  %v2720_v7 = vld [vmem:[%s2324_s14 + $0x4] ss:$16 sps:$4 sm:$0xff]  }
 0x44e   : > { %1224 = vmatprep.subr.bf16.mxu0 %v2337_v9  ;;  %1265 = vmatprep.subr.bf16.mxu1 %v2367_v18  ;;  %v1904_v9 = vld [vmem:[%s2511_s9 + $0x40] sm:$0xff]  ;;  %v1905_v18 = vld [vmem:[%s2511_s9 + $0x48] sm:$0xff] }
 0x44f   : > { %1254 = vmatprep.mubr.bf16.mxu0 %v2228_v1  ;;  %1295 = vmatprep.mubr.bf16.mxu1 %v2228_v1 }
 0x451   : > { %1225 = vmatpush1.bf16.msra.mxu0 %v2341_v10  ;;  %1266 = vmatpush1.bf16.msra.mxu1 %v2370_v19  ;;  %v1080_v10 = vunpack.c.l.bf16 %v1904_v9 }
 0x452   : > { %1226 = vmatprep.subr.bf16.mxu0 %v2346_v11  ;;  %1267 = vmatprep.subr.bf16.mxu1 %v2382_v23  ;;  %v1081_v11 = vunpack.c.h.bf16 %v1904_v9  ;;  %v2824_v9 = vld [vmem:[%s2324_s14 + $0xa8] ss:$16 sps:$4 sm:$0xff]  }
 0x455   : > { %1227 = vmatpush1.bf16.msra.mxu0 %v2357_v16  ;;  %1268 = vmatpush1.bf16.msra.mxu1 %v2387_v24 }
 0x456   : > { %1228 = vmatprep.subr.bf16.mxu0 %v2363_v17  ;;  %1269 = vmatprep.subr.bf16.mxu1 %v2391_v25 }
 0x459   : > { %1229 = vmatpush1.bf16.msra.mxu0 %v2376_v21  ;;  %1270 = vmatpush1.bf16.msra.mxu1 %v2403_v28 }
 0x45a   : > { %1230 = vmatprep.subr.bf16.mxu0 %v2379_v22  ;;  %1271 = vmatprep.subr.bf16.mxu1 %v2407_v29  ;;  %v1083_v29 = vunpack.c.h.bf16 %v1905_v18 }
 0x45d   : > { %1231 = vmatpush1.bf16.msra.mxu0 %v2395_v26  ;;  %1272 = vmatpush1.bf16.msra.mxu1 %v2419_v32 }
 0x45e   : > { %1232 = vmatprep.subr.bf16.mxu0 %v2399_v27  ;;  %1273 = vmatprep.subr.bf16.mxu1 %v2424_v33 }
 0x461   : > { %1233 = vmatpush1.bf16.msra.mxu0 %v2410_v30  ;;  %1274 = vmatpush1.bf16.msra.mxu1 %v2441_v36  ;;  %v1082_v30 = vunpack.c.l.bf16 %v1905_v18  ;;  %v2848_v18 = vld [vmem:[%s2324_s14 + $0xec] ss:$16 sps:$4 sm:$0xff]  }
 0x462   : > { %1234 = vmatprep.subr.bf16.mxu0 %v2414_v31  ;;  %1275 = vmatprep.subr.bf16.mxu1 %v2445_v37 }
 0x465   : > { %1235 = vmatpush1.bf16.msra.mxu0 %v2428_v34  ;;  %1276 = vmatpush1.bf16.msra.mxu1 %v2456_v40 }
 0x466   : > { %1236 = vmatprep.subr.bf16.mxu0 %v2432_v35  ;;  %1277 = vmatprep.subr.bf16.mxu1 %v2460_v41 }
 0x469   : > { %1237 = vmatpush1.bf16.msra.mxu0 %v2449_v38  ;;  %1278 = vmatpush1.bf16.msra.mxu1 %v2467_v43 }
 0x46a   : > { %1360 = vmatprep.subr.bf16.mxu0 %v2720_v7  ;;  %1401 = vmatprep.subr.bf16.mxu1 %v2349_v12 }
 0x51f   : > { %v1119_v14 = vpop.f32.mrb[16].mxu0  ;;  %v1160_v16 = vpop.f32.mrb[16].mxu1 }
 0x520   : > { %v1167_v17 = vadd.f32 %v1119_v14, %v1080_v10  ;;  %v1121_v19 = vpop.f32.mrb[17].mxu0  ;;  %v1162_v21 = vpop.f32.mrb[17].mxu1  ;;  %v1169_v32 = vadd.f32 %v1160_v16, %v1082_v30  ;;  %v2828_v10 = vld [vmem:[%s2324_s14 + $0xc4] ss:$16 sps:$4 sm:$0xff]   ;;  %v2836_v14 = vld [vmem:[%s2324_s14 + $0xc0] ss:$16 sps:$4 sm:$0xff]  }
 0x521   : > { %v1168_v22 = vadd.f32 %v1121_v19, %v1081_v11  ;;  %v1123_v23 = vpop.f32.mrb[18].mxu0  ;;  %v1164_v24 = vpop.f32.mrb[18].mxu1  ;;  %v1170_v12 = vadd.f32 %v1162_v21, %v1083_v29  ;;  %v2832_v11 = vld [vmem:[%s2324_s14 + $0xcc] ss:$16 sps:$4 sm:$0xff]   ;;  %v2840_v16 = vld [vmem:[%s2324_s14 + $0xc8] ss:$16 sps:$4 sm:$0xff]  }
 0x522   : > { %v1906_v25 = vmul.f32 -1.442695, %v1167_v17  ;;  %v1124_v26 = vpop.f32.mrb[19].mxu0  ;;  %v1165_v27 = vpop.f32.mrb[19].mxu1  ;;  %v2844_v17 = vld [vmem:[%s2324_s14 + $0xe4] ss:$16 sps:$4 sm:$0xff]  }
 0x523   : > { %v1907_v28 = vmul.f32 -1.442695, %v1168_v22  ;;  %v1908_v31 = vmul.f32 -1.442695, %v1170_v12  ;;  %v2852_v19 = vld [vmem:[%s2324_s14 + $0xe0] ss:$16 sps:$4 sm:$0xff]  }
 0x524   : > { %2092 = vpow2.f32 %v1906_v25  ;;  %v2856_v21 = vld [vmem:[%s2324_s14 + $0xe8] ss:$16 sps:$4 sm:$0xff]   ;;  %v2187_v22 = vld [vmem:[%s2324_s14 + $0xc] ss:$16 sps:$4 sm:$0xff]   ;;  %v1910_v23 = vld [vmem:[%s2511_s9 + $0x50] sm:$0xff] }
 0x525   : > { %2094 = vpow2.f32 %v1907_v28  ;;  %v1217_v24 = vunpack.c.l.bf16 %v1910_v23  ;;  %v1218_v25 = vunpack.c.h.bf16 %v1910_v23  ;;  %v1911_v29 = vld [vmem:[%s2511_s9 + $0x58] sm:$0xff] }
 0x526   : > { %2096 = vpow2.f32 %v1908_v31 }
 0x527   : > { %2098 = vtanh.f32 %v1169_v32 }
 0x52e   : > { %v2093_v33 = vpop.eup %2092 }
 0x52f   : > { %v2095_v34 = vpop.eup %2094  ;;  %v1174_v35 = vadd.f32 1.0, %v2093_v33 }
 0x530   : > { %v1180_v36 = vadd.f32 1.0, %v2095_v34  ;;  %v2097_v37 = vpop.eup %2096 }
 0x531   : > { %2100 = vrcp.f32 %v1174_v35  ;;  %v2099_v38 = vpop.eup %2098  ;;  %v1187_v0 = vadd.f32 1.0, %v2097_v37 }
 0x532   : > { %2102 = vrcp.f32 %v1180_v36 }
 0x533   : > { %2104 = vrcp.f32 %v1187_v0 }
 0x53b   : > { %v2101_v40 = vpop.eup %2100 }
 0x53c   : > { %v2103_v41 = vpop.eup %2102  ;;  %v1191_v43 = vmul.f32 %v2101_v40, %v2099_v38  ;;  %v1220_v38 = vunpack.c.h.bf16 %v1911_v29  ;;  %v1219_v40 = vunpack.c.l.bf16 %v1911_v29 }
 0x53d   : > { %v1190_v56 = vmul.f32 %v2103_v41, %v2676_v59  ;;  %v2105_v15 = vpop.eup %2104 }
 0x53f   : > { %v1192_v6 = vadd.f32 %v1191_v43, %v1190_v56 }
 0x541   : > { %2106 = vtanh.f32 %v1192_v6  ;;  %v2728_v8 = vsel %vm1202_vm12, %v1192_v6, %v2676_v59  ;;  %v2796_v59 = vld [vmem:[%s2324_s14 + $0x84] ss:$16 sps:$4 sm:$0xff]  }
 0x54b   : > { %v2107_v20 = vpop.eup %2106 }
 0x54c   : > { %v1194_v42 = vmul.f32 %v2107_v20, %v2105_v15 }
 0x54e   : > { %v1203_v5 = vsel %vm1202_vm12, %v1194_v42, 0.0  ;;  %v2733_v44 = vsel %vm1202_vm12, %v1194_v42, %v2683_v2  ;;  %v2816_v2 = vld [vmem:[%s2324_s14 + $0xac] ss:$16 sps:$4 sm:$0xff]   ;;  %s1915_s14 = smul.u32 4294967272, %s2218_s20 }
 0x54f   : > { %1206 = vst [vmem:[%s1205_s18] sm:$0xff] %v1203_v5  ;;  %v1221_v46 = vpack.c.bf16 %v2733_v44, %v2733_v44 }
 0x550   : > { %s1765_s23 = scalar_lea.vmem %s2524_s16, %s1915_s14 [#allocation4] }
 0x551   : > { %1255 = vmatmul.mubr.bf16.vlgmr.msra.gmra.mrb[20].mxu0 %v1221_v46  ;;  %1296 = vmatmul.mubr.bf16.vlgmr.msra.gmra.mrb[20].mxu1 %v1221_v46 }
 0x552   : > { %1361 = vmatpush1.bf16.msra.mxu0 %v2738_v50  ;;  %1402 = vmatpush1.bf16.msra.mxu1 %v2742_v55 }
 0x553   : > { %1362 = vmatprep.subr.bf16.mxu0 %v2746_v47  ;;  %1403 = vmatprep.subr.bf16.mxu1 %v2750_v48 }
 0x554   : > { %1392 = vmatprep.mubr.bf16.mxu0 %v2228_v1  ;;  %1433 = vmatprep.mubr.bf16.mxu1 %v2228_v1 }
 0x556   : > { %1363 = vmatpush1.bf16.msra.mxu0 %v2756_v49  ;;  %1404 = vmatpush1.bf16.msra.mxu1 %v2760_v51 }
 0x557   : > { %1364 = vmatprep.subr.bf16.mxu0 %v2764_v52  ;;  %1405 = vmatprep.subr.bf16.mxu1 %v2768_v53 }
 0x55a   : > { %1365 = vmatpush1.bf16.msra.mxu0 %v2772_v54  ;;  %1406 = vmatpush1.bf16.msra.mxu1 %v2776_v39 }
 0x55b   : > { %1366 = vmatprep.subr.bf16.mxu0 %v2780_v13  ;;  %1407 = vmatprep.subr.bf16.mxu1 %v2784_v45 }
 0x55e   : > { %1367 = vmatpush1.bf16.msra.mxu0 %v2788_v57  ;;  %1408 = vmatpush1.bf16.msra.mxu1 %v2792_v58 }
 0x55f   : > { %1368 = vmatprep.subr.bf16.mxu0 %v2796_v59  ;;  %1409 = vmatprep.subr.bf16.mxu1 %v2800_v60 }
 0x562   : > { %1369 = vmatpush1.bf16.msra.mxu0 %v2804_v61  ;;  %1410 = vmatpush1.bf16.msra.mxu1 %v2808_v62 }
 0x563   : > { %1370 = vmatprep.subr.bf16.mxu0 %v2812_v63  ;;  %1411 = vmatprep.subr.bf16.mxu1 %v2816_v2 }
 0x566   : > { %1371 = vmatpush1.bf16.msra.mxu0 %v2820_v3  ;;  %1412 = vmatpush1.bf16.msra.mxu1 %v2824_v9 }
 0x567   : > { %1372 = vmatprep.subr.bf16.mxu0 %v2828_v10  ;;  %1413 = vmatprep.subr.bf16.mxu1 %v2832_v11 }
 0x56a   : > { %1373 = vmatpush1.bf16.msra.mxu0 %v2836_v14  ;;  %1414 = vmatpush1.bf16.msra.mxu1 %v2840_v16 }
 0x56b   : > { %1374 = vmatprep.subr.bf16.mxu0 %v2844_v17  ;;  %1415 = vmatprep.subr.bf16.mxu1 %v2848_v18 }
 0x56e   : > { %1375 = vmatpush1.bf16.msra.mxu0 %v2852_v19  ;;  %1416 = vmatpush1.bf16.msra.mxu1 %v2856_v21 }
 0x56f   : > { %1498 = vmatprep.subr.bf16.mxu0 %v2720_v7  ;;  %1539 = vmatprep.subr.bf16.mxu1 %v2187_v22 }
 0x624   : > { %v1256_v26 = vpop.f32.mrb[20].mxu0  ;;  %v1297_v27 = vpop.f32.mrb[20].mxu1 }
 0x625   : > { %v1304_v28 = vadd.f32 %v1256_v26, %v1217_v24  ;;  %v1258_v12 = vpop.f32.mrb[21].mxu0  ;;  %v1299_v30 = vpop.f32.mrb[21].mxu1  ;;  %v1306_v43 = vadd.f32 %v1297_v27, %v1219_v40  ;;  %v1924_v40 = vld [vmem:[%s2511_s9 + $0x70] sm:$0xff] }
 0x626   : > { %v1305_v31 = vadd.f32 %v1258_v12, %v1218_v25  ;;  %v1260_v32 = vpop.f32.mrb[22].mxu0  ;;  %v1301_v33 = vpop.f32.mrb[22].mxu1  ;;  %v1307_v7 = vadd.f32 %v1299_v30, %v1220_v38 }
 0x627   : > { %v1912_v34 = vmul.f32 -1.442695, %v1304_v28  ;;  %v1261_v35 = vpop.f32.mrb[23].mxu0  ;;  %v1302_v36 = vpop.f32.mrb[23].mxu1 }
 0x628   : > { %v1913_v37 = vmul.f32 -1.442695, %v1305_v31  ;;  %v1914_v41 = vmul.f32 -1.442695, %v1307_v7  ;;  %v1339_v24 = vpop.permute.xlu1 %1338 }
 0x629   : > { %2108 = vpow2.f32 %v1912_v34  ;;  %vm1340_vm13 = vcmp.eq.s32.totalorder %v1339_v24, 1 }
 0x62a   : > { %2110 = vpow2.f32 %v1913_v37 }
 0x62b   : > { %2112 = vpow2.f32 %v1914_v41  ;;  %v1493_v41 = vunpack.c.l.bf16 %v1924_v40 }
 0x62c   : > { %2114 = vtanh.f32 %v1306_v43  ;;  %v1494_v43 = vunpack.c.h.bf16 %v1924_v40 }
 0x633   : > { %v2109_v0 = vpop.eup %2108 }
 0x634   : > { %v2111_v56 = vpop.eup %2110  ;;  %v1311_v4 = vadd.f32 1.0, %v2109_v0 }
 0x635   : > { %v1317_v6 = vadd.f32 1.0, %v2111_v56  ;;  %v2113_v15 = vpop.eup %2112 }
 0x636   : > { %2116 = vrcp.f32 %v1311_v4  ;;  %v2115_v20 = vpop.eup %2114  ;;  %v1324_v22 = vadd.f32 1.0, %v2113_v15 }
 0x637   : > { %2118 = vrcp.f32 %v1317_v6  ;;  %v1925_v6 = vld [vmem:[%s2511_s9 + $0x78] sm:$0xff] }
 0x638   : > { %2120 = vrcp.f32 %v1324_v22 }
 0x640   : > { %v2117_v42 = vpop.eup %2116 }
 0x641   : > { %v2119_v5 = vpop.eup %2118  ;;  %v1328_v46 = vmul.f32 %v2117_v42, %v2115_v20 }
 0x642   : > { %v1327_v23 = vmul.f32 %v2119_v5, %v2728_v8  ;;  %v2121_v27 = vpop.eup %2120 }
 0x644   : > { %v1329_v25 = vadd.f32 %v1328_v46, %v1327_v23 }
 0x646   : > { %2122 = vtanh.f32 %v1329_v25  ;;  %v2865_v26 = vsel %vm1340_vm13, %v1329_v25, %v2728_v8 }
 0x650   : > { %v2123_v28 = vpop.eup %2122 }
 0x651   : > { %v1331_v29 = vmul.f32 %v2123_v28, %v2121_v27  ;;  %v1495_v28 = vunpack.c.l.bf16 %v1925_v6 }
 0x653   : > { %v1341_v12 = vsel %vm1340_vm13, %v1331_v29, 0.0  ;;  %v2870_v30 = vsel %vm1340_vm13, %v1331_v29, %v2733_v44 }
 0x654   : > { %1916 = vst [vmem:[%s1765_s23 + $0x28] sm:$0xff] %v1341_v12  ;;  %v1359_v31 = vpack.c.bf16 %v2870_v30, %v2870_v30 }
 0x656   : > { %1393 = vmatmul.mubr.bf16.vlgmr.msra.gmra.mrb[24].mxu0 %v1359_v31  ;;  %1434 = vmatmul.mubr.bf16.vlgmr.msra.gmra.mrb[24].mxu1 %v1359_v31 }
 0x657   : > { %1499 = vmatpush1.bf16.msra.mxu0 %v2738_v50  ;;  %1540 = vmatpush1.bf16.msra.mxu1 %v2742_v55 }
 0x658   : > { %1500 = vmatprep.subr.bf16.mxu0 %v2746_v47  ;;  %1541 = vmatprep.subr.bf16.mxu1 %v2750_v48  ;;  %v1918_v48 = vld [vmem:[%s2511_s9 + $0x68] sm:$0xff] }
 0x659   : > { %1530 = vmatprep.mubr.bf16.mxu0 %v2228_v1  ;;  %1571 = vmatprep.mubr.bf16.mxu1 %v2228_v1  ;;  %v1917_v1 = vld [vmem:[%s2511_s9 + $0x60] sm:$0xff]  ;;  %s1929_s9 = smul.u32 4294967240, %s2218_s20 }
 0x65a   : > { %v1355_v8 = vunpack.c.l.bf16 %v1917_v1  ;;  %v1356_v44 = vunpack.c.h.bf16 %v1917_v1 }
 0x65b   : > { %1501 = vmatpush1.bf16.msra.mxu0 %v2756_v49  ;;  %1542 = vmatpush1.bf16.msra.mxu1 %v2760_v51  ;;  %s1773_s29 = scalar_lea.vmem %s2524_s16, %s1929_s9 [#allocation4] }
 0x65c   : > { %1502 = vmatprep.subr.bf16.mxu0 %v2764_v52  ;;  %1543 = vmatprep.subr.bf16.mxu1 %v2768_v53 }
 0x65f   : > { %1503 = vmatpush1.bf16.msra.mxu0 %v2772_v54  ;;  %1544 = vmatpush1.bf16.msra.mxu1 %v2776_v39 }
 0x660   : > { %1504 = vmatprep.subr.bf16.mxu0 %v2780_v13  ;;  %1545 = vmatprep.subr.bf16.mxu1 %v2784_v45 }
 0x663   : > { %1505 = vmatpush1.bf16.msra.mxu0 %v2788_v57  ;;  %1546 = vmatpush1.bf16.msra.mxu1 %v2792_v58  ;;  %v1358_v58 = vunpack.c.h.bf16 %v1918_v48 }
 0x664   : > { %1506 = vmatprep.subr.bf16.mxu0 %v2796_v59  ;;  %1547 = vmatprep.subr.bf16.mxu1 %v2800_v60  ;;  %v1357_v60 = vunpack.c.l.bf16 %v1918_v48 }
 0x667   : > { %1507 = vmatpush1.bf16.msra.mxu0 %v2804_v61  ;;  %1548 = vmatpush1.bf16.msra.mxu1 %v2808_v62 }
 0x668   : > { %1508 = vmatprep.subr.bf16.mxu0 %v2812_v63  ;;  %1549 = vmatprep.subr.bf16.mxu1 %v2816_v2 }
 0x66b   : > { %1509 = vmatpush1.bf16.msra.mxu0 %v2820_v3  ;;  %1550 = vmatpush1.bf16.msra.mxu1 %v2824_v9 }
 0x66c   : > { %1510 = vmatprep.subr.bf16.mxu0 %v2828_v10  ;;  %1551 = vmatprep.subr.bf16.mxu1 %v2832_v11 }
 0x66f   : > { %1511 = vmatpush1.bf16.msra.mxu0 %v2836_v14  ;;  %1552 = vmatpush1.bf16.msra.mxu1 %v2840_v16 }
 0x670   : > { %1512 = vmatprep.subr.bf16.mxu0 %v2844_v17  ;;  %1553 = vmatprep.subr.bf16.mxu1 %v2848_v18 }
 0x673   : > { %1513 = vmatpush1.bf16.msra.mxu0 %v2852_v19  ;;  %1554 = vmatpush1.bf16.msra.mxu1 %v2856_v21  ;;  %v1477_v19 = vpop.permute.xlu0 %1476 }
 0x674   : > { %vm1478_vm14 = vcmp.eq.s32.totalorder %v1477_v19, 1 }
 0x729   : > { %v1394_v50 = vpop.f32.mrb[24].mxu0  ;;  %v1435_v55 = vpop.f32.mrb[24].mxu1 }
 0x72a   : > { %v1442_v47 = vadd.f32 %v1394_v50, %v1355_v8  ;;  %v1396_v49 = vpop.f32.mrb[25].mxu0  ;;  %v1437_v51 = vpop.f32.mrb[25].mxu1  ;;  %v1444_v62 = vadd.f32 %v1435_v55, %v1357_v60 }
 0x72b   : > { %v1443_v52 = vadd.f32 %v1396_v49, %v1356_v44  ;;  %v1398_v53 = vpop.f32.mrb[26].mxu0  ;;  %v1439_v54 = vpop.f32.mrb[26].mxu1  ;;  %v1445_v59 = vadd.f32 %v1437_v51, %v1358_v58 }
 0x72c   : > { %v1919_v39 = vmul.f32 -1.442695, %v1442_v47  ;;  %v1399_v13 = vpop.f32.mrb[27].mxu0  ;;  %v1440_v45 = vpop.f32.mrb[27].mxu1 }
 0x72d   : > { %v1920_v57 = vmul.f32 -1.442695, %v1443_v52  ;;  %v1921_v61 = vmul.f32 -1.442695, %v1445_v59  ;;  %v1615_v54 = vpop.permute.xlu1 %1614 }
 0x72e   : > { %2124 = vpow2.f32 %v1919_v39  ;;  %vm1616_vm15 = vcmp.eq.s32.totalorder %v1615_v54, 1 }
 0x72f   : > { %2126 = vpow2.f32 %v1920_v57 }
 0x730   : > { %2128 = vpow2.f32 %v1921_v61 }
 0x731   : > { %2130 = vtanh.f32 %v1444_v62 }
 0x738   : > { %v2125_v63 = vpop.eup %2124 }
 0x739   : > { %v2127_v2 = vpop.eup %2126  ;;  %v1449_v3 = vadd.f32 1.0, %v2125_v63 }
 0x73a   : > { %v1455_v9 = vadd.f32 1.0, %v2127_v2  ;;  %v2129_v10 = vpop.eup %2128 }
 0x73b   : > { %2132 = vrcp.f32 %v1449_v3  ;;  %v2131_v11 = vpop.eup %2130  ;;  %v1462_v18 = vadd.f32 1.0, %v2129_v10 }
 0x73c   : > { %2134 = vrcp.f32 %v1455_v9 }
 0x73d   : > { %2136 = vrcp.f32 %v1462_v18 }
 0x745   : > { %v2133_v14 = vpop.eup %2132 }
 0x746   : > { %v2135_v16 = vpop.eup %2134  ;;  %v1466_v17 = vmul.f32 %v2133_v14, %v2131_v11 }
 0x747   : > { %v1465_v21 = vmul.f32 %v2135_v16, %v2865_v26  ;;  %v2137_v34 = vpop.eup %2136 }
 0x749   : > { %v1467_v32 = vadd.f32 %v1466_v17, %v1465_v21 }
 0x74b   : > { %2138 = vtanh.f32 %v1467_v32  ;;  %v1484_v33 = vsel %vm1478_vm14, %v1467_v32, %v2865_v26  ;;  %v1496_v26 = vunpack.c.h.bf16 %v1925_v6 }
 0x755   : > { %v2139_v35 = vpop.eup %2138 }
 0x756   : > { %v1469_v36 = vmul.f32 %v2139_v35, %v2137_v34 }
 0x758   : > { %v1479_v37 = vsel %vm1478_vm14, %v1469_v36, 0.0  ;;  %v1483_v38 = vsel %vm1478_vm14, %v1469_v36, %v2870_v30 }
 0x759   : > { %1923 = vst [vmem:[%s1769_s27 + $0x30] sm:$0xff] %v1479_v37  ;;  %v1497_v7 = vpack.c.bf16 %v1483_v38, %v1483_v38 }
 0x75b   : > { %1531 = vmatmul.mubr.bf16.vlgmr.msra.gmra.mrb[28].mxu0 %v1497_v7  ;;  %1572 = vmatmul.mubr.bf16.vlgmr.msra.gmra.mrb[28].mxu1 %v1497_v7 }
 0x82e   : > { %v1532_v0 = vpop.f32.mrb[28].mxu0  ;;  %v1573_v56 = vpop.f32.mrb[28].mxu1 }
 0x82f   : > { %v1580_v4 = vadd.f32 %v1532_v0, %v1493_v41  ;;  %v1534_v15 = vpop.f32.mrb[29].mxu0  ;;  %v1575_v20 = vpop.f32.mrb[29].mxu1  ;;  %v1582_v12 = vadd.f32 %v1573_v56, %v1495_v28 }
 0x830   : > { %v1581_v42 = vadd.f32 %v1534_v15, %v1494_v43  ;;  %v1536_v5 = vpop.f32.mrb[30].mxu0  ;;  %v1577_v46 = vpop.f32.mrb[30].mxu1  ;;  %v1583_v27 = vadd.f32 %v1575_v20, %v1496_v26 }
 0x831   : > { %v1926_v22 = vmul.f32 -1.442695, %v1580_v4  ;;  %v1537_v23 = vpop.f32.mrb[31].mxu0  ;;  %v1578_v24 = vpop.f32.mrb[31].mxu1 }
 0x832   : > { %v1927_v25 = vmul.f32 -1.442695, %v1581_v42  ;;  %v1928_v29 = vmul.f32 -1.442695, %v1583_v27 }
 0x833   : > { %2140 = vpow2.f32 %v1926_v22 }
 0x834   : > { %2142 = vpow2.f32 %v1927_v25 }
 0x835   : > { %2144 = vpow2.f32 %v1928_v29 }
 0x836   : > { %2146 = vtanh.f32 %v1582_v12 }
 0x83d   : > { %v2141_v30 = vpop.eup %2140 }
 0x83e   : > { %v2143_v31 = vpop.eup %2142  ;;  %v1587_v1 = vadd.f32 1.0, %v2141_v30 }
 0x83f   : > { %v1593_v8 = vadd.f32 1.0, %v2143_v31  ;;  %v2145_v44 = vpop.eup %2144 }
 0x840   : > { %2148 = vrcp.f32 %v1587_v1  ;;  %v2147_v50 = vpop.eup %2146  ;;  %v1600_v49 = vadd.f32 1.0, %v2145_v44 }
 0x841   : > { %2150 = vrcp.f32 %v1593_v8 }
 0x842   : > { %2152 = vrcp.f32 %v1600_v49 }
 0x84a   : > { %v2149_v55 = vpop.eup %2148 }
 0x84b   : > { %v2151_v47 = vpop.eup %2150  ;;  %v1604_v48 = vmul.f32 %v2149_v55, %v2147_v50 }
 0x84c   : > { %v1603_v51 = vmul.f32 %v2151_v47, %v1484_v33  ;;  %v2153_v53 = vpop.eup %2152 }
 0x84e   : > { %v1605_v52 = vadd.f32 %v1604_v48, %v1603_v51 }
 0x850   : > { %2154 = vtanh.f32 %v1605_v52 }
 0x858   : > { %1631 = sbr.rel (!%p2291_p3) target bundleno = 2154 (0x86a), region = 48 }
 0x85a   : > { %v2155_v39 = vpop.eup %2154 }
 0x85b   : > { %v1607_v13 = vmul.f32 %v2155_v39, %v2153_v53 }
 0x85d   : > { %v1617_v45 = vsel %vm1616_vm15, %v1607_v13, 0.0 }
 0x85e   : > { %1930 = vst [vmem:[%s1773_s29 + $0x38] sm:$0xff] %v1617_v45 }
 0x865   : > { %v1682_v57 = vld [vmem:[%s2524_s16] sm:$0xff]  ;;  %v1684_v58 = vld [vmem:[%s2524_s16 + $0x8] sm:$0xff]  ;;  %v1686_v59 = vld [vmem:[%s2524_s16 + $0x10] sm:$0xff] }
 0x866   : > { %1683 = vst [vmem:[%s1640_s7] sm:$0xff] %v1682_v57  ;;  %1685 = vst [vmem:[%s1640_s7 + $0x10] sm:$0xff] %v1684_v58  ;;  %v1688_v60 = vld [vmem:[%s2524_s16 + $0x18] sm:$0xff]  ;;  %v1690_v61 = vld [vmem:[%s2524_s16 + $0x20] sm:$0xff] }
 0x867   : > { %1687 = vst [vmem:[%s1640_s7 + $0x20] sm:$0xff] %v1686_v59  ;;  %v1692_v62 = vld [vmem:[%s2524_s16 + $0x28] sm:$0xff]  ;;  %1689 = vst [vmem:[%s1640_s7 + $0x30] sm:$0xff] %v1688_v60  ;;  %v1694_v63 = vld [vmem:[%s2524_s16 + $0x30] sm:$0xff] }
 0x868   : > { %1691 = vst [vmem:[%s1640_s7 + $0x40] sm:$0xff] %v1690_v61  ;;  %1693 = vst [vmem:[%s1640_s7 + $0x50] sm:$0xff] %v1692_v62  ;;  %v1696_v2 = vld [vmem:[%s2524_s16 + $0x38] sm:$0xff] }
 0x869   : > { %1695 = vst [vmem:[%s1640_s7 + $0x60] sm:$0xff] %v1694_v63  ;;  %1697 = vst [vmem:[%s1640_s7 + $0x70] sm:$0xff] %v1696_v2 }
 0x86a PF: > { %s15_s22 = sadd.s32 1, %s2226_s22   ;;  %s2954_s18 = smov %s2214_s19 }
 0x86b   : > { %p12_p9 = scmp.ge.s32.totalorder %s15_s22, 4   ;;  %s2955_s19 = smov %s2300_s28 }
 0x86c   : > { %s2956_s20 = smov %s2222_s21  ;;  %s2957_s21 = smov %s2959_s24 }
 0x86d   :  { %14 = sbr.rel (!%p12_p9) target bundleno = 3 (0x3), region = 136 }

// kernel: lstm_encoder_forward.2
= control target key start
LH: loop header
LB: loop body
LE: loop exit
PB: predicated region body
PF: predicated region fallthrough
CT: control target
= control target key end

     0   :  { %s2275_s18 = smov 0   ;;  %s2277_s19 = smov 0   ;;  %s2966_s0 = inlined_call_operand.vmem [shape: s32[8,1], index: 0, kind: input, shape index: {}]   ;;  %s2967_s1 = inlined_call_operand.vmem [shape: bf16[2,8,8,512], index: 1, kind: input, shape index: {}]   ;;  %s2968_s2 = inlined_call_operand.vmem [shape: bf16[2,128,512], index: 2, kind: input, shape index: {}]   ;;  %s2969_s3 = inlined_call_operand.vmem [shape: f32[2,8,128], index: 3, kind: input, shape index: {}]   ;;  %s2970_s4 = inlined_call_operand.vmem [shape: f32[2,8,128], index: 4, kind: input, shape index: {}]   ;;  %s2971_s5 = inlined_call_operand.vmem [shape: bf16[8,8,256], index: 5, kind: output, shape index: {}]  }
   0x1   :  { %s2279_s20 = smov 0   ;;  %s2281_s21 = smov 0  }
   0x2   :  { %s2283_s22 = smov 0  }
   0x3 LB: > { %s1850_s23 = sadd.s32 4294967295, %s2242_s22   ;;  %s27_s24 = sadd.s32 1, %s2238_s21  ;;  %s2242_s22 = sphi %s2283_s22, %s15_s22   ;;  %s2238_s21 = sphi %s2281_s21, %s2976_s21   ;;  %s2234_s20 = sphi %s2279_s20, %s2975_s20   ;;  %s2230_s19 = sphi %s2277_s19, %s2974_s19   ;;  %s2226_s18 = sphi %s2275_s18, %s2973_s18  }
   0x4   : > { %p29_p0 = scmp.ge.s32.totalorder %s27_s24, 2  ;;  %s171_s25 = sadd.s32 1, %s2230_s19 }
   0x5   : > { %p181_p1 = scmp.ne.s32.totalorder %s2230_s19, %s2226_s18  ;;  %p182_p2 = scmp.eq.s32.totalorder %s1850_s23, 1 }
   0x6   : > { %s2978_s24 = smov (%p29_p0, %s27_s24), 0  ;;  %p1854_p4 = scmp.ge.s32.totalorder %s2242_s22, 1 }
   0x7   : > { %p2307_p3 = por %p182_p2, %p181_p1  ;;  %s167_s27 = ssub.s32 %s2238_s21, %s2978_s24 }
   0x8   : > { %p245_p5 = scmp.lt.s32.totalorder %s2242_s22, 3  ;;  %p169_p6 = scmp.eq.s32.totalorder %s167_s27, 0 }
   0xa   : > { %p246_p7 = pnand %p1854_p4, %p245_p5 }
   0xb   : > { %s2316_s28 = scalar_select %p169_p6, %s2230_s19, %s171_s25  }
   0xc   : > { %249 = sbr.rel (%p246_p7) target bundleno = 2157 (0x86d), region = 40  ;;  %p291_p8 = scmp.lt.s32.totalorder (!%p246_p7), %s2234_s20, 1  ;;  %v2322_v0 = vld [vmem:[%s2966_s0] sm:$0xff] (!%p246_p7)  ;;  %v2244_v1 = vmov (!%p246_p7), 0  }
   0xd   : > { %s366_s6 = smul.u32 (!%p246_p7), 7, %s2234_s20  ;;  %567 = vmatprep.mubr.bf16.mxu0 (!%p246_p7), %v2244_v1  ;;  %608 = vmatprep.mubr.bf16.mxu1 (!%p246_p7), %v2244_v1 }
   0xe   : > { %s663_s7 = smul.u32 (!%p246_p7), 5, %s2234_s20  ;;  %1994 = vset.pattern.permute.xlu0 (!%p246_p7), %v2244_v1  ;;  %1995 = vset.pattern.permute.xlu1 (!%p246_p7), %v2244_v1 }
   0xf   : > { %v645_v2 = vstv (!%p246_p7), %s366_s6  ;;  %s1079_s10 = smul.u32 (!%p246_p7), 4294967295, %s2234_s20 }
  0x10   : > { %vm646_vm0 = vcmp.lt.s32.totalorder (!%p246_p7), %v645_v2, %v2322_v0  ;;  %s664_s9 = sadd.s32 (!%p246_p7), 1, %s663_s7  ;;  %s1356_s16 = smul.u32 (!%p246_p7), 4294967291, %s2234_s20 }
  0x11   : > { %v648_v3 = vsel (!%p246_p7), %vm646_vm0, 1, %v2244_v1  ;;  %v783_v4 = vstv (!%p246_p7), %s664_s9  ;;  %s1080_s15 = sadd.s32 (!%p246_p7), 4, %s1079_s10  ;;  %s1217_s25 = smul.u32 (!%p246_p7), 4294967293, %s2234_s20 }
  0x12   : > { %650 = vperm.xlu0 (!%p246_p7), %1994, %v648_v3   ;;  %vm784_vm1 = vcmp.lt.s32.totalorder (!%p246_p7), %v783_v4, %v2322_v0  ;;  %v1199_v8 = vstv (!%p246_p7), %s1080_s15  ;;  %s1357_s17 = sadd.s32 (!%p246_p7), 6, %s1356_s16  ;;  %s1952_s15 = smul.u32 (!%p246_p7), 28, %s2234_s20 }
  0x13   : > { %s2329_s8 = scalar_select %p291_p8, %s2234_s20, 1  ;;  %v787_v6 = vsel %vm784_vm1, 1, %v2244_v1  ;;  %vm1200_vm2 = vcmp.lt.s32.totalorder %v1199_v8, %v2322_v0  ;;  %v1476_v13 = vstv %s1357_s17 }
  0x14   : > { %v1202_v15 = vsel %vm1200_vm2, 1, %v2244_v1  ;;  %vm1477_vm3 = vcmp.lt.s32.totalorder %v1476_v13, %v2322_v0  ;;  %s1903_s7 = smul.u32 20, %s2234_s20 }
  0x15   : > { %s1951_s11 = sshll.u32 %s2329_s8, 8  ;;  %v1480_v20 = vsel %vm1477_vm3, 1, %v2244_v1  ;;  %s1860_s23 = sshll.u32 %s2329_s8, 3 }
  0x16   : > { %s2340_s14 = scalar_lea.vmem %s2968_s2, %s1951_s11  ;;  %789 = vperm.xlu0 %1994, %v787_v6   ;;  %s309_s29 = scalar_lea.vmem %s2969_s3, %s1860_s23 }
  0x17   : > { %v2344_v5 = vld [vmem:[%s2340_s14 + $0x4] ss:$16 sps:$4 sm:$0xff]   ;;  %v2348_v7 = vld [vmem:[%s2340_s14] ss:$16 sps:$4 sm:$0xff]   ;;  %v2365_v12 = vld [vmem:[%s2340_s14 + $0xc] ss:$16 sps:$4 sm:$0xff]   ;;  %s313_s12 = scalar_lea.vmem %s2970_s4, %s1860_s23 }
  0x18   : > { %535 = vmatprep.subr.bf16.mxu0 %v2344_v5  ;;  %v2353_v9 = vld [vmem:[%s2340_s14 + $0x24] ss:$16 sps:$4 sm:$0xff]   ;;  %v2357_v10 = vld [vmem:[%s2340_s14 + $0x20] ss:$16 sps:$4 sm:$0xff]   ;;  %v2368_v14 = vld [vmem:[%s2340_s14 + $0x8] ss:$16 sps:$4 sm:$0xff]   ;;  %576 = vmatprep.subr.bf16.mxu1 %v2365_v12 }
  0x19   : > { %536 = vmatpush1.bf16.msra.mxu0 %v2348_v7  ;;  %v2362_v11 = vld [vmem:[%s2340_s14 + $0x44] ss:$16 sps:$4 sm:$0xff]   ;;  %v2373_v16 = vld [vmem:[%s2340_s14 + $0x40] ss:$16 sps:$4 sm:$0xff]   ;;  %577 = vmatpush1.bf16.msra.mxu1 %v2368_v14  ;;  %v2383_v18 = vld [vmem:[%s2340_s14 + $0x2c] ss:$16 sps:$4 sm:$0xff]  }
  0x1a   : > { %537 = vmatprep.subr.bf16.mxu0 %v2353_v9  ;;  %v2379_v17 = vld [vmem:[%s2340_s14 + $0x64] ss:$16 sps:$4 sm:$0xff]   ;;  %v2386_v19 = vld [vmem:[%s2340_s14 + $0x28] ss:$16 sps:$4 sm:$0xff]   ;;  %1204 = vperm.xlu0 %1994, %v1202_v15   ;;  %v2392_v21 = vld [vmem:[%s2340_s14 + $0x60] ss:$16 sps:$4 sm:$0xff]  }
  0x1b   : > { %578 = vmatprep.subr.bf16.mxu1 %v2383_v18  ;;  %v2395_v22 = vld [vmem:[%s2340_s14 + $0x84] ss:$16 sps:$4 sm:$0xff]   ;;  %v2398_v23 = vld [vmem:[%s2340_s14 + $0x4c] ss:$16 sps:$4 sm:$0xff]   ;;  %v2403_v24 = vld [vmem:[%s2340_s14 + $0x48] ss:$16 sps:$4 sm:$0xff]  }
  0x1c   : > { %v2407_v25 = vld [vmem:[%s2340_s14 + $0x6c] ss:$16 sps:$4 sm:$0xff]   ;;  %v2411_v26 = vld [vmem:[%s2340_s14 + $0x80] ss:$16 sps:$4 sm:$0xff]   ;;  %v2415_v27 = vld [vmem:[%s2340_s14 + $0xa4] ss:$16 sps:$4 sm:$0xff]  }
  0x1d   : > { %538 = vmatpush1.bf16.msra.mxu0 %v2357_v10  ;;  %579 = vmatpush1.bf16.msra.mxu1 %v2386_v19  ;;  %v2419_v28 = vld [vmem:[%s2340_s14 + $0x68] ss:$16 sps:$4 sm:$0xff]   ;;  %v2423_v29 = vld [vmem:[%s2340_s14 + $0x8c] ss:$16 sps:$4 sm:$0xff]   ;;  %v2426_v30 = vld [vmem:[%s2340_s14 + $0xa0] ss:$16 sps:$4 sm:$0xff]  }
  0x1e   : > { %539 = vmatprep.subr.bf16.mxu0 %v2362_v11  ;;  %580 = vmatprep.subr.bf16.mxu1 %v2398_v23  ;;  %v2430_v31 = vld [vmem:[%s2340_s14 + $0xc4] ss:$16 sps:$4 sm:$0xff]   ;;  %v2435_v32 = vld [vmem:[%s2340_s14 + $0x88] ss:$16 sps:$4 sm:$0xff]   ;;  %v2440_v33 = vld [vmem:[%s2340_s14 + $0xac] ss:$16 sps:$4 sm:$0xff]  }
  0x1f   : > { %1482 = vperm.xlu0 %1994, %v1480_v20   ;;  %v2444_v34 = vld [vmem:[%s2340_s14 + $0xc0] ss:$16 sps:$4 sm:$0xff]   ;;  %v2448_v35 = vld [vmem:[%s2340_s14 + $0xe4] ss:$16 sps:$4 sm:$0xff]   ;;  %v2457_v36 = vld [vmem:[%s2340_s14 + $0xa8] ss:$16 sps:$4 sm:$0xff]  }
  0x20   : > { %v2461_v37 = vld [vmem:[%s2340_s14 + $0xcc] ss:$16 sps:$4 sm:$0xff]   ;;  %v2465_v38 = vld [vmem:[%s2340_s14 + $0xe0] ss:$16 sps:$4 sm:$0xff]   ;;  %v2472_v40 = vld [vmem:[%s2340_s14 + $0xc8] ss:$16 sps:$4 sm:$0xff]  }
  0x21   : > { %540 = vmatpush1.bf16.msra.mxu0 %v2373_v16  ;;  %581 = vmatpush1.bf16.msra.mxu1 %v2403_v24  ;;  %v2467_v39 = vld [vmem:[%s309_s29] sm:$0xff]  ;;  %v2476_v41 = vld [vmem:[%s2340_s14 + $0xec] ss:$16 sps:$4 sm:$0xff]   ;;  %v2483_v43 = vld [vmem:[%s2340_s14 + $0xe8] ss:$16 sps:$4 sm:$0xff]   ;;  %s1950_s30 = sshll.u32 %s2329_s8, 7 }
  0x22   : > { %541 = vmatprep.subr.bf16.mxu0 %v2379_v17  ;;  %582 = vmatprep.subr.bf16.mxu1 %v2407_v25  ;;  %v374_v42 = vpack.c.bf16 %v2467_v39, %v2467_v39  ;;  %s2527_s9 = scalar_lea.vmem %s2967_s1, %s1950_s30  ;;  %v326_v20 = vld [vmem:[%s313_s12] sm:$0xff]  ;;  %s287_s8 = sand.u32 1, %s2226_s18  }
  0x23   : > { %v368_v44 = vld [vmem:[%s2527_s9] sm:$0xff]  ;;  %v369_v48 = vld [vmem:[%s2527_s9 + $0x8] sm:$0xff]  ;;  %s1855_s13 = sshll.u32 %s287_s8, 5  ;;  %s802_s18 = smul.u32 3, %s2234_s20 }
  0x24   : > { %v370_v45 = vunpack.c.l.bf16 %v368_v44  ;;  %v371_v46 = vunpack.c.h.bf16 %v368_v44  ;;  %v373_v55 = vunpack.c.h.bf16 %v369_v48  ;;  %v372_v61 = vunpack.c.l.bf16 %v369_v48  ;;  %s2540_s16 = scalar_lea.vmem [#allocation4], %s1855_s13  ;;  %s942_s23 = sadd.s32 3, %s2234_s20 }
  0x25   : > { %542 = vmatpush1.bf16.msra.mxu0 %v2392_v21  ;;  %583 = vmatpush1.bf16.msra.mxu1 %v2419_v28  ;;  %s656_s17 = scalar_lea.vmem %s2540_s16, %s1952_s15 [#allocation4]  ;;  %s803_s27 = sadd.s32 2, %s802_s18 }
  0x26   : > { %543 = vmatprep.subr.bf16.mxu0 %v2395_v22  ;;  %584 = vmatprep.subr.bf16.mxu1 %v2423_v29  ;;  %s1495_s29 = smul.u32 4294967289, %s2234_s20  ;;  %s1218_s30 = sadd.s32 5, %s1217_s25 }
  0x27   : > { %s1767_s10 = scalar_lea.vmem %s2540_s16, %s1903_s7 [#allocation4]  ;;  %s1910_s11 = smul.u32 12, %s2234_s20 }
  0x28   : > { %s1496_s6 = sadd.s32 7, %s1495_s29  ;;  %s1917_s8 = sshll.u32 %s2234_s20, 2 }
  0x29   : > { %544 = vmatpush1.bf16.msra.mxu0 %v2411_v26  ;;  %585 = vmatpush1.bf16.msra.mxu1 %v2435_v32  ;;  %s1771_s12 = scalar_lea.vmem %s2540_s16, %s1910_s11 [#allocation4]  ;;  %s1774_s13 = scalar_lea.vmem %s2540_s16, %s1917_s8 [#allocation4] }
  0x2a   : > { %545 = vmatprep.subr.bf16.mxu0 %v2415_v27  ;;  %586 = vmatprep.subr.bf16.mxu1 %v2440_v33  ;;  %s1201_s15 = ssub.s32 4, %s2234_s20  ;;  %s1937_s25 = smul.u32 4294967276, %s2234_s20 }
  0x2b   : > { %s1648_s7 = scalar_lea.vmem (%p2307_p3), %s2971_s5, %s1917_s8 }
  0x2d   : > { %546 = vmatpush1.bf16.msra.mxu0 %v2426_v30  ;;  %587 = vmatpush1.bf16.msra.mxu1 %v2457_v36 }
  0x2e   : > { %547 = vmatprep.subr.bf16.mxu0 %v2430_v31  ;;  %588 = vmatprep.subr.bf16.mxu1 %v2461_v37 }
  0x31   : > { %548 = vmatpush1.bf16.msra.mxu0 %v2444_v34  ;;  %589 = vmatpush1.bf16.msra.mxu1 %v2472_v40 }
  0x32   : > { %549 = vmatprep.subr.bf16.mxu0 %v2448_v35  ;;  %590 = vmatprep.subr.bf16.mxu1 %v2476_v41 }
  0x35   : > { %550 = vmatpush1.bf16.msra.mxu0 %v2465_v38  ;;  %591 = vmatpush1.bf16.msra.mxu1 %v2483_v43 }
  0x36   : > { %673 = vmatprep.subr.bf16.mxu0 %v2344_v5  ;;  %714 = vmatprep.subr.bf16.mxu1 %v2365_v12 }
  0x38   : > { %568 = vmatmul.mubr.bf16.vlgmr.msra.gmra.mrb[0].mxu0 %v374_v42  ;;  %609 = vmatmul.mubr.bf16.vlgmr.msra.gmra.mrb[0].mxu1 %v374_v42 }
  0x39   : > { %674 = vmatpush1.bf16.msra.mxu0 %v2348_v7  ;;  %705 = vmatprep.mubr.bf16.mxu0 %v2244_v1 }
  0x3a   : > { %675 = vmatprep.subr.bf16.mxu0 %v2353_v9  ;;  %715 = vmatpush1.bf16.msra.mxu1 %v2368_v14 }
  0x3b   : > { %716 = vmatprep.subr.bf16.mxu1 %v2383_v18  ;;  %746 = vmatprep.mubr.bf16.mxu1 %v2244_v1 }
  0x3d   : > { %676 = vmatpush1.bf16.msra.mxu0 %v2357_v10 }
  0x3e   : > { %677 = vmatprep.subr.bf16.mxu0 %v2362_v11  ;;  %717 = vmatpush1.bf16.msra.mxu1 %v2386_v19 }
  0x3f   : > { %718 = vmatprep.subr.bf16.mxu1 %v2398_v23 }
  0x41   : > { %678 = vmatpush1.bf16.msra.mxu0 %v2373_v16 }
  0x42   : > { %679 = vmatprep.subr.bf16.mxu0 %v2379_v17  ;;  %719 = vmatpush1.bf16.msra.mxu1 %v2403_v24 }
  0x43   : > { %720 = vmatprep.subr.bf16.mxu1 %v2407_v25 }
  0x45   : > { %680 = vmatpush1.bf16.msra.mxu0 %v2392_v21 }
  0x46   : > { %681 = vmatprep.subr.bf16.mxu0 %v2395_v22  ;;  %721 = vmatpush1.bf16.msra.mxu1 %v2419_v28 }
  0x47   : > { %722 = vmatprep.subr.bf16.mxu1 %v2423_v29 }
  0x49   : > { %682 = vmatpush1.bf16.msra.mxu0 %v2411_v26 }
  0x4a   : > { %683 = vmatprep.subr.bf16.mxu0 %v2415_v27  ;;  %723 = vmatpush1.bf16.msra.mxu1 %v2435_v32 }
  0x4b   : > { %724 = vmatprep.subr.bf16.mxu1 %v2440_v33 }
  0x4d   : > { %684 = vmatpush1.bf16.msra.mxu0 %v2426_v30 }
  0x4e   : > { %685 = vmatprep.subr.bf16.mxu0 %v2430_v31  ;;  %725 = vmatpush1.bf16.msra.mxu1 %v2457_v36 }
  0x4f   : > { %726 = vmatprep.subr.bf16.mxu1 %v2461_v37 }
  0x51   : > { %686 = vmatpush1.bf16.msra.mxu0 %v2444_v34 }
  0x52   : > { %687 = vmatprep.subr.bf16.mxu0 %v2448_v35  ;;  %727 = vmatpush1.bf16.msra.mxu1 %v2472_v40 }
  0x53   : > { %728 = vmatprep.subr.bf16.mxu1 %v2476_v41 }
  0x55   : > { %688 = vmatpush1.bf16.msra.mxu0 %v2465_v38 }
  0x56   : > { %812 = vmatprep.subr.bf16.mxu0 %v2344_v5  ;;  %729 = vmatpush1.bf16.msra.mxu1 %v2483_v43 }
  0x57   : > { %853 = vmatprep.subr.bf16.mxu1 %v2365_v12 }
 0x10b   : > { %v569_v47 = vpop.f32.mrb[0].mxu0  ;;  %v610_v57 = vpop.f32.mrb[0].mxu1 }
 0x10c   : > { %v617_v49 = vadd.f32 %v569_v47, %v370_v45  ;;  %v571_v50 = vpop.f32.mrb[1].mxu0  ;;  %v612_v58 = vpop.f32.mrb[1].mxu1  ;;  %v619_v2 = vadd.f32 %v610_v57, %v372_v61 }
 0x10d   : > { %v618_v51 = vadd.f32 %v571_v50, %v371_v46  ;;  %v573_v52 = vpop.f32.mrb[2].mxu0  ;;  %v620_v59 = vadd.f32 %v612_v58, %v373_v55  ;;  %v614_v60 = vpop.f32.mrb[2].mxu1  ;;  %v922_v58 = vstv %s803_s27  ;;  %s1784_s27 = scalar_lea.vmem %s2540_s16, %s1937_s25 [#allocation4] }
 0x10e   : > { %v1894_v53 = vmul.f32 -1.442695, %v617_v49  ;;  %v574_v54 = vpop.f32.mrb[3].mxu0  ;;  %v615_v62 = vpop.f32.mrb[3].mxu1  ;;  %vm923_vm5 = vcmp.lt.s32.totalorder %v922_v58, %v2322_v0  ;;  %v1337_v60 = vstv %s1218_s30 }
 0x10f   : > { %v1895_v56 = vmul.f32 -1.442695, %v618_v51  ;;  %v1896_v63 = vmul.f32 -1.442695, %v620_v59  ;;  %v651_v45 = vpop.permute.xlu0 %650  ;;  %v926_v59 = vsel %vm923_vm5, 1, %v2244_v1  ;;  %vm1338_vm7 = vcmp.lt.s32.totalorder %v1337_v60, %v2322_v0 }
 0x110   : > { %2044 = vpow2.f32 %v1894_v53  ;;  %vm652_vm4 = vcmp.eq.s32.totalorder %v651_v45, 1  ;;  %928 = vperm.xlu1 %1995, %v926_v59   ;;  %v1615_v62 = vstv %s1496_s6 }
 0x111   : > { %2046 = vpow2.f32 %v1895_v56  ;;  %vm1616_vm8 = vcmp.lt.s32.totalorder %v1615_v62, %v2322_v0 }
 0x112   : > { %2048 = vpow2.f32 %v1896_v63  ;;  %v1341_v63 = vsel %vm1338_vm7, 1, %v2244_v1 }
 0x113   : > { %2050 = vtanh.f32 %v619_v2  ;;  %v1619_v2 = vsel %vm1616_vm8, 1, %v2244_v1 }
 0x11a   : > { %v2045_v3 = vpop.eup %2044 }
 0x11b   : > { %v2047_v4 = vpop.eup %2046  ;;  %v624_v6 = vadd.f32 1.0, %v2045_v3  ;;  %v1898_v3 = vld [vmem:[%s2527_s9 + $0x10] sm:$0xff] }
 0x11c   : > { %v630_v8 = vadd.f32 1.0, %v2047_v4  ;;  %v2049_v13 = vpop.eup %2048  ;;  %v668_v4 = vunpack.c.l.bf16 %v1898_v3 }
 0x11d   : > { %2052 = vrcp.f32 %v624_v6  ;;  %v2051_v15 = vpop.eup %2050  ;;  %v637_v44 = vadd.f32 1.0, %v2049_v13  ;;  %v669_v6 = vunpack.c.h.bf16 %v1898_v3 }
 0x11e   : > { %2054 = vrcp.f32 %v630_v8 }
 0x11f   : > { %2056 = vrcp.f32 %v637_v44 }
 0x127   : > { %v2053_v42 = vpop.eup %2052 }
 0x128   : > { %v2055_v46 = vpop.eup %2054  ;;  %v641_v47 = vmul.f32 %v2053_v42, %v2051_v15 }
 0x129   : > { %v640_v48 = vmul.f32 %v2055_v46, %v326_v20  ;;  %v2057_v51 = vpop.eup %2056 }
 0x12b   : > { %v642_v49 = vadd.f32 %v641_v47, %v640_v48 }
 0x12d   : > { %2058 = vtanh.f32 %v642_v49  ;;  %v2536_v50 = vsel %vm652_vm4, %v642_v49, %v326_v20  ;;  %v1899_v20 = vld [vmem:[%s2527_s9 + $0x18] sm:$0xff] }
 0x137   : > { %v2059_v52 = vpop.eup %2058 }
 0x138   : > { %v644_v53 = vmul.f32 %v2059_v52, %v2057_v51  ;;  %v671_v52 = vunpack.c.h.bf16 %v1899_v20 }
 0x13a   : > { %v653_v54 = vsel %vm652_vm4, %v644_v53, 0.0  ;;  %v2544_v55 = vsel %vm652_vm4, %v644_v53, %v2467_v39  ;;  %v1061_v39 = vstv %s942_s23 }
 0x13b   : > { %v654_v56 = vpack.c.bf16 %v653_v54, %v653_v54  ;;  %v672_v57 = vpack.c.bf16 %v2544_v55, %v2544_v55  ;;  %vm1062_vm6 = vcmp.lt.s32.totalorder %v1061_v39, %v2322_v0  ;;  %v670_v54 = vunpack.c.l.bf16 %v1899_v20 }
 0x13c   : > { %v1064_v61 = vsel %vm1062_vm6, 1, %v2244_v1 }
 0x13d   : > { %657 = vst [vmem:[%s656_s17] sm:$0xf] %v654_v56  ;;  %706 = vmatmul.mubr.bf16.vlgmr.msra.gmra.mrb[4].mxu0 %v672_v57  ;;  %747 = vmatmul.mubr.bf16.vlgmr.msra.gmra.mrb[4].mxu1 %v672_v57  ;;  %s1924_s17 = sshll.u32 %s1201_s15, 2 }
 0x13e   : > { %813 = vmatpush1.bf16.msra.mxu0 %v2348_v7  ;;  %854 = vmatpush1.bf16.msra.mxu1 %v2368_v14  ;;  %s1210_s18 = scalar_lea.vmem %s2540_s16, %s1924_s17 [#allocation4] }
 0x13f   : > { %814 = vmatprep.subr.bf16.mxu0 %v2353_v9  ;;  %855 = vmatprep.subr.bf16.mxu1 %v2383_v18 }
 0x140   : > { %844 = vmatprep.mubr.bf16.mxu0 %v2244_v1  ;;  %885 = vmatprep.mubr.bf16.mxu1 %v2244_v1 }
 0x141   : > { %1066 = vperm.xlu1 %1995, %v1064_v61  }
 0x142   : > { %815 = vmatpush1.bf16.msra.mxu0 %v2357_v10  ;;  %856 = vmatpush1.bf16.msra.mxu1 %v2386_v19 }
 0x143   : > { %816 = vmatprep.subr.bf16.mxu0 %v2362_v11  ;;  %857 = vmatprep.subr.bf16.mxu1 %v2398_v23 }
 0x145   : > { %1343 = vperm.xlu1 %1995, %v1341_v63  }
 0x146   : > { %817 = vmatpush1.bf16.msra.mxu0 %v2373_v16  ;;  %858 = vmatpush1.bf16.msra.mxu1 %v2403_v24 }
 0x147   : > { %818 = vmatprep.subr.bf16.mxu0 %v2379_v17  ;;  %859 = vmatprep.subr.bf16.mxu1 %v2407_v25 }
 0x149   : > { %1621 = vperm.xlu1 %1995, %v1619_v2  }
 0x14a   : > { %819 = vmatpush1.bf16.msra.mxu0 %v2392_v21  ;;  %860 = vmatpush1.bf16.msra.mxu1 %v2419_v28 }
 0x14b   : > { %820 = vmatprep.subr.bf16.mxu0 %v2395_v22  ;;  %861 = vmatprep.subr.bf16.mxu1 %v2423_v29 }
 0x14e   : > { %821 = vmatpush1.bf16.msra.mxu0 %v2411_v26  ;;  %862 = vmatpush1.bf16.msra.mxu1 %v2435_v32 }
 0x14f   : > { %822 = vmatprep.subr.bf16.mxu0 %v2415_v27  ;;  %863 = vmatprep.subr.bf16.mxu1 %v2440_v33 }
 0x152   : > { %823 = vmatpush1.bf16.msra.mxu0 %v2426_v30  ;;  %864 = vmatpush1.bf16.msra.mxu1 %v2457_v36 }
 0x153   : > { %824 = vmatprep.subr.bf16.mxu0 %v2430_v31  ;;  %865 = vmatprep.subr.bf16.mxu1 %v2461_v37 }
 0x156   : > { %825 = vmatpush1.bf16.msra.mxu0 %v2444_v34  ;;  %866 = vmatpush1.bf16.msra.mxu1 %v2472_v40 }
 0x157   : > { %826 = vmatprep.subr.bf16.mxu0 %v2448_v35  ;;  %867 = vmatprep.subr.bf16.mxu1 %v2476_v41 }
 0x15a   : > { %827 = vmatpush1.bf16.msra.mxu0 %v2465_v38  ;;  %868 = vmatpush1.bf16.msra.mxu1 %v2483_v43 }
 0x15b   : > { %951 = vmatprep.subr.bf16.mxu0 %v2344_v5  ;;  %992 = vmatprep.subr.bf16.mxu1 %v2365_v12 }
 0x210   : > { %v707_v8 = vpop.f32.mrb[4].mxu0  ;;  %v748_v13 = vpop.f32.mrb[4].mxu1 }
 0x211   : > { %v755_v15 = vadd.f32 %v707_v8, %v668_v4  ;;  %v709_v42 = vpop.f32.mrb[5].mxu0  ;;  %v750_v44 = vpop.f32.mrb[5].mxu1  ;;  %v757_v57 = vadd.f32 %v748_v13, %v670_v54 }
 0x212   : > { %v756_v45 = vadd.f32 %v709_v42, %v669_v6  ;;  %v711_v46 = vpop.f32.mrb[6].mxu0  ;;  %v752_v47 = vpop.f32.mrb[6].mxu1  ;;  %v758_v53 = vadd.f32 %v750_v44, %v671_v52 }
 0x213   : > { %v1900_v48 = vmul.f32 -1.442695, %v755_v15  ;;  %v712_v49 = vpop.f32.mrb[7].mxu0  ;;  %v753_v51 = vpop.f32.mrb[7].mxu1 }
 0x214   : > { %v1901_v0 = vmul.f32 -1.442695, %v756_v45  ;;  %v1902_v56 = vmul.f32 -1.442695, %v758_v53  ;;  %v790_v8 = vpop.permute.xlu0 %789  ;;  %v1906_v53 = vld [vmem:[%s2527_s9 + $0x28] sm:$0xff] }
 0x215   : > { %2060 = vpow2.f32 %v1900_v48  ;;  %vm791_vm9 = vcmp.eq.s32.totalorder %v790_v8, 1 }
 0x216   : > { %2062 = vpow2.f32 %v1901_v0 }
 0x217   : > { %2064 = vpow2.f32 %v1902_v56 }
 0x218   : > { %2066 = vtanh.f32 %v757_v57 }
 0x21f   : > { %v2061_v39 = vpop.eup %2060 }
 0x220   : > { %v2063_v58 = vpop.eup %2062  ;;  %v762_v59 = vadd.f32 1.0, %v2061_v39 }
 0x221   : > { %v768_v60 = vadd.f32 1.0, %v2063_v58  ;;  %v2065_v61 = vpop.eup %2064 }
 0x222   : > { %2068 = vrcp.f32 %v762_v59  ;;  %v2067_v62 = vpop.eup %2066  ;;  %v775_v4 = vadd.f32 1.0, %v2065_v61 }
 0x223   : > { %2070 = vrcp.f32 %v768_v60 }
 0x224   : > { %2072 = vrcp.f32 %v775_v4 }
 0x22c   : > { %v2069_v63 = vpop.eup %2068 }
 0x22d   : > { %v2071_v2 = vpop.eup %2070  ;;  %v779_v3 = vmul.f32 %v2069_v63, %v2067_v62  ;;  %v810_v63 = vunpack.c.h.bf16 %v1906_v53 }
 0x22e   : > { %v778_v6 = vmul.f32 %v2071_v2, %v2536_v50  ;;  %v2073_v20 = vpop.eup %2072 }
 0x230   : > { %v780_v13 = vadd.f32 %v779_v3, %v778_v6  ;;  %v809_v3 = vunpack.c.l.bf16 %v1906_v53 }
 0x232   : > { %2074 = vtanh.f32 %v780_v13  ;;  %v2598_v15 = vsel %vm791_vm9, %v780_v13, %v2536_v50  ;;  %v1905_v50 = vld [vmem:[%s2527_s9 + $0x20] sm:$0xff] }
 0x233   : > { %v808_v49 = vunpack.c.h.bf16 %v1905_v50 }
 0x23c   : > { %v2075_v42 = vpop.eup %2074 }
 0x23d   : > { %v782_v44 = vmul.f32 %v2075_v42, %v2073_v20 }
 0x23f   : > { %v792_v45 = vsel %vm791_vm9, %v782_v44, 0.0  ;;  %v2603_v46 = vsel %vm791_vm9, %v782_v44, %v2544_v55  ;;  %v807_v55 = vunpack.c.l.bf16 %v1905_v50 }
 0x240   : > { %v793_v47 = vpack.c.bf16 %v792_v45, %v792_v45  ;;  %v811_v48 = vpack.c.bf16 %v2603_v46, %v2603_v46 }
 0x242   : > { %1904 = vst [vmem:[%s1767_s10 + $0x4] sm:$0xf] %v793_v47  ;;  %845 = vmatmul.mubr.bf16.vlgmr.msra.gmra.mrb[8].mxu0 %v811_v48  ;;  %886 = vmatmul.mubr.bf16.vlgmr.msra.gmra.mrb[8].mxu1 %v811_v48  ;;  %v929_v48 = vpop.permute.xlu1 %928 }
 0x243   : > { %952 = vmatpush1.bf16.msra.mxu0 %v2348_v7  ;;  %993 = vmatpush1.bf16.msra.mxu1 %v2368_v14  ;;  %vm930_vm10 = vcmp.eq.s32.totalorder %v929_v48, 1 }
 0x244   : > { %953 = vmatprep.subr.bf16.mxu0 %v2353_v9  ;;  %994 = vmatprep.subr.bf16.mxu1 %v2383_v18 }
 0x245   : > { %983 = vmatprep.mubr.bf16.mxu0 %v2244_v1  ;;  %1024 = vmatprep.mubr.bf16.mxu1 %v2244_v1 }
 0x247   : > { %954 = vmatpush1.bf16.msra.mxu0 %v2357_v10  ;;  %995 = vmatpush1.bf16.msra.mxu1 %v2386_v19 }
 0x248   : > { %955 = vmatprep.subr.bf16.mxu0 %v2362_v11  ;;  %996 = vmatprep.subr.bf16.mxu1 %v2398_v23 }
 0x24b   : > { %956 = vmatpush1.bf16.msra.mxu0 %v2373_v16  ;;  %997 = vmatpush1.bf16.msra.mxu1 %v2403_v24 }
 0x24c   : > { %957 = vmatprep.subr.bf16.mxu0 %v2379_v17  ;;  %998 = vmatprep.subr.bf16.mxu1 %v2407_v25 }
 0x24f   : > { %958 = vmatpush1.bf16.msra.mxu0 %v2392_v21  ;;  %999 = vmatpush1.bf16.msra.mxu1 %v2419_v28 }
 0x250   : > { %959 = vmatprep.subr.bf16.mxu0 %v2395_v22  ;;  %1000 = vmatprep.subr.bf16.mxu1 %v2423_v29 }
 0x253   : > { %960 = vmatpush1.bf16.msra.mxu0 %v2411_v26  ;;  %1001 = vmatpush1.bf16.msra.mxu1 %v2435_v32 }
 0x254   : > { %961 = vmatprep.subr.bf16.mxu0 %v2415_v27  ;;  %1002 = vmatprep.subr.bf16.mxu1 %v2440_v33 }
 0x257   : > { %962 = vmatpush1.bf16.msra.mxu0 %v2426_v30  ;;  %1003 = vmatpush1.bf16.msra.mxu1 %v2457_v36 }
 0x258   : > { %963 = vmatprep.subr.bf16.mxu0 %v2430_v31  ;;  %1004 = vmatprep.subr.bf16.mxu1 %v2461_v37 }
 0x25b   : > { %964 = vmatpush1.bf16.msra.mxu0 %v2444_v34  ;;  %1005 = vmatpush1.bf16.msra.mxu1 %v2472_v40 }
 0x25c   : > { %965 = vmatprep.subr.bf16.mxu0 %v2448_v35  ;;  %1006 = vmatprep.subr.bf16.mxu1 %v2476_v41 }
 0x25f   : > { %966 = vmatpush1.bf16.msra.mxu0 %v2465_v38  ;;  %1007 = vmatpush1.bf16.msra.mxu1 %v2483_v43 }
 0x260   : > { %1089 = vmatprep.subr.bf16.mxu0 %v2344_v5  ;;  %1130 = vmatprep.subr.bf16.mxu1 %v2365_v12 }
 0x315   : > { %v846_v51 = vpop.f32.mrb[8].mxu0  ;;  %v887_v0 = vpop.f32.mrb[8].mxu1 }
 0x316   : > { %v894_v52 = vadd.f32 %v846_v51, %v807_v55  ;;  %v848_v54 = vpop.f32.mrb[9].mxu0  ;;  %v889_v56 = vpop.f32.mrb[9].mxu1  ;;  %v896_v6 = vadd.f32 %v887_v0, %v809_v3 }
 0x317   : > { %v895_v57 = vadd.f32 %v848_v54, %v808_v49  ;;  %v850_v39 = vpop.f32.mrb[10].mxu0  ;;  %v891_v58 = vpop.f32.mrb[10].mxu1  ;;  %v897_v2 = vadd.f32 %v889_v56, %v810_v63 }
 0x318   : > { %v1907_v59 = vmul.f32 -1.442695, %v894_v52  ;;  %v851_v60 = vpop.f32.mrb[11].mxu0  ;;  %v892_v61 = vpop.f32.mrb[11].mxu1 }
 0x319   : > { %v1908_v62 = vmul.f32 -1.442695, %v895_v57  ;;  %v1909_v4 = vmul.f32 -1.442695, %v897_v2  ;;  %v1913_v2 = vld [vmem:[%s2527_s9 + $0x38] sm:$0xff] }
 0x31a   : > { %2076 = vpow2.f32 %v1907_v59 }
 0x31b   : > { %2078 = vpow2.f32 %v1908_v62 }
 0x31c   : > { %2080 = vpow2.f32 %v1909_v4 }
 0x31d   : > { %2082 = vtanh.f32 %v896_v6 }
 0x324   : > { %v2077_v8 = vpop.eup %2076 }
 0x325   : > { %v2079_v13 = vpop.eup %2078  ;;  %v901_v20 = vadd.f32 1.0, %v2077_v8 }
 0x326   : > { %v907_v42 = vadd.f32 1.0, %v2079_v13  ;;  %v2081_v44 = vpop.eup %2080 }
 0x327   : > { %2084 = vrcp.f32 %v901_v20  ;;  %v2083_v45 = vpop.eup %2082  ;;  %v914_v55 = vadd.f32 1.0, %v2081_v44 }
 0x328   : > { %2086 = vrcp.f32 %v907_v42 }
 0x329   : > { %2088 = vrcp.f32 %v914_v55 }
 0x331   : > { %v2085_v47 = vpop.eup %2084 }
 0x332   : > { %v2087_v50 = vpop.eup %2086  ;;  %v918_v49 = vmul.f32 %v2085_v47, %v2083_v45  ;;  %v949_v47 = vunpack.c.h.bf16 %v1913_v2 }
 0x333   : > { %v917_v51 = vmul.f32 %v2087_v50, %v2598_v15  ;;  %v2089_v53 = vpop.eup %2088 }
 0x335   : > { %v919_v0 = vadd.f32 %v918_v49, %v917_v51 }
 0x337   : > { %2090 = vtanh.f32 %v919_v0  ;;  %v2645_v52 = vsel %vm930_vm10, %v919_v0, %v2598_v15  ;;  %v1912_v15 = vld [vmem:[%s2527_s9 + $0x30] sm:$0xff] }
 0x338   : > { %v947_v60 = vunpack.c.h.bf16 %v1912_v15 }
 0x341   : > { %v2091_v54 = vpop.eup %2090 }
 0x342   : > { %v921_v56 = vmul.f32 %v2091_v54, %v2089_v53 }
 0x344   : > { %v931_v57 = vsel %vm930_vm10, %v921_v56, 0.0  ;;  %v2650_v39 = vsel %vm930_vm10, %v921_v56, %v2603_v46  ;;  %v946_v46 = vunpack.c.l.bf16 %v1912_v15 }
 0x345   : > { %v932_v58 = vpack.c.bf16 %v931_v57, %v931_v57  ;;  %v950_v59 = vpack.c.bf16 %v2650_v39, %v2650_v39 }
 0x347   : > { %1911 = vst [vmem:[%s1771_s12 + $0x8] sm:$0xf] %v932_v58  ;;  %984 = vmatmul.mubr.bf16.vlgmr.msra.gmra.mrb[12].mxu0 %v950_v59  ;;  %1025 = vmatmul.mubr.bf16.vlgmr.msra.gmra.mrb[12].mxu1 %v950_v59 }
 0x348   : > { %1090 = vmatpush1.bf16.msra.mxu0 %v2348_v7  ;;  %1131 = vmatpush1.bf16.msra.mxu1 %v2368_v14 }
 0x349   : > { %1091 = vmatprep.subr.bf16.mxu0 %v2353_v9  ;;  %1132 = vmatprep.subr.bf16.mxu1 %v2383_v18 }
 0x34a   : > { %1121 = vmatprep.mubr.bf16.mxu0 %v2244_v1  ;;  %1162 = vmatprep.mubr.bf16.mxu1 %v2244_v1 }
 0x34c   : > { %1092 = vmatpush1.bf16.msra.mxu0 %v2357_v10  ;;  %1133 = vmatpush1.bf16.msra.mxu1 %v2386_v19 }
 0x34d   : > { %1093 = vmatprep.subr.bf16.mxu0 %v2362_v11  ;;  %1134 = vmatprep.subr.bf16.mxu1 %v2398_v23 }
 0x350   : > { %1094 = vmatpush1.bf16.msra.mxu0 %v2373_v16  ;;  %1135 = vmatpush1.bf16.msra.mxu1 %v2403_v24 }
 0x351   : > { %1095 = vmatprep.subr.bf16.mxu0 %v2379_v17  ;;  %1136 = vmatprep.subr.bf16.mxu1 %v2407_v25 }
 0x354   : > { %1096 = vmatpush1.bf16.msra.mxu0 %v2392_v21  ;;  %1137 = vmatpush1.bf16.msra.mxu1 %v2419_v28 }
 0x355   : > { %1097 = vmatprep.subr.bf16.mxu0 %v2395_v22  ;;  %1138 = vmatprep.subr.bf16.mxu1 %v2423_v29 }
 0x358   : > { %1098 = vmatpush1.bf16.msra.mxu0 %v2411_v26  ;;  %1139 = vmatpush1.bf16.msra.mxu1 %v2435_v32 }
 0x359   : > { %1099 = vmatprep.subr.bf16.mxu0 %v2415_v27  ;;  %1140 = vmatprep.subr.bf16.mxu1 %v2440_v33 }
 0x35c   : > { %1100 = vmatpush1.bf16.msra.mxu0 %v2426_v30  ;;  %1141 = vmatpush1.bf16.msra.mxu1 %v2457_v36 }
 0x35d   : > { %1101 = vmatprep.subr.bf16.mxu0 %v2430_v31  ;;  %1142 = vmatprep.subr.bf16.mxu1 %v2461_v37 }
 0x360   : > { %1102 = vmatpush1.bf16.msra.mxu0 %v2444_v34  ;;  %1143 = vmatpush1.bf16.msra.mxu1 %v2472_v40 }
 0x361   : > { %1103 = vmatprep.subr.bf16.mxu0 %v2448_v35  ;;  %1144 = vmatprep.subr.bf16.mxu1 %v2476_v41 }
 0x364   : > { %1104 = vmatpush1.bf16.msra.mxu0 %v2465_v38  ;;  %1145 = vmatpush1.bf16.msra.mxu1 %v2483_v43 }
 0x365   : > { %1227 = vmatprep.subr.bf16.mxu0 %v2344_v5  ;;  %1268 = vmatprep.subr.bf16.mxu1 %v2365_v12  ;;  %v948_v12 = vunpack.c.l.bf16 %v1913_v2 }
 0x41a   : > { %v985_v61 = vpop.f32.mrb[12].mxu0  ;;  %v1026_v62 = vpop.f32.mrb[12].mxu1 }
 0x41b   : > { %v1033_v63 = vadd.f32 %v985_v61, %v946_v46  ;;  %v987_v3 = vpop.f32.mrb[13].mxu0  ;;  %v1028_v4 = vpop.f32.mrb[13].mxu1  ;;  %v1035_v50 = vadd.f32 %v1026_v62, %v948_v12 }
 0x41c   : > { %v1034_v6 = vadd.f32 %v987_v3, %v947_v60  ;;  %v989_v8 = vpop.f32.mrb[14].mxu0  ;;  %v1030_v13 = vpop.f32.mrb[14].mxu1  ;;  %v1036_v5 = vadd.f32 %v1028_v4, %v949_v47 }
 0x41d   : > { %v1914_v20 = vmul.f32 -1.442695, %v1033_v63  ;;  %v990_v42 = vpop.f32.mrb[15].mxu0  ;;  %v1031_v44 = vpop.f32.mrb[15].mxu1 }
 0x41e   : > { %v1915_v45 = vmul.f32 -1.442695, %v1034_v6  ;;  %v1916_v48 = vmul.f32 -1.442695, %v1036_v5  ;;  %v1067_v46 = vpop.permute.xlu1 %1066  ;;  %v1205_v42 = vpop.permute.xlu0 %1204 }
 0x41f   : > { %2092 = vpow2.f32 %v1914_v20  ;;  %vm1068_vm11 = vcmp.eq.s32.totalorder %v1067_v46, 1  ;;  %vm1206_vm12 = vcmp.eq.s32.totalorder %v1205_v42, 1  ;;  %v2795_v46 = vld [vmem:[%s2340_s14 + $0x48] ss:$16 sps:$4 sm:$0xff]  }
 0x420   : > { %2094 = vpow2.f32 %v1915_v45 }
 0x421   : > { %2096 = vpow2.f32 %v1916_v48 }
 0x422   : > { %2098 = vtanh.f32 %v1035_v50 }
 0x429   : > { %v2093_v55 = vpop.eup %2092 }
 0x42a   : > { %v2095_v49 = vpop.eup %2094  ;;  %v1040_v51 = vadd.f32 1.0, %v2093_v55 }
 0x42b   : > { %v1046_v0 = vadd.f32 1.0, %v2095_v49  ;;  %v2097_v53 = vpop.eup %2096 }
 0x42c   : > { %2100 = vrcp.f32 %v1040_v51  ;;  %v2099_v54 = vpop.eup %2098  ;;  %v1053_v59 = vadd.f32 1.0, %v2097_v53  ;;  %v2757_v51 = vld [vmem:[%s2340_s14] ss:$16 sps:$4 sm:$0xff]   ;;  %v2765_v53 = vld [vmem:[%s2340_s14 + $0x24] ss:$16 sps:$4 sm:$0xff]  }
 0x42d   : > { %2102 = vrcp.f32 %v1046_v0  ;;  %v2761_v0 = vld [vmem:[%s2340_s14 + $0x8] ss:$16 sps:$4 sm:$0xff]  }
 0x42e   : > { %2104 = vrcp.f32 %v1053_v59  ;;  %v2787_v59 = vld [vmem:[%s2340_s14 + $0x4c] ss:$16 sps:$4 sm:$0xff]  }
 0x436   : > { %v2101_v56 = vpop.eup %2100 }
 0x437   : > { %v2103_v57 = vpop.eup %2102  ;;  %v1057_v58 = vmul.f32 %v2101_v56, %v2099_v54  ;;  %v2769_v54 = vld [vmem:[%s2340_s14 + $0x2c] ss:$16 sps:$4 sm:$0xff]   ;;  %v2775_v56 = vld [vmem:[%s2340_s14 + $0x20] ss:$16 sps:$4 sm:$0xff]  }
 0x438   : > { %v1056_v15 = vmul.f32 %v2103_v57, %v2645_v52  ;;  %v2105_v62 = vpop.eup %2104  ;;  %v2779_v57 = vld [vmem:[%s2340_s14 + $0x28] ss:$16 sps:$4 sm:$0xff]  }
 0x43a   : > { %v1058_v60 = vadd.f32 %v1057_v58, %v1056_v15  ;;  %v2783_v58 = vld [vmem:[%s2340_s14 + $0x44] ss:$16 sps:$4 sm:$0xff]   ;;  %v2791_v15 = vld [vmem:[%s2340_s14 + $0x40] ss:$16 sps:$4 sm:$0xff]  }
 0x43c   : > { %2106 = vtanh.f32 %v1058_v60  ;;  %v2692_v61 = vsel %vm1068_vm11, %v1058_v60, %v2645_v52  ;;  %v2799_v60 = vld [vmem:[%s2340_s14 + $0x64] ss:$16 sps:$4 sm:$0xff]  }
 0x446   : > { %v2107_v63 = vpop.eup %2106 }
 0x447   : > { %v1060_v2 = vmul.f32 %v2107_v63, %v2105_v62  ;;  %v2807_v62 = vld [vmem:[%s2340_s14 + $0x60] ss:$16 sps:$4 sm:$0xff]   ;;  %v2811_v63 = vld [vmem:[%s2340_s14 + $0x68] ss:$16 sps:$4 sm:$0xff]  }
 0x449   : > { %v1069_v3 = vsel %vm1068_vm11, %v1060_v2, 0.0  ;;  %v2699_v4 = vsel %vm1068_vm11, %v1060_v2, %v2650_v39  ;;  %v2815_v2 = vld [vmem:[%s2340_s14 + $0x84] ss:$16 sps:$4 sm:$0xff]  }
 0x44a   : > { %v1070_v6 = vpack.c.bf16 %v1069_v3, %v1069_v3  ;;  %v1088_v8 = vpack.c.bf16 %v2699_v4, %v2699_v4  ;;  %v2819_v3 = vld [vmem:[%s2340_s14 + $0x8c] ss:$16 sps:$4 sm:$0xff]  }
 0x44c   : > { %1918 = vst [vmem:[%s1774_s13 + $0xc] sm:$0xf] %v1070_v6  ;;  %1122 = vmatmul.mubr.bf16.vlgmr.msra.gmra.mrb[16].mxu0 %v1088_v8  ;;  %1163 = vmatmul.mubr.bf16.vlgmr.msra.gmra.mrb[16].mxu1 %v1088_v8  ;;  %v2827_v6 = vld [vmem:[%s2340_s14 + $0x88] ss:$16 sps:$4 sm:$0xff]   ;;  %v2831_v8 = vld [vmem:[%s2340_s14 + $0xa4] ss:$16 sps:$4 sm:$0xff]  }
 0x44d   : > { %1228 = vmatpush1.bf16.msra.mxu0 %v2348_v7  ;;  %1269 = vmatpush1.bf16.msra.mxu1 %v2368_v14  ;;  %v2736_v7 = vld [vmem:[%s2340_s14 + $0x4] ss:$16 sps:$4 sm:$0xff]  }
 0x44e   : > { %1229 = vmatprep.subr.bf16.mxu0 %v2353_v9  ;;  %1270 = vmatprep.subr.bf16.mxu1 %v2383_v18  ;;  %v2740_v9 = vld [vmem:[%s2340_s14 + $0xc] ss:$16 sps:$4 sm:$0xff]  }
 0x44f   : > { %1259 = vmatprep.mubr.bf16.mxu0 %v2244_v1  ;;  %1300 = vmatprep.mubr.bf16.mxu1 %v2244_v1 }
 0x451   : > { %1230 = vmatpush1.bf16.msra.mxu0 %v2357_v10  ;;  %1271 = vmatpush1.bf16.msra.mxu1 %v2386_v19  ;;  %v1919_v10 = vld [vmem:[%s2527_s9 + $0x40] sm:$0xff]  ;;  %v1920_v19 = vld [vmem:[%s2527_s9 + $0x48] sm:$0xff] }
 0x452   : > { %1231 = vmatprep.subr.bf16.mxu0 %v2362_v11  ;;  %1272 = vmatprep.subr.bf16.mxu1 %v2398_v23  ;;  %v1084_v11 = vunpack.c.l.bf16 %v1919_v10  ;;  %v1085_v14 = vunpack.c.h.bf16 %v1919_v10  ;;  %v2835_v10 = vld [vmem:[%s2340_s14 + $0xac] ss:$16 sps:$4 sm:$0xff]  }
 0x455   : > { %1232 = vmatpush1.bf16.msra.mxu0 %v2373_v16  ;;  %1273 = vmatpush1.bf16.msra.mxu1 %v2403_v24 }
 0x456   : > { %1233 = vmatprep.subr.bf16.mxu0 %v2379_v17  ;;  %1274 = vmatprep.subr.bf16.mxu1 %v2407_v25 }
 0x459   : > { %1234 = vmatpush1.bf16.msra.mxu0 %v2392_v21  ;;  %1275 = vmatpush1.bf16.msra.mxu1 %v2419_v28 }
 0x45a   : > { %1235 = vmatprep.subr.bf16.mxu0 %v2395_v22  ;;  %1276 = vmatprep.subr.bf16.mxu1 %v2423_v29 }
 0x45d   : > { %1236 = vmatpush1.bf16.msra.mxu0 %v2411_v26  ;;  %1277 = vmatpush1.bf16.msra.mxu1 %v2435_v32  ;;  %v1086_v32 = vunpack.c.l.bf16 %v1920_v19 }
 0x45e   : > { %1237 = vmatprep.subr.bf16.mxu0 %v2415_v27  ;;  %1278 = vmatprep.subr.bf16.mxu1 %v2440_v33 }
 0x461   : > { %1238 = vmatpush1.bf16.msra.mxu0 %v2426_v30  ;;  %1279 = vmatpush1.bf16.msra.mxu1 %v2457_v36  ;;  %v1087_v30 = vunpack.c.h.bf16 %v1920_v19  ;;  %v2859_v19 = vld [vmem:[%s2340_s14 + $0xc8] ss:$16 sps:$4 sm:$0xff]  }
 0x462   : > { %1239 = vmatprep.subr.bf16.mxu0 %v2430_v31  ;;  %1280 = vmatprep.subr.bf16.mxu1 %v2461_v37 }
 0x465   : > { %1240 = vmatpush1.bf16.msra.mxu0 %v2444_v34  ;;  %1281 = vmatpush1.bf16.msra.mxu1 %v2472_v40 }
 0x466   : > { %1241 = vmatprep.subr.bf16.mxu0 %v2448_v35  ;;  %1282 = vmatprep.subr.bf16.mxu1 %v2476_v41 }
 0x469   : > { %1242 = vmatpush1.bf16.msra.mxu0 %v2465_v38  ;;  %1283 = vmatpush1.bf16.msra.mxu1 %v2483_v43 }
 0x46a   : > { %1366 = vmatprep.subr.bf16.mxu0 %v2736_v7  ;;  %1407 = vmatprep.subr.bf16.mxu1 %v2740_v9 }
 0x51f   : > { %v1123_v16 = vpop.f32.mrb[16].mxu0  ;;  %v1164_v17 = vpop.f32.mrb[16].mxu1 }
 0x520   : > { %v1171_v18 = vadd.f32 %v1123_v16, %v1084_v11  ;;  %v1125_v21 = vpop.f32.mrb[17].mxu0  ;;  %v1166_v22 = vpop.f32.mrb[17].mxu1  ;;  %v1173_v34 = vadd.f32 %v1164_v17, %v1086_v32  ;;  %v2839_v11 = vld [vmem:[%s2340_s14 + $0xa0] ss:$16 sps:$4 sm:$0xff]   ;;  %v2847_v16 = vld [vmem:[%s2340_s14 + $0xc4] ss:$16 sps:$4 sm:$0xff]  }
 0x521   : > { %v1172_v23 = vadd.f32 %v1125_v21, %v1085_v14  ;;  %v1127_v24 = vpop.f32.mrb[18].mxu0  ;;  %v1168_v25 = vpop.f32.mrb[18].mxu1  ;;  %v1174_v31 = vadd.f32 %v1166_v22, %v1087_v30  ;;  %v2843_v14 = vld [vmem:[%s2340_s14 + $0xa8] ss:$16 sps:$4 sm:$0xff]   ;;  %v2851_v17 = vld [vmem:[%s2340_s14 + $0xcc] ss:$16 sps:$4 sm:$0xff]  }
 0x522   : > { %v1921_v26 = vmul.f32 -1.442695, %v1171_v18  ;;  %v1128_v27 = vpop.f32.mrb[19].mxu0  ;;  %v1169_v28 = vpop.f32.mrb[19].mxu1  ;;  %v2855_v18 = vld [vmem:[%s2340_s14 + $0xc0] ss:$16 sps:$4 sm:$0xff]  }
 0x523   : > { %v1922_v29 = vmul.f32 -1.442695, %v1172_v23  ;;  %v1923_v33 = vmul.f32 -1.442695, %v1174_v31  ;;  %v2863_v21 = vld [vmem:[%s2340_s14 + $0xe4] ss:$16 sps:$4 sm:$0xff]  }
 0x524   : > { %2108 = vpow2.f32 %v1921_v26  ;;  %v2867_v22 = vld [vmem:[%s2340_s14 + $0xec] ss:$16 sps:$4 sm:$0xff]   ;;  %v2871_v23 = vld [vmem:[%s2340_s14 + $0xe0] ss:$16 sps:$4 sm:$0xff]   ;;  %v2875_v24 = vld [vmem:[%s2340_s14 + $0xe8] ss:$16 sps:$4 sm:$0xff]  }
 0x525   : > { %2110 = vpow2.f32 %v1922_v29  ;;  %v1925_v25 = vld [vmem:[%s2527_s9 + $0x50] sm:$0xff]  ;;  %v1926_v31 = vld [vmem:[%s2527_s9 + $0x58] sm:$0xff] }
 0x526   : > { %2112 = vpow2.f32 %v1923_v33  ;;  %v1222_v26 = vunpack.c.l.bf16 %v1925_v25  ;;  %v1223_v27 = vunpack.c.h.bf16 %v1925_v25 }
 0x527   : > { %2114 = vtanh.f32 %v1173_v34 }
 0x52e   : > { %v2109_v35 = vpop.eup %2108 }
 0x52f   : > { %v2111_v36 = vpop.eup %2110  ;;  %v1178_v37 = vadd.f32 1.0, %v2109_v35 }
 0x530   : > { %v1184_v38 = vadd.f32 1.0, %v2111_v36  ;;  %v2113_v40 = vpop.eup %2112 }
 0x531   : > { %2116 = vrcp.f32 %v1178_v37  ;;  %v2115_v41 = vpop.eup %2114  ;;  %v1191_v13 = vadd.f32 1.0, %v2113_v40 }
 0x532   : > { %2118 = vrcp.f32 %v1184_v38 }
 0x533   : > { %2120 = vrcp.f32 %v1191_v13 }
 0x53b   : > { %v2117_v43 = vpop.eup %2116 }
 0x53c   : > { %v2119_v52 = vpop.eup %2118  ;;  %v1195_v39 = vmul.f32 %v2117_v43, %v2115_v41  ;;  %v1225_v43 = vunpack.c.h.bf16 %v1926_v31 }
 0x53d   : > { %v1194_v20 = vmul.f32 %v2119_v52, %v2692_v61  ;;  %v2121_v47 = vpop.eup %2120 }
 0x53f   : > { %v1196_v44 = vadd.f32 %v1195_v39, %v1194_v20 }
 0x541   : > { %2122 = vtanh.f32 %v1196_v44  ;;  %v2747_v45 = vsel %vm1206_vm12, %v1196_v44, %v2692_v61  ;;  %v2803_v61 = vld [vmem:[%s2340_s14 + $0x6c] ss:$16 sps:$4 sm:$0xff]  }
 0x54b   : > { %v2123_v5 = vpop.eup %2122 }
 0x54c   : > { %v1198_v12 = vmul.f32 %v2123_v5, %v2121_v47 }
 0x54e   : > { %v1207_v48 = vsel %vm1206_vm12, %v1198_v12, 0.0  ;;  %v2752_v50 = vsel %vm1206_vm12, %v1198_v12, %v2699_v4  ;;  %v2823_v4 = vld [vmem:[%s2340_s14 + $0x80] ss:$16 sps:$4 sm:$0xff]   ;;  %s1930_s14 = smul.u32 4294967284, %s2234_s20 }
 0x54f   : > { %v1208_v55 = vpack.c.bf16 %v1207_v48, %v1207_v48  ;;  %v1226_v49 = vpack.c.bf16 %v2752_v50, %v2752_v50 }
 0x550   : > { %s1780_s23 = scalar_lea.vmem %s2540_s16, %s1930_s14 [#allocation4] }
 0x551   : > { %1211 = vst [vmem:[%s1210_s18] sm:$0xf] %v1208_v55  ;;  %1260 = vmatmul.mubr.bf16.vlgmr.msra.gmra.mrb[20].mxu0 %v1226_v49  ;;  %1301 = vmatmul.mubr.bf16.vlgmr.msra.gmra.mrb[20].mxu1 %v1226_v49 }
 0x552   : > { %1367 = vmatpush1.bf16.msra.mxu0 %v2757_v51  ;;  %1408 = vmatpush1.bf16.msra.mxu1 %v2761_v0 }
 0x553   : > { %1368 = vmatprep.subr.bf16.mxu0 %v2765_v53  ;;  %1409 = vmatprep.subr.bf16.mxu1 %v2769_v54 }
 0x554   : > { %1398 = vmatprep.mubr.bf16.mxu0 %v2244_v1  ;;  %1439 = vmatprep.mubr.bf16.mxu1 %v2244_v1 }
 0x556   : > { %1369 = vmatpush1.bf16.msra.mxu0 %v2775_v56  ;;  %1410 = vmatpush1.bf16.msra.mxu1 %v2779_v57 }
 0x557   : > { %1370 = vmatprep.subr.bf16.mxu0 %v2783_v58  ;;  %1411 = vmatprep.subr.bf16.mxu1 %v2787_v59 }
 0x55a   : > { %1371 = vmatpush1.bf16.msra.mxu0 %v2791_v15  ;;  %1412 = vmatpush1.bf16.msra.mxu1 %v2795_v46 }
 0x55b   : > { %1372 = vmatprep.subr.bf16.mxu0 %v2799_v60  ;;  %1413 = vmatprep.subr.bf16.mxu1 %v2803_v61 }
 0x55e   : > { %1373 = vmatpush1.bf16.msra.mxu0 %v2807_v62  ;;  %1414 = vmatpush1.bf16.msra.mxu1 %v2811_v63 }
 0x55f   : > { %1374 = vmatprep.subr.bf16.mxu0 %v2815_v2  ;;  %1415 = vmatprep.subr.bf16.mxu1 %v2819_v3 }
 0x562   : > { %1375 = vmatpush1.bf16.msra.mxu0 %v2823_v4  ;;  %1416 = vmatpush1.bf16.msra.mxu1 %v2827_v6 }
 0x563   : > { %1376 = vmatprep.subr.bf16.mxu0 %v2831_v8  ;;  %1417 = vmatprep.subr.bf16.mxu1 %v2835_v10 }
 0x566   : > { %1377 = vmatpush1.bf16.msra.mxu0 %v2839_v11  ;;  %1418 = vmatpush1.bf16.msra.mxu1 %v2843_v14 }
 0x567   : > { %1378 = vmatprep.subr.bf16.mxu0 %v2847_v16  ;;  %1419 = vmatprep.subr.bf16.mxu1 %v2851_v17 }
 0x56a   : > { %1379 = vmatpush1.bf16.msra.mxu0 %v2855_v18  ;;  %1420 = vmatpush1.bf16.msra.mxu1 %v2859_v19 }
 0x56b   : > { %1380 = vmatprep.subr.bf16.mxu0 %v2863_v21  ;;  %1421 = vmatprep.subr.bf16.mxu1 %v2867_v22 }
 0x56e   : > { %1381 = vmatpush1.bf16.msra.mxu0 %v2871_v23  ;;  %1422 = vmatpush1.bf16.msra.mxu1 %v2875_v24 }
 0x56f   : > { %1505 = vmatprep.subr.bf16.mxu0 %v2736_v7  ;;  %1546 = vmatprep.subr.bf16.mxu1 %v2740_v9  ;;  %v1224_v9 = vunpack.c.l.bf16 %v1926_v31 }
 0x624   : > { %v1261_v28 = vpop.f32.mrb[20].mxu0  ;;  %v1302_v29 = vpop.f32.mrb[20].mxu1 }
 0x625   : > { %v1309_v30 = vadd.f32 %v1261_v28, %v1222_v26  ;;  %v1263_v32 = vpop.f32.mrb[21].mxu0  ;;  %v1304_v33 = vpop.f32.mrb[21].mxu1  ;;  %v1311_v39 = vadd.f32 %v1302_v29, %v1224_v9 }
 0x626   : > { %v1310_v34 = vadd.f32 %v1263_v32, %v1223_v27  ;;  %v1265_v35 = vpop.f32.mrb[22].mxu0  ;;  %v1306_v36 = vpop.f32.mrb[22].mxu1  ;;  %v1312_v7 = vadd.f32 %v1304_v33, %v1225_v43 }
 0x627   : > { %v1927_v37 = vmul.f32 -1.442695, %v1309_v30  ;;  %v1266_v38 = vpop.f32.mrb[23].mxu0  ;;  %v1307_v40 = vpop.f32.mrb[23].mxu1 }
 0x628   : > { %v1928_v41 = vmul.f32 -1.442695, %v1310_v34  ;;  %v1929_v52 = vmul.f32 -1.442695, %v1312_v7  ;;  %v1344_v26 = vpop.permute.xlu1 %1343 }
 0x629   : > { %2124 = vpow2.f32 %v1927_v37  ;;  %vm1345_vm13 = vcmp.eq.s32.totalorder %v1344_v26, 1 }
 0x62a   : > { %2126 = vpow2.f32 %v1928_v41 }
 0x62b   : > { %2128 = vpow2.f32 %v1929_v52 }
 0x62c   : > { %2130 = vtanh.f32 %v1311_v39  ;;  %v1939_v39 = vld [vmem:[%s2527_s9 + $0x70] sm:$0xff] }
 0x633   : > { %v2125_v13 = vpop.eup %2124 }
 0x634   : > { %v2127_v20 = vpop.eup %2126  ;;  %v1316_v42 = vadd.f32 1.0, %v2125_v13  ;;  %v1500_v13 = vunpack.c.l.bf16 %v1939_v39 }
 0x635   : > { %v1322_v44 = vadd.f32 1.0, %v2127_v20  ;;  %v2129_v47 = vpop.eup %2128  ;;  %v1501_v20 = vunpack.c.h.bf16 %v1939_v39 }
 0x636   : > { %2132 = vrcp.f32 %v1316_v42  ;;  %v2131_v5 = vpop.eup %2130  ;;  %v1329_v49 = vadd.f32 1.0, %v2129_v47 }
 0x637   : > { %2134 = vrcp.f32 %v1322_v44 }
 0x638   : > { %2136 = vrcp.f32 %v1329_v49 }
 0x640   : > { %v2133_v12 = vpop.eup %2132 }
 0x641   : > { %v2135_v48 = vpop.eup %2134  ;;  %v1333_v55 = vmul.f32 %v2133_v12, %v2131_v5  ;;  %v1940_v5 = vld [vmem:[%s2527_s9 + $0x78] sm:$0xff] }
 0x642   : > { %v1332_v25 = vmul.f32 %v2135_v48, %v2747_v45  ;;  %v2137_v29 = vpop.eup %2136 }
 0x644   : > { %v1334_v27 = vadd.f32 %v1333_v55, %v1332_v25 }
 0x646   : > { %2138 = vtanh.f32 %v1334_v27  ;;  %v2884_v28 = vsel %vm1345_vm13, %v1334_v27, %v2747_v45 }
 0x650   : > { %v2139_v30 = vpop.eup %2138 }
 0x651   : > { %v1336_v31 = vmul.f32 %v2139_v30, %v2137_v29  ;;  %v1503_v30 = vunpack.c.h.bf16 %v1940_v5 }
 0x653   : > { %v1346_v32 = vsel %vm1345_vm13, %v1336_v31, 0.0  ;;  %v2889_v33 = vsel %vm1345_vm13, %v1336_v31, %v2752_v50 }
 0x654   : > { %v1347_v34 = vpack.c.bf16 %v1346_v32, %v1346_v32  ;;  %v1365_v35 = vpack.c.bf16 %v2889_v33, %v2889_v33  ;;  %v1502_v32 = vunpack.c.l.bf16 %v1940_v5 }
 0x656   : > { %1931 = vst [vmem:[%s1780_s23 + $0x14] sm:$0xf] %v1347_v34  ;;  %1399 = vmatmul.mubr.bf16.vlgmr.msra.gmra.mrb[24].mxu0 %v1365_v35  ;;  %1440 = vmatmul.mubr.bf16.vlgmr.msra.gmra.mrb[24].mxu1 %v1365_v35 }
 0x657   : > { %1506 = vmatpush1.bf16.msra.mxu0 %v2757_v51  ;;  %1547 = vmatpush1.bf16.msra.mxu1 %v2761_v0 }
 0x658   : > { %1507 = vmatprep.subr.bf16.mxu0 %v2765_v53  ;;  %1548 = vmatprep.subr.bf16.mxu1 %v2769_v54  ;;  %v1933_v54 = vld [vmem:[%s2527_s9 + $0x68] sm:$0xff] }
 0x659   : > { %1537 = vmatprep.mubr.bf16.mxu0 %v2244_v1  ;;  %1578 = vmatprep.mubr.bf16.mxu1 %v2244_v1  ;;  %v1932_v1 = vld [vmem:[%s2527_s9 + $0x60] sm:$0xff]  ;;  %s1944_s9 = smul.u32 4294967268, %s2234_s20 }
 0x65a   : > { %v1361_v45 = vunpack.c.l.bf16 %v1932_v1  ;;  %v1362_v50 = vunpack.c.h.bf16 %v1932_v1 }
 0x65b   : > { %1508 = vmatpush1.bf16.msra.mxu0 %v2775_v56  ;;  %1549 = vmatpush1.bf16.msra.mxu1 %v2779_v57  ;;  %s1788_s29 = scalar_lea.vmem %s2540_s16, %s1944_s9 [#allocation4] }
 0x65c   : > { %1509 = vmatprep.subr.bf16.mxu0 %v2783_v58  ;;  %1550 = vmatprep.subr.bf16.mxu1 %v2787_v59 }
 0x65f   : > { %1510 = vmatpush1.bf16.msra.mxu0 %v2791_v15  ;;  %1551 = vmatpush1.bf16.msra.mxu1 %v2795_v46 }
 0x660   : > { %1511 = vmatprep.subr.bf16.mxu0 %v2799_v60  ;;  %1552 = vmatprep.subr.bf16.mxu1 %v2803_v61 }
 0x663   : > { %1512 = vmatpush1.bf16.msra.mxu0 %v2807_v62  ;;  %1553 = vmatpush1.bf16.msra.mxu1 %v2811_v63  ;;  %v1364_v63 = vunpack.c.h.bf16 %v1933_v54 }
 0x664   : > { %1513 = vmatprep.subr.bf16.mxu0 %v2815_v2  ;;  %1554 = vmatprep.subr.bf16.mxu1 %v2819_v3  ;;  %v1363_v3 = vunpack.c.l.bf16 %v1933_v54 }
 0x667   : > { %1514 = vmatpush1.bf16.msra.mxu0 %v2823_v4  ;;  %1555 = vmatpush1.bf16.msra.mxu1 %v2827_v6 }
 0x668   : > { %1515 = vmatprep.subr.bf16.mxu0 %v2831_v8  ;;  %1556 = vmatprep.subr.bf16.mxu1 %v2835_v10 }
 0x66b   : > { %1516 = vmatpush1.bf16.msra.mxu0 %v2839_v11  ;;  %1557 = vmatpush1.bf16.msra.mxu1 %v2843_v14 }
 0x66c   : > { %1517 = vmatprep.subr.bf16.mxu0 %v2847_v16  ;;  %1558 = vmatprep.subr.bf16.mxu1 %v2851_v17 }
 0x66f   : > { %1518 = vmatpush1.bf16.msra.mxu0 %v2855_v18  ;;  %1559 = vmatpush1.bf16.msra.mxu1 %v2859_v19 }
 0x670   : > { %1519 = vmatprep.subr.bf16.mxu0 %v2863_v21  ;;  %1560 = vmatprep.subr.bf16.mxu1 %v2867_v22 }
 0x673   : > { %1520 = vmatpush1.bf16.msra.mxu0 %v2871_v23  ;;  %1561 = vmatpush1.bf16.msra.mxu1 %v2875_v24  ;;  %v1483_v23 = vpop.permute.xlu0 %1482 }
 0x674   : > { %vm1484_vm14 = vcmp.eq.s32.totalorder %v1483_v23, 1 }
 0x729   : > { %v1400_v51 = vpop.f32.mrb[24].mxu0  ;;  %v1441_v0 = vpop.f32.mrb[24].mxu1 }
 0x72a   : > { %v1448_v53 = vadd.f32 %v1400_v51, %v1361_v45  ;;  %v1402_v56 = vpop.f32.mrb[25].mxu0  ;;  %v1443_v57 = vpop.f32.mrb[25].mxu1  ;;  %v1450_v6 = vadd.f32 %v1441_v0, %v1363_v3 }
 0x72b   : > { %v1449_v58 = vadd.f32 %v1402_v56, %v1362_v50  ;;  %v1404_v59 = vpop.f32.mrb[26].mxu0  ;;  %v1445_v15 = vpop.f32.mrb[26].mxu1  ;;  %v1451_v2 = vadd.f32 %v1443_v57, %v1364_v63 }
 0x72c   : > { %v1934_v46 = vmul.f32 -1.442695, %v1448_v53  ;;  %v1405_v60 = vpop.f32.mrb[27].mxu0  ;;  %v1446_v61 = vpop.f32.mrb[27].mxu1 }
 0x72d   : > { %v1935_v62 = vmul.f32 -1.442695, %v1449_v58  ;;  %v1936_v4 = vmul.f32 -1.442695, %v1451_v2 }
 0x72e   : > { %2140 = vpow2.f32 %v1934_v46  ;;  %v1622_v46 = vpop.permute.xlu1 %1621 }
 0x72f   : > { %2142 = vpow2.f32 %v1935_v62  ;;  %vm1623_vm15 = vcmp.eq.s32.totalorder %v1622_v46, 1 }
 0x730   : > { %2144 = vpow2.f32 %v1936_v4 }
 0x731   : > { %2146 = vtanh.f32 %v1450_v6 }
 0x738   : > { %v2141_v8 = vpop.eup %2140 }
 0x739   : > { %v2143_v10 = vpop.eup %2142  ;;  %v1455_v11 = vadd.f32 1.0, %v2141_v8 }
 0x73a   : > { %v1461_v14 = vadd.f32 1.0, %v2143_v10  ;;  %v2145_v16 = vpop.eup %2144 }
 0x73b   : > { %2148 = vrcp.f32 %v1455_v11  ;;  %v2147_v17 = vpop.eup %2146  ;;  %v1468_v22 = vadd.f32 1.0, %v2145_v16 }
 0x73c   : > { %2150 = vrcp.f32 %v1461_v14 }
 0x73d   : > { %2152 = vrcp.f32 %v1468_v22 }
 0x745   : > { %v2149_v18 = vpop.eup %2148 }
 0x746   : > { %v2151_v19 = vpop.eup %2150  ;;  %v1472_v21 = vmul.f32 %v2149_v18, %v2147_v17 }
 0x747   : > { %v1471_v24 = vmul.f32 %v2151_v19, %v2884_v28  ;;  %v2153_v38 = vpop.eup %2152 }
 0x749   : > { %v1473_v36 = vadd.f32 %v1472_v21, %v1471_v24 }
 0x74b   : > { %2154 = vtanh.f32 %v1473_v36  ;;  %v1491_v37 = vsel %vm1484_vm14, %v1473_v36, %v2884_v28 }
 0x755   : > { %v2155_v40 = vpop.eup %2154 }
 0x756   : > { %v1475_v41 = vmul.f32 %v2155_v40, %v2153_v38 }
 0x758   : > { %v1485_v43 = vsel %vm1484_vm14, %v1475_v41, 0.0  ;;  %v1490_v7 = vsel %vm1484_vm14, %v1475_v41, %v2889_v33 }
 0x759   : > { %v1486_v9 = vpack.c.bf16 %v1485_v43, %v1485_v43  ;;  %v1504_v52 = vpack.c.bf16 %v1490_v7, %v1490_v7 }
 0x75b   : > { %1938 = vst [vmem:[%s1784_s27 + $0x18] sm:$0xf] %v1486_v9  ;;  %1538 = vmatmul.mubr.bf16.vlgmr.msra.gmra.mrb[28].mxu0 %v1504_v52  ;;  %1579 = vmatmul.mubr.bf16.vlgmr.msra.gmra.mrb[28].mxu1 %v1504_v52 }
 0x82e   : > { %v1539_v42 = vpop.f32.mrb[28].mxu0  ;;  %v1580_v44 = vpop.f32.mrb[28].mxu1 }
 0x82f   : > { %v1587_v47 = vadd.f32 %v1539_v42, %v1500_v13  ;;  %v1541_v12 = vpop.f32.mrb[29].mxu0  ;;  %v1582_v48 = vpop.f32.mrb[29].mxu1  ;;  %v1589_v34 = vadd.f32 %v1580_v44, %v1502_v32 }
 0x830   : > { %v1588_v55 = vadd.f32 %v1541_v12, %v1501_v20  ;;  %v1543_v49 = vpop.f32.mrb[30].mxu0  ;;  %v1584_v25 = vpop.f32.mrb[30].mxu1  ;;  %v1590_v31 = vadd.f32 %v1582_v48, %v1503_v30 }
 0x831   : > { %v1941_v26 = vmul.f32 -1.442695, %v1587_v47  ;;  %v1544_v27 = vpop.f32.mrb[31].mxu0  ;;  %v1585_v28 = vpop.f32.mrb[31].mxu1 }
 0x832   : > { %v1942_v29 = vmul.f32 -1.442695, %v1588_v55  ;;  %v1943_v33 = vmul.f32 -1.442695, %v1590_v31 }
 0x833   : > { %2156 = vpow2.f32 %v1941_v26 }
 0x834   : > { %2158 = vpow2.f32 %v1942_v29 }
 0x835   : > { %2160 = vpow2.f32 %v1943_v33 }
 0x836   : > { %2162 = vtanh.f32 %v1589_v34 }
 0x83d   : > { %v2157_v35 = vpop.eup %2156 }
 0x83e   : > { %v2159_v1 = vpop.eup %2158  ;;  %v1594_v45 = vadd.f32 1.0, %v2157_v35 }
 0x83f   : > { %v1600_v50 = vadd.f32 1.0, %v2159_v1  ;;  %v2161_v51 = vpop.eup %2160 }
 0x840   : > { %2164 = vrcp.f32 %v1594_v45  ;;  %v2163_v0 = vpop.eup %2162  ;;  %v1607_v57 = vadd.f32 1.0, %v2161_v51 }
 0x841   : > { %2166 = vrcp.f32 %v1600_v50 }
 0x842   : > { %2168 = vrcp.f32 %v1607_v57 }
 0x84a   : > { %v2165_v53 = vpop.eup %2164 }
 0x84b   : > { %v2167_v54 = vpop.eup %2166  ;;  %v1611_v56 = vmul.f32 %v2165_v53, %v2163_v0 }
 0x84c   : > { %v1610_v58 = vmul.f32 %v2167_v54, %v1491_v37  ;;  %v2169_v15 = vpop.eup %2168 }
 0x84e   : > { %v1612_v59 = vadd.f32 %v1611_v56, %v1610_v58 }
 0x850   : > { %2170 = vtanh.f32 %v1612_v59 }
 0x85a   : > { %v2171_v60 = vpop.eup %2170  ;;  %1639 = sbr.rel (!%p2307_p3) target bundleno = 2157 (0x86d), region = 48 }
 0x85b   : > { %v1614_v61 = vmul.f32 %v2171_v60, %v2169_v15 }
 0x85d   : > { %v1624_v62 = vsel %vm1623_vm15, %v1614_v61, 0.0 }
 0x85e   : > { %v1625_v63 = vpack.c.bf16 %v1624_v62, %v1624_v62 }
 0x860   : > { %1945 = vst [vmem:[%s1788_s29 + $0x1c] sm:$0xf] %v1625_v63 }
 0x867   : > { %v1664_v2 = vld [vmem:[%s2540_s16] sm:$0xf]  ;;  %v1666_v3 = vld [vmem:[%s2540_s16 + $0x4] sm:$0xf]  ;;  %v1668_v4 = vld [vmem:[%s2540_s16 + $0x8] sm:$0xf] }
 0x868   : > { %1665 = vst [vmem:[%s1648_s7] sm:$0xf] %v1664_v2  ;;  %1667 = vst [vmem:[%s1648_s7 + $0x8] sm:$0xf] %v1666_v3  ;;  %v1670_v6 = vld [vmem:[%s2540_s16 + $0xc] sm:$0xf] }
 0x869   : > { %1669 = vst [vmem:[%s1648_s7 + $0x10] sm:$0xf] %v1668_v4  ;;  %v1672_v8 = vld [vmem:[%s2540_s16 + $0x10] sm:$0xf]  ;;  %v1674_v10 = vld [vmem:[%s2540_s16 + $0x14] sm:$0xf] }
 0x86a   : > { %1671 = vst [vmem:[%s1648_s7 + $0x18] sm:$0xf] %v1670_v6  ;;  %1673 = vst [vmem:[%s1648_s7 + $0x20] sm:$0xf] %v1672_v8  ;;  %v1676_v11 = vld [vmem:[%s2540_s16 + $0x18] sm:$0xf] }
 0x86b   : > { %1675 = vst [vmem:[%s1648_s7 + $0x28] sm:$0xf] %v1674_v10  ;;  %v1678_v14 = vld [vmem:[%s2540_s16 + $0x1c] sm:$0xf]  ;;  %1677 = vst [vmem:[%s1648_s7 + $0x30] sm:$0xf] %v1676_v11 }
 0x86c   : > { %1679 = vst [vmem:[%s1648_s7 + $0x38] sm:$0xf] %v1678_v14 }
 0x86d PF: > { %s15_s22 = sadd.s32 1, %s2242_s22   ;;  %s2973_s18 = smov %s2230_s19 }
 0x86e   : > { %p12_p9 = scmp.ge.s32.totalorder %s15_s22, 4   ;;  %s2974_s19 = smov %s2316_s28 }
 0x86f   : > { %s2975_s20 = smov %s2238_s21  ;;  %s2976_s21 = smov %s2978_s24 }
 0x870   :  { %14 = sbr.rel (!%p12_p9) target bundleno = 3 (0x3), region = 139 }

</bundles_post_ra>
